<compile_context>
chip_gen: v7x
topology: tpu7x:2x2x1
jax: 0.10.0
libtpu: 0.0.40
codegen_flags: <defaults>
</compile_context>

<pallas_src>
import functools

import jax
import jax.numpy as jnp
from jax.experimental import pallas as pl
from jax.experimental.pallas import tpu as pltpu


# ---------------------------------------------------------------------------
# Fused Pallas kernel: whole forward (stem + block + pool + FC) in one call
# ---------------------------------------------------------------------------
def _fused_forward_kernel(pstem_ref, mask_ref, ws_ref, bs_ref, w1_ref, b1_ref,
                          w2_ref, b2_ref, fcwt_ref, fcbt_ref, pool_ref, o_ref,
                          *, Ww):
    """pstem_ref : (9*Cin, M)   host-built stem im2col patches (channels-first, lane-dense M)
       mask_ref  : (9, M)       per-tap halo masks (1 inside the image, 0 where pad would be)
       ws_ref    : (C, 9*Cin)   stem weight, BN scale folded
       w1/w2_ref : (C, 9*C)     block conv weights, BN scale folded
       b*_ref    : (C, 1)       folded BN biases
       fcwt_ref  : (classes, C) transposed FC weight
       fcbt_ref  : (classes, 1) FC bias
       pool_ref  : (M, N)       global-average-pool matrix (1/(H*W) on own image's positions)
       o_ref     : (classes, N) transposed logits
    """
    M = pstem_ref.shape[1]
    masks = mask_ref[...]                                           # (9, M)

    # --- stem conv3x3 (+folded BN) + ReLU: one deep-K matmul on host-built patches
    act1 = jnp.maximum(
        jnp.dot(ws_ref[...], pstem_ref[...], preferred_element_type=jnp.float32)
        + bs_ref[...], 0.0)                                         # (C, M)

    def conv3x3(act, w_ref, b_ref):
        # 3x3 "same" conv as ONE (C, 9C) @ (9C, M) matmul.
        # Halo: per-tap lane roll (XLU) + precomputed mask (VPU) instead of a padded scratch.
        taps = []
        for t in range(9):
            dh, dw = t // 3, t % 3
            off = (dh - 1) * Ww + (dw - 1)                          # static shift
            shifted = act if off == 0 else pltpu.roll(act, shift=(-off) % M, axis=1)
            taps.append(shifted * masks[t:t + 1])
        patches = jnp.concatenate(taps, axis=0)                     # (9C, M), lane-dense
        return (jnp.dot(w_ref[...], patches, preferred_element_type=jnp.float32)
                + b_ref[...])

    # --- BasicBlock: conv1 + BN + ReLU ; conv2 + BN + residual + ReLU
    act2 = jnp.maximum(conv3x3(act1, w1_ref, b1_ref), 0.0)
    y = jnp.maximum(conv3x3(act2, w2_ref, b2_ref) + act1, 0.0)      # (C, M)

    # --- replace_pool (global avg pool as a matmul) + replace_fc (linear head)
    pooled = jnp.dot(y, pool_ref[...], preferred_element_type=jnp.float32)        # (C, N)
    logits = (jnp.dot(fcwt_ref[...], pooled, preferred_element_type=jnp.float32)
              + fcbt_ref[...])                                                     # (classes, N)
    o_ref[...] = logits.astype(o_ref.dtype)


# ---------------------------------------------------------------------------
# Host-side glue: BN folding, layout plumbing, pallas_call wrapper
# ---------------------------------------------------------------------------
def custom_model_forward(x_nchw, p):
    N, Cin, H, W = x_nchw.shape
    C = p["fc_w"].shape[0]
    classes = p["fc_w"].shape[1]
    HW = H * W
    M = N * HW

    x = x_nchw.astype(jnp.float32)

    # stem im2col, channels-first: (9*Cin, M) with m ordered (n, h, w)
    xpad = jnp.pad(x, ((0, 0), (0, 0), (1, 1), (1, 1)))
    taps = []
    for dh in range(3):
        for dw in range(3):
            sl = xpad[:, :, dh:dh + H, dw:dw + W]                   # (N, Cin, H, W)
            taps.append(jnp.transpose(sl, (1, 0, 2, 3)).reshape(Cin, M))
    pstem = jnp.concatenate(taps, axis=0)                           # (9*Cin, M)

    # per-tap halo masks (destination-indexed): valid iff the shifted source is in-image
    m_idx = jnp.arange(M)
    hh = (m_idx // W) % H
    ww = m_idx % W
    mask_rows = []
    for dh in range(3):
        for dw in range(3):
            ok = ((hh + dh - 1 >= 0) & (hh + dh - 1 < H) &
                  (ww + dw - 1 >= 0) & (ww + dw - 1 < W))
            mask_rows.append(ok)
    masks = jnp.stack(mask_rows, axis=0).astype(jnp.float32)        # (9, M)

    # pooling-as-matmul: (M, N), 1/(H*W) on each image's own spatial positions
    pool_mat = (jnp.equal(m_idx[:, None] // HW, jnp.arange(N)[None, :])
                .astype(jnp.float32) / HW)

    # BN scale folded into conv weights, laid out (Cout, 9*Cin) to match the patch rows
    def fold(w_oihw, scale):
        co = w_oihw.shape[0]
        wmat = jnp.transpose(w_oihw, (0, 2, 3, 1)).reshape(co, -1)  # (Cout, 3*3*Cin)
        return (wmat * scale[:, None]).astype(jnp.float32)

    ws = fold(p["stem_w"], p["stem_scale"]); bs = p["stem_bias"].reshape(C, 1)
    w1 = fold(p["b_w1"], p["b_scale1"]);     b1 = p["b_bias1"].reshape(C, 1)
    w2 = fold(p["b_w2"], p["b_scale2"]);     b2 = p["b_bias2"].reshape(C, 1)
    fcwt = jnp.transpose(p["fc_w"]).astype(jnp.float32)             # (classes, C)
    fcbt = p["fc_b"].reshape(classes, 1).astype(jnp.float32)

    args = (pstem, masks, ws, bs, w1, b1, w2, b2, fcwt, fcbt, pool_mat)

    def whole(a):   # whole-array block, constant block index -> fetched once
        nd = a.ndim
        return pl.BlockSpec(a.shape, lambda i, _nd=nd: (0,) * _nd)

    kernel = functools.partial(_fused_forward_kernel, Ww=W)

    out_t = pl.pallas_call(
        kernel,
        out_shape=jax.ShapeDtypeStruct((classes, N), jnp.float32),
        grid=(1,),
        in_specs=[whole(a) for a in args],
        out_specs=pl.BlockSpec((classes, N), lambda i: (0, 0)),
        compiler_params=pltpu.CompilerParams(dimension_semantics=("arbitrary",)),
    )(*args)
    return jnp.transpose(out_t)                                     # (N, classes)


# ---------------------------------------------------------------------------
# Pure-jnp reference (same math, no Pallas) for correctness checking
# ---------------------------------------------------------------------------
def _im2col_3x3(x_nhwc):
    N, Hh, Ww, Cin = x_nhwc.shape
    xp = jnp.pad(x_nhwc, ((0, 0), (1, 1), (1, 1), (0, 0)))
    patches = []
    for dh in range(3):
        for dw in range(3):
            patches.append(xp[:, dh:dh + Hh, dw:dw + Ww, :])
    return jnp.concatenate(patches, axis=-1).reshape(N * Hh * Ww, 9 * Cin)


def _weight_to_matmul(w_oihw):
    Cout, Cin, KH, KW = w_oihw.shape
    return jnp.transpose(w_oihw, (2, 3, 1, 0)).reshape(KH * KW * Cin, Cout)


def reference_forward(x_nchw, p):
    x = jnp.transpose(x_nchw, (0, 2, 3, 1))

    def conv(xh, w, s, b, res=None, relu=True):
        N, Hh, Ww, _ = xh.shape
        Cout = w.shape[0]
        o = _im2col_3x3(xh) @ _weight_to_matmul(w)
        o = o * s.reshape(1, Cout) + b.reshape(1, Cout)
        if res is not None:
            o = o + res.reshape(-1, Cout)
        if relu:
            o = jnp.maximum(o, 0.0)
        return o.reshape(N, Hh, Ww, Cout)

    x = conv(x, p["stem_w"], p["stem_scale"], p["stem_bias"])
    idn = x
    y = conv(x, p["b_w1"], p["b_scale1"], p["b_bias1"])
    y = conv(y, p["b_w2"], p["b_scale2"], p["b_bias2"], res=idn)
    pooled = jnp.mean(y.reshape(y.shape[0], -1, y.shape[-1]), axis=1)
    return pooled @ p["fc_w"] + p["fc_b"].reshape(1, -1)


def make_params(key, n_channels=4, width=32, n_classes=10):
    ks = jax.random.split(key, 16)

    def bn(k):
        kg, kb, km, kv = jax.random.split(k, 4)
        gamma = 1.0 + 0.1 * jax.random.normal(kg, (width,), jnp.float32)
        beta = 0.1 * jax.random.normal(kb, (width,), jnp.float32)
        mean = 0.05 * jax.random.normal(km, (width,), jnp.float32)
        var = 1.0 + 0.5 * jax.nn.sigmoid(jax.random.normal(kv, (width,), jnp.float32))
        scale = gamma / jnp.sqrt(var + 1e-5)
        bias = beta - mean * scale
        return scale, bias

    # stem: 3-channel pretrained-style weight + set_channels concat rule (n_channels=4 > 3)
    w3 = 0.1 * jax.random.normal(ks[0], (width, 3, 3, 3), jnp.float32)
    stem_w = jnp.concatenate([w3, w3[:, : n_channels - 3]], axis=1)  # (width, 4, 3, 3)
    stem_scale, stem_bias = bn(ks[1])

    b_w1 = 0.1 * jax.random.normal(ks[2], (width, width, 3, 3), jnp.float32)
    b_scale1, b_bias1 = bn(ks[3])
    b_w2 = 0.1 * jax.random.normal(ks[4], (width, width, 3, 3), jnp.float32)
    b_scale2, b_bias2 = bn(ks[5])

    fc_w = 0.1 * jax.random.normal(ks[6], (width, n_classes), jnp.float32)
    fc_b = 0.05 * jax.random.normal(ks[7], (n_classes,), jnp.float32)

    return dict(stem_w=stem_w, stem_scale=stem_scale, stem_bias=stem_bias,
                b_w1=b_w1, b_scale1=b_scale1, b_bias1=b_bias1,
                b_w2=b_w2, b_scale2=b_scale2, b_bias2=b_bias2,
                fc_w=fc_w, fc_b=fc_b)


if __name__ == "__main__":
    key = jax.random.PRNGKey(0)
    k_p, k_x = jax.random.split(key)
    params = make_params(k_p)
    x = jax.random.normal(k_x, (2, 4, 16, 16), jnp.float32)  # NCHW, n_channels=4

    out = jax.block_until_ready(jax.jit(custom_model_forward)(x, params))
    ref = reference_forward(x, params)

    assert out.shape == (2, 10), out.shape
    assert jnp.allclose(out, ref, atol=1e-4, rtol=1e-4)
    print("KERNEL_OK")
</pallas_src>

<mosaic_0001>
module attributes {stable_mosaic.version = 11 : i64} {
  func.func @_fused_forward_kernel(%arg0: i32, %arg1: memref<36x512xf32, #tpu.memory_space<vmem>>, %arg2: memref<9x512xf32, #tpu.memory_space<vmem>>, %arg3: memref<32x36xf32, #tpu.memory_space<vmem>>, %arg4: memref<32x1xf32, #tpu.memory_space<vmem>>, %arg5: memref<32x288xf32, #tpu.memory_space<vmem>>, %arg6: memref<32x1xf32, #tpu.memory_space<vmem>>, %arg7: memref<32x288xf32, #tpu.memory_space<vmem>>, %arg8: memref<32x1xf32, #tpu.memory_space<vmem>>, %arg9: memref<10x32xf32, #tpu.memory_space<vmem>>, %arg10: memref<10x1xf32, #tpu.memory_space<vmem>>, %arg11: memref<512x2xf32, #tpu.memory_space<vmem>>, %arg12: memref<10x2xf32, #tpu.memory_space<vmem>>) attributes {dimension_semantics = [#tpu.dimension_semantics<arbitrary>], iteration_bounds = array<i64: 1>, scalar_prefetch = 0 : i64, scratch_operands = 0 : i64, tpu.core_type = #tpu.core_type<tc>, window_params = [{pipeline_mode = #tpu.pipeline_mode<synchronous>, transform_indices = @transform_0, window_bounds = array<i64: 36, 512>}, {pipeline_mode = #tpu.pipeline_mode<synchronous>, transform_indices = @transform_1, window_bounds = array<i64: 9, 512>}, {pipeline_mode = #tpu.pipeline_mode<synchronous>, transform_indices = @transform_2, window_bounds = array<i64: 32, 36>}, {pipeline_mode = #tpu.pipeline_mode<synchronous>, transform_indices = @transform_3, window_bounds = array<i64: 32, 1>}, {pipeline_mode = #tpu.pipeline_mode<synchronous>, transform_indices = @transform_4, window_bounds = array<i64: 32, 288>}, {pipeline_mode = #tpu.pipeline_mode<synchronous>, transform_indices = @transform_5, window_bounds = array<i64: 32, 1>}, {pipeline_mode = #tpu.pipeline_mode<synchronous>, transform_indices = @transform_6, window_bounds = array<i64: 32, 288>}, {pipeline_mode = #tpu.pipeline_mode<synchronous>, transform_indices = @transform_7, window_bounds = array<i64: 32, 1>}, {pipeline_mode = #tpu.pipeline_mode<synchronous>, transform_indices = @transform_8, window_bounds = array<i64: 10, 32>}, {pipeline_mode = #tpu.pipeline_mode<synchronous>, transform_indices = @transform_9, window_bounds = array<i64: 10, 1>}, {pipeline_mode = #tpu.pipeline_mode<synchronous>, transform_indices = @transform_10, window_bounds = array<i64: 512, 2>}, {pipeline_mode = #tpu.pipeline_mode<synchronous>, transform_indices = @transform_11, window_bounds = array<i64: 10, 2>}]} {
    %c0 = arith.constant 0 : index
    %c0_0 = arith.constant 0 : index
    %0 = vector.load %arg2[%c0, %c0_0] : memref<9x512xf32, #tpu.memory_space<vmem>>, vector<9x512xf32>
    %c0_1 = arith.constant 0 : index
    %c0_2 = arith.constant 0 : index
    %1 = vector.load %arg3[%c0_1, %c0_2] : memref<32x36xf32, #tpu.memory_space<vmem>>, vector<32x36xf32>
    %c0_3 = arith.constant 0 : index
    %c0_4 = arith.constant 0 : index
    %2 = vector.load %arg1[%c0_3, %c0_4] : memref<36x512xf32, #tpu.memory_space<vmem>>, vector<36x512xf32>
    %cst = arith.constant dense<0.000000e+00> : vector<32x512xf32>
    %3 = tpu.matmul %1, %2, %cst {dimension_numbers = #tpu.dot_dimension_numbers<[1], [0], [0], [1], [0, 0, 1, 1], [], []>} : vector<32x36xf32>, vector<36x512xf32>, vector<32x512xf32> -> vector<32x512xf32>
    %c0_5 = arith.constant 0 : index
    %c0_6 = arith.constant 0 : index
    %4 = vector.load %arg4[%c0_5, %c0_6] : memref<32x1xf32, #tpu.memory_space<vmem>>, vector<32x1xf32>
    %5 = vector.broadcast %4 : vector<32x1xf32> to vector<32x512xf32>
    %6 = arith.addf %3, %5 : vector<32x512xf32>
    %cst_7 = arith.constant 0.000000e+00 : f32
    %7 = vector.broadcast %cst_7 : f32 to vector<32x512xf32>
    %8 = arith.maximumf %6, %7 : vector<32x512xf32>
    %c17_i32 = arith.constant 17 : i32
    %9 = tpu.dynamic_rotate %8 by %c17_i32 dim 1 : vector<32x512xf32>, i32 -> vector<32x512xf32>
    %10 = vector.extract_strided_slice %0 {offsets = [0, 0], sizes = [1, 512], strides = [1, 1]} : vector<9x512xf32> to vector<1x512xf32>
    %11 = vector.broadcast %10 : vector<1x512xf32> to vector<32x512xf32>
    %12 = arith.mulf %9, %11 : vector<32x512xf32>
    %c16_i32 = arith.constant 16 : i32
    %13 = tpu.dynamic_rotate %8 by %c16_i32 dim 1 : vector<32x512xf32>, i32 -> vector<32x512xf32>
    %14 = vector.extract_strided_slice %0 {offsets = [1, 0], sizes = [1, 512], strides = [1, 1]} : vector<9x512xf32> to vector<1x512xf32>
    %15 = vector.broadcast %14 : vector<1x512xf32> to vector<32x512xf32>
    %16 = arith.mulf %13, %15 : vector<32x512xf32>
    %c15_i32 = arith.constant 15 : i32
    %17 = tpu.dynamic_rotate %8 by %c15_i32 dim 1 : vector<32x512xf32>, i32 -> vector<32x512xf32>
    %18 = vector.extract_strided_slice %0 {offsets = [2, 0], sizes = [1, 512], strides = [1, 1]} : vector<9x512xf32> to vector<1x512xf32>
    %19 = vector.broadcast %18 : vector<1x512xf32> to vector<32x512xf32>
    %20 = arith.mulf %17, %19 : vector<32x512xf32>
    %c1_i32 = arith.constant 1 : i32
    %21 = tpu.dynamic_rotate %8 by %c1_i32 dim 1 : vector<32x512xf32>, i32 -> vector<32x512xf32>
    %22 = vector.extract_strided_slice %0 {offsets = [3, 0], sizes = [1, 512], strides = [1, 1]} : vector<9x512xf32> to vector<1x512xf32>
    %23 = vector.broadcast %22 : vector<1x512xf32> to vector<32x512xf32>
    %24 = arith.mulf %21, %23 : vector<32x512xf32>
    %25 = vector.extract_strided_slice %0 {offsets = [4, 0], sizes = [1, 512], strides = [1, 1]} : vector<9x512xf32> to vector<1x512xf32>
    %26 = vector.broadcast %25 : vector<1x512xf32> to vector<32x512xf32>
    %27 = arith.mulf %8, %26 : vector<32x512xf32>
    %c511_i32 = arith.constant 511 : i32
    %28 = tpu.dynamic_rotate %8 by %c511_i32 dim 1 : vector<32x512xf32>, i32 -> vector<32x512xf32>
    %29 = vector.extract_strided_slice %0 {offsets = [5, 0], sizes = [1, 512], strides = [1, 1]} : vector<9x512xf32> to vector<1x512xf32>
    %30 = vector.broadcast %29 : vector<1x512xf32> to vector<32x512xf32>
    %31 = arith.mulf %28, %30 : vector<32x512xf32>
    %c497_i32 = arith.constant 497 : i32
    %32 = tpu.dynamic_rotate %8 by %c497_i32 dim 1 : vector<32x512xf32>, i32 -> vector<32x512xf32>
    %33 = vector.extract_strided_slice %0 {offsets = [6, 0], sizes = [1, 512], strides = [1, 1]} : vector<9x512xf32> to vector<1x512xf32>
    %34 = vector.broadcast %33 : vector<1x512xf32> to vector<32x512xf32>
    %35 = arith.mulf %32, %34 : vector<32x512xf32>
    %c496_i32 = arith.constant 496 : i32
    %36 = tpu.dynamic_rotate %8 by %c496_i32 dim 1 : vector<32x512xf32>, i32 -> vector<32x512xf32>
    %37 = vector.extract_strided_slice %0 {offsets = [7, 0], sizes = [1, 512], strides = [1, 1]} : vector<9x512xf32> to vector<1x512xf32>
    %38 = vector.broadcast %37 : vector<1x512xf32> to vector<32x512xf32>
    %39 = arith.mulf %36, %38 : vector<32x512xf32>
    %c495_i32 = arith.constant 495 : i32
    %40 = tpu.dynamic_rotate %8 by %c495_i32 dim 1 : vector<32x512xf32>, i32 -> vector<32x512xf32>
    %41 = vector.extract_strided_slice %0 {offsets = [8, 0], sizes = [1, 512], strides = [1, 1]} : vector<9x512xf32> to vector<1x512xf32>
    %42 = vector.broadcast %41 : vector<1x512xf32> to vector<32x512xf32>
    %43 = arith.mulf %40, %42 : vector<32x512xf32>
    %44 = tpu.concatenate %12, %16, %20, %24, %27, %31, %35, %39, %43 in 0 : vector<32x512xf32>, vector<32x512xf32>, vector<32x512xf32>, vector<32x512xf32>, vector<32x512xf32>, vector<32x512xf32>, vector<32x512xf32>, vector<32x512xf32>, vector<32x512xf32> -> vector<288x512xf32>
    %c0_8 = arith.constant 0 : index
    %c0_9 = arith.constant 0 : index
    %45 = vector.load %arg5[%c0_8, %c0_9] : memref<32x288xf32, #tpu.memory_space<vmem>>, vector<32x288xf32>
    %cst_10 = arith.constant dense<0.000000e+00> : vector<32x512xf32>
    %46 = tpu.matmul %45, %44, %cst_10 {dimension_numbers = #tpu.dot_dimension_numbers<[1], [0], [0], [1], [0, 0, 1, 1], [], []>} : vector<32x288xf32>, vector<288x512xf32>, vector<32x512xf32> -> vector<32x512xf32>
    %c0_11 = arith.constant 0 : index
    %c0_12 = arith.constant 0 : index
    %47 = vector.load %arg6[%c0_11, %c0_12] : memref<32x1xf32, #tpu.memory_space<vmem>>, vector<32x1xf32>
    %48 = vector.broadcast %47 : vector<32x1xf32> to vector<32x512xf32>
    %49 = arith.addf %46, %48 : vector<32x512xf32>
    %cst_13 = arith.constant 0.000000e+00 : f32
    %50 = vector.broadcast %cst_13 : f32 to vector<32x512xf32>
    %51 = arith.maximumf %49, %50 : vector<32x512xf32>
    %c17_i32_14 = arith.constant 17 : i32
    %52 = tpu.dynamic_rotate %51 by %c17_i32_14 dim 1 : vector<32x512xf32>, i32 -> vector<32x512xf32>
    %53 = vector.extract_strided_slice %0 {offsets = [0, 0], sizes = [1, 512], strides = [1, 1]} : vector<9x512xf32> to vector<1x512xf32>
    %54 = vector.broadcast %53 : vector<1x512xf32> to vector<32x512xf32>
    %55 = arith.mulf %52, %54 : vector<32x512xf32>
    %c16_i32_15 = arith.constant 16 : i32
    %56 = tpu.dynamic_rotate %51 by %c16_i32_15 dim 1 : vector<32x512xf32>, i32 -> vector<32x512xf32>
    %57 = vector.extract_strided_slice %0 {offsets = [1, 0], sizes = [1, 512], strides = [1, 1]} : vector<9x512xf32> to vector<1x512xf32>
    %58 = vector.broadcast %57 : vector<1x512xf32> to vector<32x512xf32>
    %59 = arith.mulf %56, %58 : vector<32x512xf32>
    %c15_i32_16 = arith.constant 15 : i32
    %60 = tpu.dynamic_rotate %51 by %c15_i32_16 dim 1 : vector<32x512xf32>, i32 -> vector<32x512xf32>
    %61 = vector.extract_strided_slice %0 {offsets = [2, 0], sizes = [1, 512], strides = [1, 1]} : vector<9x512xf32> to vector<1x512xf32>
    %62 = vector.broadcast %61 : vector<1x512xf32> to vector<32x512xf32>
    %63 = arith.mulf %60, %62 : vector<32x512xf32>
    %c1_i32_17 = arith.constant 1 : i32
    %64 = tpu.dynamic_rotate %51 by %c1_i32_17 dim 1 : vector<32x512xf32>, i32 -> vector<32x512xf32>
    %65 = vector.extract_strided_slice %0 {offsets = [3, 0], sizes = [1, 512], strides = [1, 1]} : vector<9x512xf32> to vector<1x512xf32>
    %66 = vector.broadcast %65 : vector<1x512xf32> to vector<32x512xf32>
    %67 = arith.mulf %64, %66 : vector<32x512xf32>
    %68 = vector.extract_strided_slice %0 {offsets = [4, 0], sizes = [1, 512], strides = [1, 1]} : vector<9x512xf32> to vector<1x512xf32>
    %69 = vector.broadcast %68 : vector<1x512xf32> to vector<32x512xf32>
    %70 = arith.mulf %51, %69 : vector<32x512xf32>
    %c511_i32_18 = arith.constant 511 : i32
    %71 = tpu.dynamic_rotate %51 by %c511_i32_18 dim 1 : vector<32x512xf32>, i32 -> vector<32x512xf32>
    %72 = vector.extract_strided_slice %0 {offsets = [5, 0], sizes = [1, 512], strides = [1, 1]} : vector<9x512xf32> to vector<1x512xf32>
    %73 = vector.broadcast %72 : vector<1x512xf32> to vector<32x512xf32>
    %74 = arith.mulf %71, %73 : vector<32x512xf32>
    %c497_i32_19 = arith.constant 497 : i32
    %75 = tpu.dynamic_rotate %51 by %c497_i32_19 dim 1 : vector<32x512xf32>, i32 -> vector<32x512xf32>
    %76 = vector.extract_strided_slice %0 {offsets = [6, 0], sizes = [1, 512], strides = [1, 1]} : vector<9x512xf32> to vector<1x512xf32>
    %77 = vector.broadcast %76 : vector<1x512xf32> to vector<32x512xf32>
    %78 = arith.mulf %75, %77 : vector<32x512xf32>
    %c496_i32_20 = arith.constant 496 : i32
    %79 = tpu.dynamic_rotate %51 by %c496_i32_20 dim 1 : vector<32x512xf32>, i32 -> vector<32x512xf32>
    %80 = vector.extract_strided_slice %0 {offsets = [7, 0], sizes = [1, 512], strides = [1, 1]} : vector<9x512xf32> to vector<1x512xf32>
    %81 = vector.broadcast %80 : vector<1x512xf32> to vector<32x512xf32>
    %82 = arith.mulf %79, %81 : vector<32x512xf32>
    %c495_i32_21 = arith.constant 495 : i32
    %83 = tpu.dynamic_rotate %51 by %c495_i32_21 dim 1 : vector<32x512xf32>, i32 -> vector<32x512xf32>
    %84 = vector.extract_strided_slice %0 {offsets = [8, 0], sizes = [1, 512], strides = [1, 1]} : vector<9x512xf32> to vector<1x512xf32>
    %85 = vector.broadcast %84 : vector<1x512xf32> to vector<32x512xf32>
    %86 = arith.mulf %83, %85 : vector<32x512xf32>
    %87 = tpu.concatenate %55, %59, %63, %67, %70, %74, %78, %82, %86 in 0 : vector<32x512xf32>, vector<32x512xf32>, vector<32x512xf32>, vector<32x512xf32>, vector<32x512xf32>, vector<32x512xf32>, vector<32x512xf32>, vector<32x512xf32>, vector<32x512xf32> -> vector<288x512xf32>
    %c0_22 = arith.constant 0 : index
    %c0_23 = arith.constant 0 : index
    %88 = vector.load %arg7[%c0_22, %c0_23] : memref<32x288xf32, #tpu.memory_space<vmem>>, vector<32x288xf32>
    %cst_24 = arith.constant dense<0.000000e+00> : vector<32x512xf32>
    %89 = tpu.matmul %88, %87, %cst_24 {dimension_numbers = #tpu.dot_dimension_numbers<[1], [0], [0], [1], [0, 0, 1, 1], [], []>} : vector<32x288xf32>, vector<288x512xf32>, vector<32x512xf32> -> vector<32x512xf32>
    %c0_25 = arith.constant 0 : index
    %c0_26 = arith.constant 0 : index
    %90 = vector.load %arg8[%c0_25, %c0_26] : memref<32x1xf32, #tpu.memory_space<vmem>>, vector<32x1xf32>
    %91 = vector.broadcast %90 : vector<32x1xf32> to vector<32x512xf32>
    %92 = arith.addf %89, %91 : vector<32x512xf32>
    %93 = arith.addf %92, %8 : vector<32x512xf32>
    %cst_27 = arith.constant 0.000000e+00 : f32
    %94 = vector.broadcast %cst_27 : f32 to vector<32x512xf32>
    %95 = arith.maximumf %93, %94 : vector<32x512xf32>
    %c0_28 = arith.constant 0 : index
    %c0_29 = arith.constant 0 : index
    %96 = vector.load %arg11[%c0_28, %c0_29] : memref<512x2xf32, #tpu.memory_space<vmem>>, vector<512x2xf32>
    %cst_30 = arith.constant dense<0.000000e+00> : vector<32x2xf32>
    %97 = tpu.matmul %95, %96, %cst_30 {dimension_numbers = #tpu.dot_dimension_numbers<[1], [0], [0], [1], [0, 0, 1, 1], [], []>} : vector<32x512xf32>, vector<512x2xf32>, vector<32x2xf32> -> vector<32x2xf32>
    %c0_31 = arith.constant 0 : index
    %c0_32 = arith.constant 0 : index
    %98 = vector.load %arg9[%c0_31, %c0_32] : memref<10x32xf32, #tpu.memory_space<vmem>>, vector<10x32xf32>
    %cst_33 = arith.constant dense<0.000000e+00> : vector<10x2xf32>
    %99 = tpu.matmul %98, %97, %cst_33 {dimension_numbers = #tpu.dot_dimension_numbers<[1], [0], [0], [1], [0, 0, 1, 1], [], []>} : vector<10x32xf32>, vector<32x2xf32>, vector<10x2xf32> -> vector<10x2xf32>
    %c0_34 = arith.constant 0 : index
    %c0_35 = arith.constant 0 : index
    %100 = vector.load %arg10[%c0_34, %c0_35] : memref<10x1xf32, #tpu.memory_space<vmem>>, vector<10x1xf32>
    %101 = vector.broadcast %100 : vector<10x1xf32> to vector<10x2xf32>
    %102 = arith.addf %99, %101 : vector<10x2xf32>
    %c0_36 = arith.constant 0 : index
    %c0_37 = arith.constant 0 : index
    %103 = vector.load %arg12[%c0_36, %c0_37] : memref<10x2xf32, #tpu.memory_space<vmem>>, vector<10x2xf32>
    tpu.vector_store %arg12[%c0_36, %c0_37], %102 {strides = array<i32>} : memref<10x2xf32, #tpu.memory_space<vmem>>, vector<10x2xf32>,
    return
  }
  func.func @transform_0(%arg0: i32) -> (i32, i32) {
    %c0_i32 = arith.constant 0 : i32
    %c0_i32_0 = arith.constant 0 : i32
    %c0_i32_1 = arith.constant 0 : i32
    return %c0_i32, %c0_i32_0 : i32, i32
  }
  func.func @transform_1(%arg0: i32) -> (i32, i32) {
    %c0_i32 = arith.constant 0 : i32
    %c0_i32_0 = arith.constant 0 : i32
    %c0_i32_1 = arith.constant 0 : i32
    return %c0_i32, %c0_i32_0 : i32, i32
  }
  func.func @transform_2(%arg0: i32) -> (i32, i32) {
    %c0_i32 = arith.constant 0 : i32
    %c0_i32_0 = arith.constant 0 : i32
    %c0_i32_1 = arith.constant 0 : i32
    return %c0_i32, %c0_i32_0 : i32, i32
  }
  func.func @transform_3(%arg0: i32) -> (i32, i32) {
    %c0_i32 = arith.constant 0 : i32
    %c0_i32_0 = arith.constant 0 : i32
    %c0_i32_1 = arith.constant 0 : i32
    return %c0_i32, %c0_i32_0 : i32, i32
  }
  func.func @transform_4(%arg0: i32) -> (i32, i32) {
    %c0_i32 = arith.constant 0 : i32
    %c0_i32_0 = arith.constant 0 : i32
    %c0_i32_1 = arith.constant 0 : i32
    return %c0_i32, %c0_i32_0 : i32, i32
  }
  func.func @transform_5(%arg0: i32) -> (i32, i32) {
    %c0_i32 = arith.constant 0 : i32
    %c0_i32_0 = arith.constant 0 : i32
    %c0_i32_1 = arith.constant 0 : i32
    return %c0_i32, %c0_i32_0 : i32, i32
  }
  func.func @transform_6(%arg0: i32) -> (i32, i32) {
    %c0_i32 = arith.constant 0 : i32
    %c0_i32_0 = arith.constant 0 : i32
    %c0_i32_1 = arith.constant 0 : i32
    return %c0_i32, %c0_i32_0 : i32, i32
  }
  func.func @transform_7(%arg0: i32) -> (i32, i32) {
    %c0_i32 = arith.constant 0 : i32
    %c0_i32_0 = arith.constant 0 : i32
    %c0_i32_1 = arith.constant 0 : i32
    return %c0_i32, %c0_i32_0 : i32, i32
  }
  func.func @transform_8(%arg0: i32) -> (i32, i32) {
    %c0_i32 = arith.constant 0 : i32
    %c0_i32_0 = arith.constant 0 : i32
    %c0_i32_1 = arith.constant 0 : i32
    return %c0_i32, %c0_i32_0 : i32, i32
  }
  func.func @transform_9(%arg0: i32) -> (i32, i32) {
    %c0_i32 = arith.constant 0 : i32
    %c0_i32_0 = arith.constant 0 : i32
    %c0_i32_1 = arith.constant 0 : i32
    return %c0_i32, %c0_i32_0 : i32, i32
  }
  func.func @transform_10(%arg0: i32) -> (i32, i32) {
    %c0_i32 = arith.constant 0 : i32
    %c0_i32_0 = arith.constant 0 : i32
    %c0_i32_1 = arith.constant 0 : i32
    return %c0_i32, %c0_i32_0 : i32, i32
  }
  func.func @transform_11(%arg0: i32) -> (i32, i32) {
    %c0_i32 = arith.constant 0 : i32
    %c0_i32_0 = arith.constant 0 : i32
    %c0_i32_1 = arith.constant 0 : i32
    return %c0_i32, %c0_i32_0 : i32, i32
  }
}

</mosaic_0001>

<bundles_post_ra>
// kernel: custom_model_forward.1
= control target key start
LH: loop header
LB: loop body
LE: loop exit
PB: predicated region body
PF: predicated region fallthrough
CT: control target
= control target key end

     0   :  { %v6499_v3 = vmov 0.0   ;;  %v3314_v8 = vmov 0   ;;  %vm107_vm0 = vcmask 1043456   ;;  %vm94_vm1 = vcmask 293888   ;;  %s3316_s14 = smov 16   ;;  %s3317_s15 = smov 15   ;;  %s6487_s0 = inlined_call_operand.vmem [shape: f32[36,512], index: 0, kind: input, shape index: {}]   ;;  %s6488_s3 = inlined_call_operand.vmem [shape: f32[32,1], index: 3, kind: input, shape index: {}]   ;;  %s6489_s2 = inlined_call_operand.vmem [shape: f32[32,36], index: 2, kind: input, shape index: {}]   ;;  %s6490_s1 = inlined_call_operand.vmem [shape: f32[9,512], index: 1, kind: input, shape index: {}]   ;;  %s6491_s4 = inlined_call_operand.vmem [shape: f32[32,288], index: 4, kind: input, shape index: {}]   ;;  %s6492_s5 = inlined_call_operand.vmem [shape: f32[32,1], index: 5, kind: input, shape index: {}]   ;;  %s6493_s6 = inlined_call_operand.vmem [shape: f32[32,288], index: 6, kind: input, shape index: {}]   ;;  %s6494_s7 = inlined_call_operand.vmem [shape: f32[32,1], index: 7, kind: input, shape index: {}]   ;;  %s6495_s9 = inlined_call_operand.vmem [shape: f32[10,1], index: 9, kind: input, shape index: {}]   ;;  %s6496_s10 = inlined_call_operand.vmem [shape: f32[512,2], index: 10, kind: input, shape index: {}]   ;;  %s6497_s8 = inlined_call_operand.vmem [shape: f32[10,32], index: 8, kind: input, shape index: {}]   ;;  %s6498_s11 = inlined_call_operand.vmem [shape: f32[10,2], index: 11, kind: output, shape index: {}]  }
   0x1   :  { %v51_v0 = vld [vmem:[%s6487_s0 + $0x8] sm:$0xff]  ;;  %v53_v2 = vld [vmem:[%s6487_s0 + $0x18] sm:$0xff]  ;;  %184 = vmatprep.mubr.f32.mxu0 %v6499_v3  ;;  %273 = vmatprep.mubr.f32.mxu1 %v6499_v3  ;;  %v50_v6 = vld [vmem:[%s6487_s0] sm:$0xff]  ;;  %s3318_s16 = smov 1   ;;  %s3319_s17 = smov 127   ;;  %vm1032_vm10 = vcmask 261120  }
   0x2   :  { %v55_v1 = vld [vmem:[%s6487_s0 + $0x28] sm:$0xff]  ;;  %v57_v5 = vld [vmem:[%s6487_s0 + $0x38] sm:$0xff]  ;;  %v54_v7 = vld [vmem:[%s6487_s0 + $0x20] sm:$0xff]  ;;  %3307 = vset.pattern.permute.xlu0 %v3314_v8  ;;  %3308 = vset.pattern.permute.xlu1 %v3314_v8  ;;  %s3320_s18 = smov 113   ;;  %s3321_s19 = smov 112   ;;  %vm2712_vm11 = vcmask 9216  }
   0x3   :  { %v2857_v4 = vpack.c.bf16 %v55_v1, %v51_v0  ;;  %v2865_v9 = vpack.c.bf16 %v57_v5, %v53_v2  ;;  %v2859_v10 = vpack.c.bf16 %v54_v7, %v50_v6  ;;  %v52_v11 = vld [vmem:[%s6487_s0 + $0x10] sm:$0xff]  ;;  %v59_v13 = vld [vmem:[%s6487_s0 + $0x48] sm:$0xff]  ;;  %v61_v16 = vld [vmem:[%s6487_s0 + $0x58] sm:$0xff]  ;;  %s3322_s20 = smov 111   ;;  %vm2710_vm12 = vcmask 15360  }
   0x4   :  { %v56_v12 = vld [vmem:[%s6487_s0 + $0x30] sm:$0xff]  ;;  %v63_v15 = vld [vmem:[%s6487_s0 + $0x68] sm:$0xff]  ;;  %v65_v17 = vld [vmem:[%s6487_s0 + $0x78] sm:$0xff] }
   0x5   :  { %2858 = vmatprep.subr.bf16.mxu0 %v2857_v4  ;;  %v2867_v14 = vpack.c.bf16 %v56_v12, %v52_v11  ;;  %2866 = vmatprep.subr.bf16.mxu1 %v2865_v9  ;;  %v2861_v18 = vpack.c.bf16 %v63_v15, %v59_v13  ;;  %v2869_v19 = vpack.c.bf16 %v65_v17, %v61_v16  ;;  %v58_v20 = vld [vmem:[%s6487_s0 + $0x40] sm:$0xff]  ;;  %v60_v22 = vld [vmem:[%s6487_s0 + $0x50] sm:$0xff]  ;;  %v67_v26 = vld [vmem:[%s6487_s0 + $0x88] sm:$0xf] }
   0x6   :  { %2860 = vmatpush1.bf16.msra.mxu0 %v2859_v10  ;;  %v62_v21 = vld [vmem:[%s6487_s0 + $0x60] sm:$0xff]  ;;  %v64_v24 = vld [vmem:[%s6487_s0 + $0x70] sm:$0xff]  ;;  %v69_v27 = vld [vmem:[%s6487_s0 + $0x98] sm:$0xf] }
   0x7   :  { %2868 = vmatpush1.bf16.msra.mxu1 %v2867_v14  ;;  %v2863_v23 = vpack.c.bf16 %v62_v21, %v58_v20  ;;  %2862 = vmatprep.subr.bf16.mxu0 %v2861_v18  ;;  %v2871_v25 = vpack.c.bf16 %v64_v24, %v60_v22  ;;  %v70_v28 = vld [vmem:[%s6488_s3] sm:$0xff]  ;;  %v72_v29 = vld [vmem:[%s6488_s3 + $0x10] sm:$0xff]  ;;  %v71_v31 = vld [vmem:[%s6488_s3 + $0x8] sm:$0xff] }
   0x8   :  { %2870 = vmatprep.subr.bf16.mxu1 %v2869_v19  ;;  %76 = vperm.xlu0 %3307, %v70_v28   ;;  %v66_v30 = vld [vmem:[%s6487_s0 + $0x80] sm:$0xf]  ;;  %v68_v32 = vld [vmem:[%s6487_s0 + $0x90] sm:$0xf]  ;;  %v73_v34 = vld [vmem:[%s6488_s3 + $0x18] sm:$0xff] }
   0x9   :  { %v46_v33 = vld [vmem:[%s6489_s2] sm:$0xff]  ;;  %86 = vperm.xlu1 %3308, %v72_v29   ;;  %v47_v35 = vld [vmem:[%s6489_s2 + $0x8] sm:$0xff]  ;;  %v48_v36 = vld [vmem:[%s6489_s2 + $0x10] sm:$0xff] }
   0xa   :  { %2864 = vmatpush1.bf16.msra.mxu0 %v2863_v23  ;;  %v49_v37 = vld [vmem:[%s6489_s2 + $0x18] sm:$0xff]  ;;  %s3315_s2 = smov 17  }
   0xb   :  { %2872 = vmatpush1.bf16.msra.mxu1 %v2871_v25  ;;  %2718 = vmatprep.subr.msk.mxu0 %vm107_vm0, %v67_v26 }
   0xc   :  { %2724 = vmatprep.subr.msk.mxu1 %vm107_vm0, %v69_v27  ;;  %81 = vperm.xlu0 %3307, %v71_v31  }
   0xd   :  { %91 = vperm.xlu1 %3308, %v73_v34  }
   0xe   :  { %2719 = vmatpush1.msk.msra.mxu0 %vm107_vm0, %v66_v30 }
   0xf   :  { %2725 = vmatpush1.msk.msra.mxu1 %vm107_vm0, %v68_v32  ;;  %2720 = vmatmul.mubr.msk.f32.vlgmr.msra.gmra.mrb[0].mxu0 %vm94_vm1, %v46_v33 }
  0x10   :  { %2726 = vmatmul.mubr.msk.f32.vlgmr.msra.gmra.mrb[0].mxu1 %vm94_vm1, %v46_v33  ;;  %190 = vmatprep.mubr.f32.mxu0 %v6499_v3 }
  0x11   :  { %279 = vmatprep.mubr.f32.mxu1 %v6499_v3 }
  0x13   :  { %2721 = vmatmul.mubr.msk.f32.gmra.mrb[2].mxu0 %vm94_vm1, %v47_v35 }
  0x14   :  { %2727 = vmatmul.mubr.msk.f32.gmra.mrb[2].mxu1 %vm94_vm1, %v47_v35  ;;  %196 = vmatprep.mubr.f32.mxu0 %v6499_v3 }
  0x15   :  { %285 = vmatprep.mubr.f32.mxu1 %v6499_v3 }
  0x17   :  { %2722 = vmatmul.mubr.msk.f32.gmra.mrb[4].mxu0 %vm94_vm1, %v48_v36 }
  0x18   :  { %2728 = vmatmul.mubr.msk.f32.gmra.mrb[4].mxu1 %vm94_vm1, %v48_v36  ;;  %202 = vmatprep.mubr.f32.mxu0 %v6499_v3 }
  0x19   :  { %291 = vmatprep.mubr.f32.mxu1 %v6499_v3 }
  0x1b   :  { %2723 = vmatmul.mubr.msk.f32.gmra.mrb[6].mxu0 %vm94_vm1, %v49_v37 }
  0x1c   :  { %2729 = vmatmul.mubr.msk.f32.gmra.mrb[6].mxu1 %vm94_vm1, %v49_v37 }
  0x87   :  { %v3487_v38 = vpop.permute.xlu0 %76 }
  0x88   :  { %v3637_v9 = vpop.permute.xlu1 %86 }
  0x8b   :  { %v3493_v46 = vpop.permute.xlu0 %81 }
  0x8c   :  { %v3649_v11 = vpop.permute.xlu1 %91 }
  0xe2   :  { %v186_v39 = vpop.f32.mrb[0].mxu0 }
  0xe3   :  { %v187_v40 = vadd.f32 %v186_v39, %v3487_v38  ;;  %v275_v41 = vpop.f32.mrb[0].mxu1  ;;  %v188_v42 = vpop.f32.mrb[1].mxu0 }
  0xe4   :  { %v277_v43 = vpop.f32.mrb[1].mxu1  ;;  %v276_v45 = vadd.f32 %v275_v41, %v3487_v38  ;;  %v189_v0 = vadd.f32 %v188_v42, %v3487_v38 }
  0xe5   :  { %v3490_v44 = vmax.f32 %v187_v40, 0.0  ;;  %v278_v2 = vadd.f32 %v277_v43, %v3487_v38 }
  0xe6   :  { %v192_v47 = vpop.f32.mrb[2].mxu0  ;;  %v3498_v52 = vmax.f32 %v276_v45, 0.0  ;;  %v3578_v1 = vmax.f32 %v189_v0, 0.0 }
  0xe7   :  { %6705 = vst [vmem:[#allocation2_spill] sm:$0xff] %v3490_v44  ;;  %v193_v48 = vadd.f32 %v192_v47, %v3493_v46  ;;  %v281_v49 = vpop.f32.mrb[2].mxu1  ;;  %v194_v50 = vpop.f32.mrb[3].mxu0  ;;  %314 = vrot.lane.b32.xlu0 %v3490_v44, %s3315_s2  ;;  %v3586_v5 = vmax.f32 %v278_v2, 0.0  ;;  %v346_v47 = vlaneseq  ;;  %v3802_v2 = vld [vmem:[%s6490_s1 + $0x8] sm:$0xff] }
  0xe8   :  { %v283_v51 = vpop.f32.mrb[3].mxu1  ;;  %6706 = vst [vmem:[#allocation3_spill] sm:$0xff] %v3498_v52  ;;  %v282_v54 = vadd.f32 %v281_v49, %v3493_v46  ;;  %6709 = vst [vmem:[#allocation6_spill] sm:$0xff] %v3578_v1  ;;  %v195_v4 = vadd.f32 %v194_v50, %v3493_v46 }
  0xe9   :  { %v3500_v53 = vmax.f32 %v193_v48, 0.0  ;;  %6710 = vst [vmem:[#allocation7_spill] sm:$0xff] %v3586_v5  ;;  %v284_v7 = vadd.f32 %v283_v51, %v3493_v46  ;;  %v3781_v51 = vand.u32 127, %v346_v47 }
  0xea   :  { %v3503_v55 = vpop.f32.mrb[4].mxu0  ;;  %v3515_v59 = vmax.f32 %v282_v54, 0.0  ;;  %v3588_v6 = vmax.f32 %v195_v4, 0.0  ;;  %v3783_v54 = vshrl.u32 %v346_v47, 7  ;;  %v3831_v47 = vld [vmem:[%s6490_s1 + $0x18] sm:$0xff] }
  0xeb   :  { %6707 = vst [vmem:[#allocation4_spill] sm:$0xff] %v3500_v53  ;;  %316 = vrot.lane.b32.xlu1 %v3500_v53, %s3315_s2  ;;  %330 = vrot.lane.b32.xlu0 %v3498_v52, %s3315_s2  ;;  %v3509_v56 = vpop.f32.mrb[4].mxu1  ;;  %v3511_v57 = vpop.f32.mrb[5].mxu0  ;;  %v3595_v8 = vmax.f32 %v284_v7, 0.0  ;;  %v199_v10 = vadd.f32 %v3503_v55, %v3637_v9  ;;  %vm348_vm2 = vcmp.lt.s32.totalorder %v3781_v51, 17  ;;  %vm429_vm3 = vcmp.lt.s32.totalorder %v3781_v51, 16 }
  0xec   :  { %v3513_v58 = vpop.f32.mrb[5].mxu1  ;;  %6708 = vst [vmem:[#allocation5_spill] sm:$0xff] %v3515_v59  ;;  %6711 = vst [vmem:[#allocation8_spill] sm:$0xff] %v3588_v6  ;;  %v288_v14 = vadd.f32 %v3509_v56, %v3637_v9  ;;  %v201_v48 = vadd.f32 %v3511_v57, %v3637_v9  ;;  %v367_v55 = vsub.s32 0, %v3783_v54  ;;  %vm510_vm4 = vcmp.lt.s32.totalorder %v3781_v51, 15 }
  0xed   :  { %6712 = vst [vmem:[#allocation9_spill] sm:$0xff] %v3595_v8  ;;  %v3657_v13 = vmax.f32 %v199_v10, 0.0  ;;  %v290_v0 = vadd.f32 %v3513_v58, %v3637_v9  ;;  %vm591_vm5 = vcmp.lt.s32.totalorder %v3781_v51, 1  ;;  %vm704_vm6 = vcmp.lt.s32.totalorder %v3781_v51, 127 }
  0xee   :  { %v3517_v60 = vpop.f32.mrb[6].mxu0  ;;  %v3671_v18 = vmax.f32 %v288_v14, 0.0  ;;  %v3790_v56 = vmax.f32 %v201_v48, 0.0  ;;  %v3805_v4 = vrot.slane %v3802_v2, %v367_v55  ;;  %vm785_vm7 = vcmp.lt.s32.totalorder %v3781_v51, 113 }
  0xef   :  { %332 = vrot.lane.b32.xlu1 %v3515_v59, %s3315_s2  ;;  %397 = vrot.lane.b32.xlu0 %v3490_v44, %s3316_s14  ;;  %v3523_v61 = vpop.f32.mrb[6].mxu1  ;;  %v3525_v62 = vpop.f32.mrb[7].mxu0  ;;  %6713 = vst [vmem:[#allocation10_spill] sm:$0xff] %v3657_v13  ;;  %v205_v15 = vadd.f32 %v3517_v60, %v3649_v11  ;;  %v3818_v14 = vmax.f32 %v290_v0, 0.0  ;;  %vm866_vm8 = vcmp.lt.s32.totalorder %v3781_v51, 112  ;;  %vm947_vm9 = vcmp.lt.s32.totalorder %v3781_v51, 111 }
  0xf0   :  { %v3527_v63 = vpop.f32.mrb[7].mxu1  ;;  %6714 = vst [vmem:[#allocation11_spill] sm:$0xff] %v3671_v18  ;;  %v294_v19 = vadd.f32 %v3523_v61, %v3649_v11  ;;  %6732 = vst [vmem:[#allocation29_spill] sm:$0xff] %v3790_v56  ;;  %v207_v57 = vadd.f32 %v3525_v62, %v3649_v11  ;;  %v2430_v51 = vld [vmem:[%s6496_s10 + $0x188] sm:$0xff] }
  0xf1   :  { %v3675_v20 = vmax.f32 %v205_v15, 0.0  ;;  %6734 = vst [vmem:[#allocation31_spill] sm:$0xff] %v3805_v4  ;;  %v296_v58 = vadd.f32 %v3527_v63, %v3649_v11  ;;  %6736 = vst [vmem:[#allocation33_spill] sm:$0xff] %v3818_v14 }
  0xf2   :  { %v3685_v23 = vmax.f32 %v294_v19, 0.0  ;;  %v3814_v7 = vmax.f32 %v207_v57, 0.0  ;;  %v3826_v19 = vld [vmem:[%s6490_s1] sm:$0xff]  ;;  %v3839_v57 = vrot.slane %v3831_v47, %v367_v55 }
  0xf3   :  { %399 = vrot.lane.b32.xlu1 %v3500_v53, %s3316_s14  ;;  %413 = vrot.lane.b32.xlu0 %v3498_v52, %s3316_s14  ;;  %6715 = vst [vmem:[#allocation12_spill] sm:$0xff] %v3675_v20  ;;  %v3836_v48 = vrot.slane %v3826_v19, %v367_v55 }
  0xf4   :  { %6716 = vst [vmem:[#allocation13_spill] sm:$0xff] %v3685_v23  ;;  %6735 = vst [vmem:[#allocation32_spill] sm:$0xff] %v3814_v7 }
  0xf7   :  { %415 = vrot.lane.b32.xlu1 %v3515_v59, %s3316_s14  ;;  %478 = vrot.lane.b32.xlu0 %v3490_v44, %s3317_s15 }
  0xfb   :  { %480 = vrot.lane.b32.xlu1 %v3500_v53, %s3317_s15  ;;  %494 = vrot.lane.b32.xlu0 %v3498_v52, %s3317_s15 }
  0xff   :  { %496 = vrot.lane.b32.xlu1 %v3515_v59, %s3317_s15  ;;  %559 = vrot.lane.b32.xlu0 %v3490_v44, %s3318_s16 }
 0x103   :  { %561 = vrot.lane.b32.xlu1 %v3500_v53, %s3318_s16  ;;  %575 = vrot.lane.b32.xlu0 %v3498_v52, %s3318_s16 }
 0x107   :  { %577 = vrot.lane.b32.xlu1 %v3515_v59, %s3318_s16  ;;  %672 = vrot.lane.b32.xlu0 %v3490_v44, %s3319_s17 }
 0x10b   :  { %674 = vrot.lane.b32.xlu1 %v3500_v53, %s3319_s17  ;;  %688 = vrot.lane.b32.xlu0 %v3498_v52, %s3319_s17 }
 0x10f   :  { %690 = vrot.lane.b32.xlu1 %v3515_v59, %s3319_s17  ;;  %753 = vrot.lane.b32.xlu0 %v3490_v44, %s3320_s18 }
 0x113   :  { %755 = vrot.lane.b32.xlu1 %v3500_v53, %s3320_s18  ;;  %769 = vrot.lane.b32.xlu0 %v3498_v52, %s3320_s18 }
 0x117   :  { %771 = vrot.lane.b32.xlu1 %v3515_v59, %s3320_s18  ;;  %834 = vrot.lane.b32.xlu0 %v3490_v44, %s3321_s19 }
 0x11b   :  { %836 = vrot.lane.b32.xlu1 %v3500_v53, %s3321_s19  ;;  %850 = vrot.lane.b32.xlu0 %v3498_v52, %s3321_s19 }
 0x11f   :  { %852 = vrot.lane.b32.xlu1 %v3515_v59, %s3321_s19  ;;  %915 = vrot.lane.b32.xlu0 %v3490_v44, %s3322_s20 }
 0x123   :  { %917 = vrot.lane.b32.xlu1 %v3500_v53, %s3322_s20  ;;  %322 = vrot.lane.b32.xlu0 %v3578_v1, %s3315_s2 }
 0x127   :  { %324 = vrot.lane.b32.xlu1 %v3588_v6, %s3315_s2  ;;  %338 = vrot.lane.b32.xlu0 %v3586_v5, %s3315_s2 }
 0x12b   :  { %340 = vrot.lane.b32.xlu1 %v3595_v8, %s3315_s2  ;;  %405 = vrot.lane.b32.xlu0 %v3578_v1, %s3316_s14 }
 0x12f   :  { %407 = vrot.lane.b32.xlu1 %v3588_v6, %s3316_s14  ;;  %421 = vrot.lane.b32.xlu0 %v3586_v5, %s3316_s14 }
 0x133   :  { %423 = vrot.lane.b32.xlu1 %v3595_v8, %s3316_s14  ;;  %486 = vrot.lane.b32.xlu0 %v3578_v1, %s3317_s15 }
 0x137   :  { %488 = vrot.lane.b32.xlu1 %v3588_v6, %s3317_s15  ;;  %502 = vrot.lane.b32.xlu0 %v3586_v5, %s3317_s15 }
 0x13b   :  { %504 = vrot.lane.b32.xlu1 %v3595_v8, %s3317_s15  ;;  %567 = vrot.lane.b32.xlu0 %v3578_v1, %s3318_s16 }
 0x13f   :  { %569 = vrot.lane.b32.xlu1 %v3588_v6, %s3318_s16  ;;  %583 = vrot.lane.b32.xlu0 %v3586_v5, %s3318_s16 }
 0x143   :  { %585 = vrot.lane.b32.xlu1 %v3595_v8, %s3318_s16  ;;  %680 = vrot.lane.b32.xlu0 %v3578_v1, %s3319_s17 }
 0x147   :  { %682 = vrot.lane.b32.xlu1 %v3588_v6, %s3319_s17  ;;  %696 = vrot.lane.b32.xlu0 %v3586_v5, %s3319_s17 }
 0x14b   :  { %698 = vrot.lane.b32.xlu1 %v3595_v8, %s3319_s17  ;;  %761 = vrot.lane.b32.xlu0 %v3578_v1, %s3320_s18 }
 0x14f   :  { %763 = vrot.lane.b32.xlu1 %v3588_v6, %s3320_s18  ;;  %777 = vrot.lane.b32.xlu0 %v3586_v5, %s3320_s18 }
 0x153   :  { %779 = vrot.lane.b32.xlu1 %v3595_v8, %s3320_s18  ;;  %842 = vrot.lane.b32.xlu0 %v3578_v1, %s3321_s19 }
 0x157   :  { %844 = vrot.lane.b32.xlu1 %v3588_v6, %s3321_s19  ;;  %858 = vrot.lane.b32.xlu0 %v3586_v5, %s3321_s19 }
 0x159   :  { %v3651_v12 = vpop.permute.xlu0 %314 }
 0x15b   :  { %860 = vrot.lane.b32.xlu1 %v3595_v8, %s3321_s19  ;;  %923 = vrot.lane.b32.xlu0 %v3578_v1, %s3322_s20 }
 0x15d   :  { %v3663_v16 = vpop.permute.xlu1 %316  ;;  %v3665_v17 = vpop.permute.xlu0 %330 }
 0x15f   :  { %925 = vrot.lane.b32.xlu1 %v3588_v6, %s3322_s20  ;;  %318 = vrot.lane.b32.xlu0 %v3657_v13, %s3315_s2 }
 0x161   :  { %v3677_v21 = vpop.permute.xlu1 %332  ;;  %v3679_v22 = vpop.permute.xlu0 %397 }
 0x163   :  { %320 = vrot.lane.b32.xlu1 %v3675_v20, %s3315_s2  ;;  %334 = vrot.lane.b32.xlu0 %v3671_v18, %s3315_s2 }
 0x165   :  { %v3687_v24 = vpop.permute.xlu1 %399  ;;  %v3689_v25 = vpop.permute.xlu0 %413 }
 0x167   :  { %336 = vrot.lane.b32.xlu1 %v3685_v23, %s3315_s2  ;;  %401 = vrot.lane.b32.xlu0 %v3657_v13, %s3316_s14 }
 0x169   :  { %v3695_v26 = vpop.permute.xlu1 %415  ;;  %v3697_v27 = vpop.permute.xlu0 %478 }
 0x16b   :  { %403 = vrot.lane.b32.xlu1 %v3675_v20, %s3316_s14  ;;  %417 = vrot.lane.b32.xlu0 %v3671_v18, %s3316_s14 }
 0x16d   :  { %v3703_v28 = vpop.permute.xlu1 %480  ;;  %v3705_v29 = vpop.permute.xlu0 %494 }
 0x16f   :  { %419 = vrot.lane.b32.xlu1 %v3685_v23, %s3316_s14  ;;  %482 = vrot.lane.b32.xlu0 %v3657_v13, %s3317_s15 }
 0x171   :  { %v3711_v30 = vpop.permute.xlu1 %496  ;;  %v3713_v31 = vpop.permute.xlu0 %559 }
 0x173   :  { %484 = vrot.lane.b32.xlu1 %v3675_v20, %s3317_s15  ;;  %498 = vrot.lane.b32.xlu0 %v3671_v18, %s3317_s15 }
 0x175   :  { %v3719_v32 = vpop.permute.xlu1 %561  ;;  %v3721_v33 = vpop.permute.xlu0 %575 }
 0x176   :  { %6717 = vst [vmem:[#allocation14_spill] sm:$0xff] %v3719_v32 }
 0x177   :  { %500 = vrot.lane.b32.xlu1 %v3685_v23, %s3317_s15  ;;  %563 = vrot.lane.b32.xlu0 %v3657_v13, %s3318_s16 }
 0x179   :  { %v3727_v34 = vpop.permute.xlu1 %577  ;;  %v3729_v35 = vpop.permute.xlu0 %672 }
 0x17a   :  { %6718 = vst [vmem:[#allocation15_spill] sm:$0xff] %v3727_v34  ;;  %6719 = vst [vmem:[#allocation16_spill] sm:$0xff] %v3729_v35 }
 0x17b   :  { %565 = vrot.lane.b32.xlu1 %v3675_v20, %s3318_s16  ;;  %579 = vrot.lane.b32.xlu0 %v3671_v18, %s3318_s16 }
 0x17d   :  { %v3735_v36 = vpop.permute.xlu1 %674  ;;  %v3737_v37 = vpop.permute.xlu0 %688 }
 0x17e   :  { %6720 = vst [vmem:[#allocation17_spill] sm:$0xff] %v3735_v36  ;;  %6721 = vst [vmem:[#allocation18_spill] sm:$0xff] %v3737_v37  ;;  %v1009_v36 = vld [vmem:[%s6492_s5 + $0x8] sm:$0xff] }
 0x17f   :  { %581 = vrot.lane.b32.xlu1 %v3685_v23, %s3318_s16  ;;  %676 = vrot.lane.b32.xlu0 %v3657_v13, %s3319_s17 }
 0x181   :  { %v3743_v38 = vpop.permute.xlu1 %690  ;;  %v3745_v39 = vpop.permute.xlu0 %753 }
 0x182   :  { %6722 = vst [vmem:[#allocation19_spill] sm:$0xff] %v3743_v38  ;;  %6723 = vst [vmem:[#allocation20_spill] sm:$0xff] %v3745_v39 }
 0x183   :  { %678 = vrot.lane.b32.xlu1 %v3675_v20, %s3319_s17  ;;  %692 = vrot.lane.b32.xlu0 %v3671_v18, %s3319_s17 }
 0x185   :  { %v3751_v40 = vpop.permute.xlu1 %755  ;;  %v3753_v41 = vpop.permute.xlu0 %769 }
 0x186   :  { %6724 = vst [vmem:[#allocation21_spill] sm:$0xff] %v3751_v40  ;;  %6725 = vst [vmem:[#allocation22_spill] sm:$0xff] %v3753_v41 }
 0x187   :  { %694 = vrot.lane.b32.xlu1 %v3685_v23, %s3319_s17  ;;  %757 = vrot.lane.b32.xlu0 %v3657_v13, %s3320_s18 }
 0x189   :  { %v3759_v42 = vpop.permute.xlu1 %771  ;;  %v3761_v43 = vpop.permute.xlu0 %834 }
 0x18a   :  { %6726 = vst [vmem:[#allocation23_spill] sm:$0xff] %v3759_v42  ;;  %6727 = vst [vmem:[#allocation24_spill] sm:$0xff] %v3761_v43 }
 0x18b   :  { %759 = vrot.lane.b32.xlu1 %v3675_v20, %s3320_s18  ;;  %773 = vrot.lane.b32.xlu0 %v3671_v18, %s3320_s18 }
 0x18d   :  { %v3767_v45 = vpop.permute.xlu1 %836  ;;  %v3769_v46 = vpop.permute.xlu0 %850 }
 0x18e   :  { %6728 = vst [vmem:[#allocation25_spill] sm:$0xff] %v3767_v45  ;;  %6729 = vst [vmem:[#allocation26_spill] sm:$0xff] %v3769_v46 }
 0x18f   :  { %775 = vrot.lane.b32.xlu1 %v3685_v23, %s3320_s18  ;;  %838 = vrot.lane.b32.xlu0 %v3657_v13, %s3321_s19 }
 0x191   :  { %v3777_v49 = vpop.permute.xlu1 %852  ;;  %v3779_v50 = vpop.permute.xlu0 %915 }
 0x192   :  { %6730 = vst [vmem:[#allocation27_spill] sm:$0xff] %v3777_v49  ;;  %6731 = vst [vmem:[#allocation28_spill] sm:$0xff] %v3779_v50 }
 0x193   :  { %840 = vrot.lane.b32.xlu1 %v3675_v20, %s3321_s19  ;;  %854 = vrot.lane.b32.xlu0 %v3671_v18, %s3321_s19 }
 0x195   :  { %v3794_v60 = vpop.permute.xlu1 %917  ;;  %v323_v61 = vpop.permute.xlu0 %322 }
 0x196   :  { %6733 = vst [vmem:[#allocation30_spill] sm:$0xff] %v3794_v60  ;;  %v357_v62 = vsel %vm348_vm2, %v3651_v12, %v323_v61 }
 0x197   :  { %856 = vrot.lane.b32.xlu1 %v3685_v23, %s3321_s19  ;;  %326 = vrot.lane.b32.xlu0 %v3790_v56, %s3315_s2  ;;  %v382_v63 = vmul.f32 %v3805_v4, %v357_v62  ;;  %v3851_v62 = vmax.f32 %v296_v58, 0.0  ;;  %v353_v58 = vsel %vm348_vm2, %v323_v61, %v3665_v17 }
 0x199   :  { %v325_v9 = vpop.permute.xlu1 %324  ;;  %v339_v10 = vpop.permute.xlu0 %338  ;;  %6737 = vst [vmem:[#allocation34_spill] sm:$0xff] %v3851_v62 }
 0x19a   :  { %v358_v15 = vsel %vm348_vm2, %v3663_v16, %v325_v9  ;;  %v349_v0 = vsel %vm348_vm2, %v3665_v17, %v339_v10  ;;  %v361_v3 = vsel %vm348_vm2, %v339_v10, %v3651_v12  ;;  %v354_v60 = vsel %vm348_vm2, %v325_v9, %v3677_v21 }
 0x19b   :  { %v386_v11 = vmul.f32 %v3805_v4, %v358_v15  ;;  %328 = vrot.lane.b32.xlu1 %v3814_v7, %s3315_s2  ;;  %342 = vrot.lane.b32.xlu0 %v3818_v14, %s3315_s2  ;;  %v3856_v15 = vld [vmem:[%s6490_s1 + $0x10] sm:$0xff]  ;;  %v381_v9 = vmul.f32 %v3836_v48, %v361_v3  ;;  %v384_v43 = vmul.f32 %v3839_v57, %v349_v0 }
 0x19c   :  { %v3864_v12 = vrot.slane %v3856_v15, %v367_v55 }
 0x19d   :  { %v341_v50 = vpop.permute.xlu1 %340  ;;  %v3861_v49 = vpop.permute.xlu0 %405  ;;  %v2873_v45 = vpack.c.bf16 %v386_v11, %v382_v63 }
 0x19e   :  { %v350_v10 = vsel %vm348_vm2, %v3677_v21, %v341_v50  ;;  %v362_v46 = vsel %vm348_vm2, %v341_v50, %v3663_v16  ;;  %v387_v17 = vmul.f32 %v3864_v12, %v354_v60  ;;  %v383_v50 = vmul.f32 %v3864_v12, %v353_v58 }
 0x19f   :  { %v385_v63 = vmul.f32 %v3836_v48, %v362_v46  ;;  %v388_v55 = vmul.f32 %v3839_v57, %v350_v10  ;;  %344 = vrot.lane.b32.xlu1 %v3851_v62, %s3315_s2  ;;  %409 = vrot.lane.b32.xlu0 %v3790_v56, %s3316_s14 }
 0x1a0   :  { %2874 = vmatprep.subr.bf16.mxu0 %v2873_v45  ;;  %v2947_v46 = vpack.c.bf16 %v387_v17, %v383_v50 }
 0x1a1   :  { %v2875_v21 = vpack.c.bf16 %v385_v63, %v381_v9  ;;  %v3884_v61 = vpop.permute.xlu1 %407  ;;  %v3886_v16 = vpop.permute.xlu0 %421  ;;  %v2945_v3 = vpack.c.bf16 %v388_v55, %v384_v43 }
 0x1a3   :  { %411 = vrot.lane.b32.xlu1 %v3814_v7, %s3316_s14  ;;  %425 = vrot.lane.b32.xlu0 %v3818_v14, %s3316_s14 }
 0x1a4   :  { %2876 = vmatpush1.bf16.msra.mxu0 %v2875_v21  ;;  %2946 = vmatprep.subr.bf16.mxu1 %v2945_v3 }
 0x1a5   :  { %v3893_v60 = vpop.permute.xlu1 %423  ;;  %v3895_v45 = vpop.permute.xlu0 %486  ;;  %2948 = vmatpush1.bf16.msra.mxu1 %v2947_v46 }
 0x1a7   :  { %427 = vrot.lane.b32.xlu1 %v3851_v62, %s3316_s14  ;;  %490 = vrot.lane.b32.xlu0 %v3790_v56, %s3317_s15 }
 0x1a9   :  { %v3901_v43 = vpop.permute.xlu1 %488  ;;  %v3903_v11 = vpop.permute.xlu0 %502 }
 0x1ab   :  { %492 = vrot.lane.b32.xlu1 %v3814_v7, %s3317_s15  ;;  %506 = vrot.lane.b32.xlu0 %v3818_v14, %s3317_s15 }
 0x1ad   :  { %v3909_v0 = vpop.permute.xlu1 %504  ;;  %v3911_v58 = vpop.permute.xlu0 %567 }
 0x1af   :  { %508 = vrot.lane.b32.xlu1 %v3851_v62, %s3317_s15  ;;  %571 = vrot.lane.b32.xlu0 %v3790_v56, %s3318_s16 }
 0x1b1   :  { %v3917_v10 = vpop.permute.xlu1 %569  ;;  %v3919_v9 = vpop.permute.xlu0 %583 }
 0x1b2   :  { %6738 = vst [vmem:[#allocation35_spill] sm:$0xff] %v3917_v10  ;;  %6739 = vst [vmem:[#allocation36_spill] sm:$0xff] %v3919_v9 }
 0x1b3   :  { %573 = vrot.lane.b32.xlu1 %v3814_v7, %s3318_s16  ;;  %587 = vrot.lane.b32.xlu0 %v3818_v14, %s3318_s16 }
 0x1b5   :  { %v3925_v63 = vpop.permute.xlu1 %585  ;;  %v3927_v55 = vpop.permute.xlu0 %680 }
 0x1b6   :  { %6740 = vst [vmem:[#allocation37_spill] sm:$0xff] %v3925_v63  ;;  %6741 = vst [vmem:[#allocation38_spill] sm:$0xff] %v3927_v55  ;;  %v1008_v55 = vld [vmem:[%s6492_s5] sm:$0xff] }
 0x1b7   :  { %589 = vrot.lane.b32.xlu1 %v3851_v62, %s3318_s16  ;;  %684 = vrot.lane.b32.xlu0 %v3790_v56, %s3319_s17 }
 0x1b9   :  { %v3933_v17 = vpop.permute.xlu1 %682  ;;  %v3935_v21 = vpop.permute.xlu0 %696 }
 0x1ba   :  { %6742 = vst [vmem:[#allocation39_spill] sm:$0xff] %v3933_v17  ;;  %6743 = vst [vmem:[#allocation40_spill] sm:$0xff] %v3935_v21 }
 0x1bb   :  { %933 = vrot.lane.b32.xlu1 %v3515_v59, %s3322_s20  ;;  %700 = vrot.lane.b32.xlu0 %v3818_v14, %s3319_s17 }
 0x1bd   :  { %v3941_v3 = vpop.permute.xlu1 %698  ;;  %v3943_v50 = vpop.permute.xlu0 %761 }
 0x1be   :  { %6744 = vst [vmem:[#allocation41_spill] sm:$0xff] %v3941_v3  ;;  %6745 = vst [vmem:[#allocation42_spill] sm:$0xff] %v3943_v50 }
 0x1bf   :  { %686 = vrot.lane.b32.xlu1 %v3814_v7, %s3319_s17  ;;  %765 = vrot.lane.b32.xlu0 %v3790_v56, %s3320_s18 }
 0x1c1   :  { %v3949_v46 = vpop.permute.xlu1 %763  ;;  %v3951_v42 = vpop.permute.xlu0 %777 }
 0x1c2   :  { %6746 = vst [vmem:[#allocation43_spill] sm:$0xff] %v3949_v46  ;;  %6747 = vst [vmem:[#allocation44_spill] sm:$0xff] %v3951_v42 }
 0x1c3   :  { %702 = vrot.lane.b32.xlu1 %v3851_v62, %s3319_s17  ;;  %781 = vrot.lane.b32.xlu0 %v3818_v14, %s3320_s18 }
 0x1c5   :  { %v3957_v41 = vpop.permute.xlu1 %779  ;;  %v3959_v40 = vpop.permute.xlu0 %842 }
 0x1c6   :  { %6748 = vst [vmem:[#allocation45_spill] sm:$0xff] %v3957_v41  ;;  %6749 = vst [vmem:[#allocation46_spill] sm:$0xff] %v3959_v40 }
 0x1c7   :  { %767 = vrot.lane.b32.xlu1 %v3814_v7, %s3320_s18  ;;  %846 = vrot.lane.b32.xlu0 %v3790_v56, %s3321_s19 }
 0x1c9   :  { %v3965_v39 = vpop.permute.xlu1 %844  ;;  %v3967_v46 = vpop.permute.xlu0 %858 }
 0x1ca   :  { %6750 = vst [vmem:[#allocation47_spill] sm:$0xff] %v3965_v39  ;;  %6751 = vst [vmem:[#allocation48_spill] sm:$0xff] %v3967_v46  ;;  %v997_v46 = vld [vmem:[%s6491_s4 + $0x8] sm:$0xff] }
 0x1cb   :  { %783 = vrot.lane.b32.xlu1 %v3851_v62, %s3320_s18  ;;  %862 = vrot.lane.b32.xlu0 %v3818_v14, %s3321_s19 }
 0x1cc   :  { %1109 = vmatprep.mubr.f32.mxu0 %v997_v46  ;;  %1287 = vmatprep.mubr.f32.mxu1 %v997_v46 }
 0x1cd   :  { %v3973_v42 = vpop.permute.xlu1 %860  ;;  %v3975_v41 = vpop.permute.xlu0 %923 }
 0x1ce   :  { %6752 = vst [vmem:[#allocation49_spill] sm:$0xff] %v3973_v42  ;;  %6753 = vst [vmem:[#allocation50_spill] sm:$0xff] %v3975_v41 }
 0x1cf   :  { %848 = vrot.lane.b32.xlu1 %v3814_v7, %s3321_s19  ;;  %931 = vrot.lane.b32.xlu0 %v3498_v52, %s3322_s20 }
 0x1d1   :  { %v3981_v40 = vpop.permute.xlu1 %925  ;;  %v3983_v39 = vpop.permute.xlu0 %318 }
 0x1d2   :  { %6754 = vst [vmem:[#allocation51_spill] sm:$0xff] %v3981_v40 }
 0x1d3   :  { %864 = vrot.lane.b32.xlu1 %v3851_v62, %s3321_s19  ;;  %939 = vrot.lane.b32.xlu0 %v3586_v5, %s3322_s20 }
 0x1d5   :  { %v3992_v41 = vpop.permute.xlu1 %320  ;;  %v3994_v42 = vpop.permute.xlu0 %334 }
 0x1d7   :  { %941 = vrot.lane.b32.xlu1 %v3595_v8, %s3322_s20  ;;  %919 = vrot.lane.b32.xlu0 %v3657_v13, %s3322_s20 }
 0x1d9   :  { %v4000_v40 = vpop.permute.xlu1 %336  ;;  %v4002_v50 = vpop.permute.xlu0 %401 }
 0x1db   :  { %921 = vrot.lane.b32.xlu1 %v3675_v20, %s3322_s20  ;;  %927 = vrot.lane.b32.xlu0 %v3790_v56, %s3322_s20 }
 0x1dd   :  { %v4008_v46 = vpop.permute.xlu1 %403  ;;  %v4010_v21 = vpop.permute.xlu0 %417 }
 0x1df   :  { %929 = vrot.lane.b32.xlu1 %v3814_v7, %s3322_s20  ;;  %935 = vrot.lane.b32.xlu0 %v3671_v18, %s3322_s20 }
 0x1e1   :  { %v4016_v37 = vpop.permute.xlu1 %419  ;;  %v4018_v3 = vpop.permute.xlu0 %482 }
 0x1e3   :  { %937 = vrot.lane.b32.xlu1 %v3685_v23, %s3322_s20  ;;  %943 = vrot.lane.b32.xlu0 %v3818_v14, %s3322_s20 }
 0x1e5   :  { %v4024_v38 = vpop.permute.xlu1 %484  ;;  %v4026_v35 = vpop.permute.xlu0 %498 }
 0x1e6   :  { %6755 = vst [vmem:[#allocation52_spill] sm:$0xff] %v4024_v38  ;;  %6756 = vst [vmem:[#allocation53_spill] sm:$0xff] %v4026_v35  ;;  %v1010_v35 = vld [vmem:[%s6492_s5 + $0x10] sm:$0xff]  ;;  %v1011_v38 = vld [vmem:[%s6492_s5 + $0x18] sm:$0xff] }
 0x1e7   :  { %945 = vrot.lane.b32.xlu1 %v3851_v62, %s3322_s20  ;;  %1014 = vperm.xlu0 %3307, %v1008_v55  }
 0x1e9   :  { %v4036_v17 = vpop.permute.xlu1 %500  ;;  %v4038_v63 = vpop.permute.xlu0 %563 }
 0x1ea   :  { %6757 = vst [vmem:[#allocation54_spill] sm:$0xff] %v4036_v17  ;;  %6758 = vst [vmem:[#allocation55_spill] sm:$0xff] %v4038_v63  ;;  %v642_v63 = vsub.s32 4, %v3783_v54 }
 0x1eb   :  { %1019 = vperm.xlu1 %3308, %v1009_v36   ;;  %1024 = vperm.xlu0 %3307, %v1010_v35  }
 0x1ec   :  { %v4060_v35 = vrot.slane %v3802_v2, %v642_v63  ;;  %v4063_v36 = vrot.slane %v3826_v19, %v642_v63 }
 0x1ed   :  { %v4046_v9 = vpop.permute.xlu1 %565  ;;  %v4048_v55 = vpop.permute.xlu0 %579 }
 0x1ee   :  { %6759 = vst [vmem:[#allocation56_spill] sm:$0xff] %v4046_v9  ;;  %6760 = vst [vmem:[#allocation57_spill] sm:$0xff] %v4048_v55 }
 0x1ef   :  { %1029 = vperm.xlu1 %3308, %v1011_v38   ;;  %6765 = vst [vmem:[#allocation62_spill] sm:$0xff] %v4060_v35  ;;  %6766 = vst [vmem:[#allocation63_spill] sm:$0xff] %v4063_v36  ;;  %v4070_v38 = vrot.slane %v3831_v47, %v642_v63 }
 0x1f1   :  { %v4050_v32 = vpop.permute.xlu1 %581  ;;  %v4052_v17 = vpop.permute.xlu0 %676  ;;  %6769 = vst [vmem:[#allocation66_spill] sm:$0xff] %v4070_v38 }
 0x1f2   :  { %6761 = vst [vmem:[#allocation58_spill] sm:$0xff] %v4050_v32  ;;  %6762 = vst [vmem:[#allocation59_spill] sm:$0xff] %v4052_v17  ;;  %v4073_v17 = vrot.slane %v3856_v15, %v642_v63  ;;  %v4085_v32 = vmul.f32 %v4060_v35, %v3588_v6  ;;  %v4093_v63 = vmul.f32 %v4063_v36, %v3500_v53 }
 0x1f3   :  { %v4105_v6 = vmul.f32 %v4063_v36, %v3657_v13  ;;  %v4125_v13 = vmul.f32 %v4070_v38, %v3818_v14 }
 0x1f4   :  { %6770 = vst [vmem:[#allocation67_spill] sm:$0xff] %v4073_v17  ;;  %6773 = vst [vmem:[#allocation70_spill] sm:$0xff] %v4085_v32  ;;  %v4113_v53 = vmul.f32 %v4073_v17, %v3671_v18  ;;  %v4133_v18 = vmul.f32 %v4073_v17, %v3685_v23  ;;  %v804_v23 = vsub.s32 6, %v3783_v54 }
 0x1f5   :  { %v4055_v10 = vpop.permute.xlu1 %678  ;;  %v4057_v34 = vpop.permute.xlu0 %692  ;;  %6775 = vst [vmem:[#allocation72_spill] sm:$0xff] %v4093_v63  ;;  %6778 = vst [vmem:[#allocation75_spill] sm:$0xff] %v4105_v6 }
 0x1f6   :  { %6763 = vst [vmem:[#allocation60_spill] sm:$0xff] %v4055_v10  ;;  %6764 = vst [vmem:[#allocation61_spill] sm:$0xff] %v4057_v34  ;;  %v4077_v10 = vmul.f32 %v4060_v35, %v3578_v1  ;;  %v4081_v34 = vmul.f32 %v4063_v36, %v3490_v44  ;;  %v4097_v1 = vmul.f32 %v4073_v17, %v3515_v59 }
 0x1f7   :  { %v4101_v44 = vmul.f32 %v4060_v35, %v3790_v56  ;;  %6780 = vst [vmem:[#allocation77_spill] sm:$0xff] %v4113_v53  ;;  %v4121_v56 = vmul.f32 %v4060_v35, %v3814_v7  ;;  %6784 = vst [vmem:[#allocation81_spill] sm:$0xff] %v4125_v13  ;;  %v4142_v7 = vmul.f32 %v4073_v17, %v3498_v52  ;;  %v529_v35 = vsub.s32 2, %v3783_v54 }
 0x1f8   :  { %6771 = vst [vmem:[#allocation68_spill] sm:$0xff] %v4077_v10  ;;  %6772 = vst [vmem:[#allocation69_spill] sm:$0xff] %v4081_v34  ;;  %v610_v52 = vsub.s32 3, %v3783_v54  ;;  %v4234_v63 = vrot.slane %v3826_v19, %v804_v23  ;;  %v443_v10 = vsel %vm429_vm3, %v3893_v60, %v3687_v24  ;;  %v4261_v32 = vrot.slane %v3831_v47, %v804_v23 }
 0x1f9   :  { %v4065_v9 = vpop.permute.xlu1 %694  ;;  %v4067_v55 = vpop.permute.xlu0 %757  ;;  %6776 = vst [vmem:[#allocation73_spill] sm:$0xff] %v4097_v1  ;;  %6777 = vst [vmem:[#allocation74_spill] sm:$0xff] %v4101_v44  ;;  %v4186_v53 = vrot.slane %v3856_v15, %v529_v35  ;;  %v4192_v6 = vrot.slane %v3831_v47, %v529_v35  ;;  %v439_v44 = vsel %vm429_vm3, %v3687_v24, %v3884_v61 }
 0x1fa   :  { %6767 = vst [vmem:[#allocation64_spill] sm:$0xff] %v4065_v9  ;;  %6768 = vst [vmem:[#allocation65_spill] sm:$0xff] %v4067_v55  ;;  %v4089_v55 = vmul.f32 %v4070_v38, %v3595_v8  ;;  %v4109_v8 = vmul.f32 %v4063_v36, %v3675_v20  ;;  %v4129_v20 = vmul.f32 %v4070_v38, %v3851_v62  ;;  %v448_v36 = vsub.s32 1, %v3783_v54 }
 0x1fb   :  { %6783 = vst [vmem:[#allocation80_spill] sm:$0xff] %v4121_v56  ;;  %6786 = vst [vmem:[#allocation83_spill] sm:$0xff] %v4133_v18  ;;  %v4189_v18 = vrot.slane %v3826_v19, %v529_v35  ;;  %v4201_v13 = vrot.slane %v3826_v19, %v610_v52 }
 0x1fc   :  { %6774 = vst [vmem:[#allocation71_spill] sm:$0xff] %v4089_v55  ;;  %6779 = vst [vmem:[#allocation76_spill] sm:$0xff] %v4109_v8  ;;  %v4176_v62 = vrot.slane %v3826_v19, %v448_v36  ;;  %v4179_v14 = vrot.slane %v3831_v47, %v448_v36  ;;  %v4195_v8 = vrot.slane %v3802_v2, %v610_v52 }
 0x1fd   :  { %v4115_v9 = vpop.permute.xlu1 %759  ;;  %v4117_v59 = vpop.permute.xlu0 %773  ;;  %6785 = vst [vmem:[#allocation82_spill] sm:$0xff] %v4129_v20  ;;  %6788 = vst [vmem:[#allocation85_spill] sm:$0xff] %v4142_v7  ;;  %v4204_v20 = vrot.slane %v3831_v47, %v610_v52  ;;  %v4248_v55 = vrot.slane %v3856_v15, %v804_v23 }
 0x1fe   :  { %6781 = vst [vmem:[#allocation78_spill] sm:$0xff] %v4115_v9  ;;  %6782 = vst [vmem:[#allocation79_spill] sm:$0xff] %v4117_v59  ;;  %v4138_v9 = vmul.f32 %v4070_v38, %v3586_v5  ;;  %v4168_v59 = vrot.slane %v3802_v2, %v448_v36  ;;  %v4171_v5 = vrot.slane %v3856_v15, %v448_v36 }
 0x1ff   :  { %v4198_v36 = vrot.slane %v3856_v15, %v610_v52  ;;  %v4222_v52 = vsub.s32 7, %v3783_v54  ;;  %6800 = vst [vmem:[#allocation97_spill] sm:$0xff] %v4234_v63  ;;  %6802 = vst [vmem:[#allocation99_spill] sm:$0xff] %v4248_v55 }
 0x200   :  { %6787 = vst [vmem:[#allocation84_spill] sm:$0xff] %v4138_v9  ;;  %6791 = vst [vmem:[#allocation88_spill] sm:$0xff] %v4168_v59  ;;  %v4245_v9 = vrot.slane %v3802_v2, %v804_v23 }
 0x201   :  { %v4156_v17 = vpop.permute.xlu1 %775  ;;  %v4158_v38 = vpop.permute.xlu0 %838  ;;  %6792 = vst [vmem:[#allocation89_spill] sm:$0xff] %v4171_v5  ;;  %6793 = vst [vmem:[#allocation90_spill] sm:$0xff] %v4198_v36  ;;  %v4275_v55 = vrot.slane %v3826_v19, %v4222_v52  ;;  %v4279_v23 = vrot.slane %v3802_v2, %v4222_v52 }
 0x202   :  { %6789 = vst [vmem:[#allocation86_spill] sm:$0xff] %v4156_v17  ;;  %6790 = vst [vmem:[#allocation87_spill] sm:$0xff] %v4158_v38  ;;  %v723_v17 = vsub.s32 5, %v3783_v54  ;;  %v4183_v38 = vrot.slane %v3802_v2, %v529_v35  ;;  %v435_v35 = vsel %vm429_vm3, %v3884_v61, %v3695_v26  ;;  %v434_v61 = vsel %vm429_vm3, %v3861_v49, %v3689_v25 }
 0x203   :  { %v438_v54 = vsel %vm429_vm3, %v3679_v22, %v3861_v49  ;;  %6801 = vst [vmem:[#allocation98_spill] sm:$0xff] %v4245_v9  ;;  %v4254_v63 = vmul.f32 %v4171_v5, %v435_v35  ;;  %6803 = vst [vmem:[#allocation100_spill] sm:$0xff] %v4261_v32  ;;  %v442_v35 = vsel %vm429_vm3, %v3886_v16, %v3679_v22 }
 0x204   :  { %v4219_v56 = vrot.slane %v3826_v19, %v723_v17  ;;  %v4231_v34 = vrot.slane %v3831_v47, %v723_v17  ;;  %6805 = vst [vmem:[#allocation102_spill] sm:$0xff] %v4275_v55  ;;  %6806 = vst [vmem:[#allocation103_spill] sm:$0xff] %v4279_v23  ;;  %v4282_v24 = vmul.f32 %v4168_v59, %v438_v54 }
 0x205   :  { %v4206_v7 = vpop.permute.xlu1 %840  ;;  %v4208_v1 = vpop.permute.xlu0 %854  ;;  %v519_v22 = vsel %vm510_vm4, %v3697_v27, %v3895_v45  ;;  %v4296_v19 = vmul.f32 %v4176_v62, %v443_v10  ;;  %v520_v55 = vsel %vm510_vm4, %v3703_v28, %v3901_v43 }
 0x206   :  { %6794 = vst [vmem:[#allocation91_spill] sm:$0xff] %v4206_v7  ;;  %6795 = vst [vmem:[#allocation92_spill] sm:$0xff] %v4208_v1  ;;  %v4225_v7 = vrot.slane %v3802_v2, %v723_v17  ;;  %v4228_v1 = vrot.slane %v3856_v15, %v723_v17  ;;  %v4251_v17 = vmul.f32 %v4168_v59, %v439_v44 }
 0x207   :  { %6796 = vst [vmem:[#allocation93_spill] sm:$0xff] %v4219_v56  ;;  %6799 = vst [vmem:[#allocation96_spill] sm:$0xff] %v4231_v34  ;;  %v430_v44 = vsel %vm429_vm3, %v3689_v25, %v3886_v16  ;;  %v431_v25 = vsel %vm429_vm3, %v3695_v26, %v3893_v60  ;;  %v515_v2 = vsel %vm510_vm4, %v3895_v45, %v3705_v29 }
 0x208   :  { %6797 = vst [vmem:[#allocation94_spill] sm:$0xff] %v4225_v7  ;;  %6798 = vst [vmem:[#allocation95_spill] sm:$0xff] %v4228_v1  ;;  %v4304_v16 = vrot.slane %v3856_v15, %v4222_v52  ;;  %v4315_v10 = vmul.f32 %v4179_v14, %v430_v44  ;;  %v2881_v45 = vpack.c.bf16 %v4251_v17, %v4282_v24 }
 0x209   :  { %v4263_v49 = vpop.permute.xlu1 %856  ;;  %v327_v9 = vpop.permute.xlu0 %326  ;;  %v4321_v15 = vmul.f32 %v4179_v14, %v431_v25  ;;  %v4334_v17 = vmul.f32 %v4186_v53, %v515_v2 }
 0x20a   :  { %6804 = vst [vmem:[#allocation101_spill] sm:$0xff] %v4263_v49  ;;  %v4285_v49 = vmul.f32 %v4171_v5, %v434_v61  ;;  %6807 = vst [vmem:[#allocation104_spill] sm:$0xff] %v4304_v16  ;;  %v359_v26 = vsel %vm348_vm2, %v3983_v39, %v327_v9  ;;  %v4312_v61 = vmul.f32 %v4176_v62, %v442_v35 }
 0x20b   :  { %v4324_v16 = vmul.f32 %v4183_v38, %v519_v22  ;;  %v516_v35 = vsel %vm510_vm4, %v3901_v43, %v3711_v30  ;;  %v390_v24 = vmul.f32 %v3805_v4, %v359_v26  ;;  %v523_v43 = vsel %vm510_vm4, %v3903_v11, %v3697_v27 }
 0x20c   :  { %v2883_v23 = vpack.c.bf16 %v4296_v19, %v4312_v61  ;;  %v511_v19 = vsel %vm510_vm4, %v3705_v29, %v3903_v11 }
 0x20d   :  { %v329_v54 = vpop.permute.xlu1 %328  ;;  %v343_v60 = vpop.permute.xlu0 %342 }
 0x20e   :  { %v360_v44 = vsel %vm348_vm2, %v3992_v41, %v329_v54  ;;  %v356_v25 = vsel %vm348_vm2, %v329_v54, %v4000_v40  ;;  %v351_v2 = vsel %vm348_vm2, %v3994_v42, %v343_v60  ;;  %v363_v26 = vsel %vm348_vm2, %v343_v60, %v3983_v39 }
 0x20f   :  { %v394_v22 = vmul.f32 %v3805_v4, %v360_v44  ;;  %v4354_v54 = vmul.f32 %v4186_v53, %v516_v35  ;;  %v355_v4 = vsel %vm348_vm2, %v327_v9, %v3994_v42  ;;  %v395_v39 = vmul.f32 %v3864_v12, %v356_v25 }
 0x210   :  { %v389_v32 = vmul.f32 %v3836_v48, %v363_v26  ;;  %v392_v27 = vmul.f32 %v3839_v57, %v351_v2  ;;  %v4379_v42 = vmul.f32 %v4183_v38, %v520_v55  ;;  %v4382_v9 = vmul.f32 %v4189_v18, %v523_v43 }
 0x211   :  { %v345_v61 = vpop.permute.xlu1 %344  ;;  %v2877_v44 = vpack.c.bf16 %v394_v22, %v390_v24  ;;  %v410_v35 = vpop.permute.xlu0 %409  ;;  %v524_v25 = vsel %vm510_vm4, %v3909_v0, %v3703_v28  ;;  %v391_v22 = vmul.f32 %v3864_v12, %v355_v4  ;;  %v2963_v43 = vpack.c.bf16 %v4354_v54, %v4334_v17 }
 0x212   :  { %v352_v60 = vsel %vm348_vm2, %v4000_v40, %v345_v61  ;;  %v364_v29 = vsel %vm348_vm2, %v345_v61, %v3992_v41  ;;  %v440_v40 = vsel %vm429_vm3, %v4002_v50, %v410_v35  ;;  %v2953_v41 = vpack.c.bf16 %v4321_v15, %v4315_v10 }
 0x213   :  { %v393_v11 = vmul.f32 %v3836_v48, %v364_v29  ;;  %v396_v24 = vmul.f32 %v3839_v57, %v352_v60  ;;  %2878 = vmatprep.subr.bf16.mxu0 %v2877_v44  ;;  %v4397_v61 = vmul.f32 %v4192_v6, %v511_v19  ;;  %v512_v10 = vsel %vm510_vm4, %v3711_v30, %v3909_v0 }
 0x214   :  { %v2951_v4 = vpack.c.bf16 %v395_v39, %v391_v22  ;;  %v4412_v60 = vmul.f32 %v4189_v18, %v524_v25  ;;  %v550_v39 = vmul.f32 %v4192_v6, %v512_v10  ;;  %v600_v29 = vsel %vm591_vm5, %v3713_v31, %v3911_v58 }
 0x215   :  { %v2879_v2 = vpack.c.bf16 %v393_v11, %v389_v32  ;;  %v412_v55 = vpop.permute.xlu1 %411  ;;  %v2949_v26 = vpack.c.bf16 %v396_v24, %v392_v27  ;;  %v426_v15 = vpop.permute.xlu0 %425  ;;  %v471_v32 = vmul.f32 %v4168_v59, %v440_v40  ;;  %v2889_v24 = vpack.c.bf16 %v4379_v42, %v4324_v16 }
 0x216   :  { %v441_v28 = vsel %vm429_vm3, %v4008_v46, %v412_v55  ;;  %v437_v44 = vsel %vm429_vm3, %v412_v55, %v4016_v37  ;;  %v432_v30 = vsel %vm429_vm3, %v4010_v21, %v426_v15  ;;  %v444_v0 = vsel %vm429_vm3, %v426_v15, %v4002_v50  ;;  %v6810_v15 = vld [vmem:[#allocation35_spill] sm:$0xff] }
 0x217   :  { %v475_v19 = vmul.f32 %v4168_v59, %v441_v28  ;;  %2880 = vmatpush1.bf16.msra.mxu0 %v2879_v2  ;;  %2950 = vmatprep.subr.bf16.mxu1 %v2949_v26  ;;  %v436_v40 = vsel %vm429_vm3, %v410_v35, %v4010_v21  ;;  %v476_v50 = vmul.f32 %v4171_v5, %v437_v44 }
 0x218   :  { %2882 = vmatprep.subr.bf16.mxu0 %v2881_v45  ;;  %2952 = vmatpush1.bf16.msra.mxu1 %v2951_v4  ;;  %v470_v2 = vmul.f32 %v4176_v62, %v444_v0  ;;  %v473_v16 = vmul.f32 %v4179_v14, %v432_v30  ;;  %v2891_v35 = vpack.c.bf16 %v4412_v60, %v4382_v9 }
 0x219   :  { %v428_v27 = vpop.permute.xlu1 %427  ;;  %v2885_v11 = vpack.c.bf16 %v475_v19, %v471_v32  ;;  %2954 = vmatprep.subr.bf16.mxu1 %v2953_v41  ;;  %v491_v22 = vpop.permute.xlu0 %490  ;;  %v472_v55 = vmul.f32 %v4171_v5, %v436_v40  ;;  %v2961_v28 = vpack.c.bf16 %v550_v39, %v4397_v61  ;;  %v6811_v32 = vld [vmem:[#allocation14_spill] sm:$0xff]  ;;  %v6812_v19 = vld [vmem:[#allocation36_spill] sm:$0xff] }
 0x21a   :  { %v433_v45 = vsel %vm429_vm3, %v4016_v37, %v428_v27  ;;  %v445_v25 = vsel %vm429_vm3, %v428_v27, %v4008_v46  ;;  %v596_v37 = vsel %vm591_vm5, %v3911_v58, %v3721_v33  ;;  %v4448_v46 = vmul.f32 %v4195_v8, %v600_v29  ;;  %v6809_v58 = vld [vmem:[#allocation15_spill] sm:$0xff]  ;;  %v6814_v39 = vld [vmem:[#allocation54_spill] sm:$0xff] }
 0x21b   :  { %v474_v42 = vmul.f32 %v4176_v62, %v445_v25  ;;  %v477_v21 = vmul.f32 %v4179_v14, %v433_v45  ;;  %2884 = vmatpush1.bf16.msra.mxu0 %v2883_v23  ;;  %v521_v41 = vsel %vm510_vm4, %v4018_v3, %v491_v22  ;;  %v6808_v23 = vpack.c.bf16 %v4254_v63, %v4285_v49  ;;  %v6813_v49 = vld [vmem:[#allocation52_spill] sm:$0xff]  ;;  %v6816_v25 = vld [vmem:[#allocation37_spill] sm:$0xff] }
 0x21c   :  { %2886 = vmatprep.subr.bf16.mxu0 %v2885_v11  ;;  %v597_v4 = vsel %vm591_vm5, %v6810_v15, %v6809_v58  ;;  %v601_v44 = vsel %vm591_vm5, %v6811_v32, %v6810_v15  ;;  %v592_v63 = vsel %vm591_vm5, %v3721_v33, %v6812_v19  ;;  %v2959_v30 = vpack.c.bf16 %v476_v50, %v472_v55  ;;  %v6815_v11 = vld [vmem:[#allocation53_spill] sm:$0xff] }
 0x21d   :  { %v2887_v26 = vpack.c.bf16 %v474_v42, %v470_v2  ;;  %2956 = vmatpush1.bf16.msra.mxu1 %v6808_v23  ;;  %v493_v9 = vpop.permute.xlu1 %492  ;;  %v2957_v10 = vpack.c.bf16 %v477_v21, %v473_v16  ;;  %v507_v61 = vpop.permute.xlu0 %506  ;;  %v552_v0 = vmul.f32 %v4183_v38, %v521_v41  ;;  %v604_v33 = vsel %vm591_vm5, %v6812_v19, %v3713_v31 }
 0x21e   :  { %v522_v60 = vsel %vm510_vm4, %v6813_v49, %v493_v9  ;;  %v518_v29 = vsel %vm510_vm4, %v493_v9, %v6814_v39  ;;  %v513_v40 = vsel %vm510_vm4, %v6815_v11, %v507_v61  ;;  %v525_v50 = vsel %vm510_vm4, %v507_v61, %v4018_v3  ;;  %v6818_v61 = vld [vmem:[#allocation56_spill] sm:$0xff] }
 0x21f   :  { %v556_v27 = vmul.f32 %v4183_v38, %v522_v60  ;;  %2888 = vmatpush1.bf16.msra.mxu0 %v2887_v26  ;;  %2958 = vmatprep.subr.bf16.mxu1 %v2957_v10  ;;  %v629_v45 = vmul.f32 %v4195_v8, %v601_v44  ;;  %v593_v2 = vsel %vm591_vm5, %v6809_v58, %v6816_v25 }
 0x220   :  { %2890 = vmatprep.subr.bf16.mxu0 %v2889_v24  ;;  %v605_v31 = vsel %vm591_vm5, %v6816_v25, %v6811_v32  ;;  %v517_v3 = vsel %vm510_vm4, %v491_v22, %v6815_v11  ;;  %v557_v24 = vmul.f32 %v4186_v53, %v518_v29  ;;  %v551_v26 = vmul.f32 %v4189_v18, %v525_v50  ;;  %v6817_v32 = vld [vmem:[#allocation55_spill] sm:$0xff]  ;;  %v6819_v11 = vld [vmem:[#allocation58_spill] sm:$0xff]  ;;  %v6822_v25 = vld [vmem:[#allocation17_spill] sm:$0xff] }
 0x221   :  { %2960 = vmatpush1.bf16.msra.mxu1 %v2959_v30  ;;  %v509_v16 = vpop.permute.xlu1 %508  ;;  %v2893_v42 = vpack.c.bf16 %v556_v27, %v552_v0  ;;  %v572_v55 = vpop.permute.xlu0 %571  ;;  %v554_v23 = vmul.f32 %v4192_v6, %v513_v40  ;;  %v626_v10 = vmul.f32 %v4198_v36, %v596_v37  ;;  %v630_v58 = vmul.f32 %v4198_v36, %v597_v4 }
 0x222   :  { %v514_v21 = vsel %vm510_vm4, %v6814_v39, %v509_v16  ;;  %v526_v41 = vsel %vm510_vm4, %v509_v16, %v6813_v49  ;;  %2962 = vmatprep.subr.bf16.mxu1 %v2961_v28  ;;  %v631_v15 = vmul.f32 %v4204_v20, %v593_v2  ;;  %v602_v28 = vsel %vm591_vm5, %v6817_v32, %v572_v55 }
 0x223   :  { %v555_v9 = vmul.f32 %v4189_v18, %v526_v41  ;;  %v558_v22 = vmul.f32 %v4192_v6, %v514_v21  ;;  %2892 = vmatpush1.bf16.msra.mxu0 %v2891_v35  ;;  %v628_v44 = vmul.f32 %v4201_v13, %v605_v31  ;;  %v553_v19 = vmul.f32 %v4186_v53, %v517_v3 }
 0x224   :  { %2894 = vmatprep.subr.bf16.mxu0 %v2893_v42  ;;  %v624_v4 = vmul.f32 %v4201_v13, %v604_v33  ;;  %v627_v60 = vmul.f32 %v4204_v20, %v592_v63  ;;  %v2897_v39 = vpack.c.bf16 %v629_v45, %v4448_v46  ;;  %v633_v27 = vmul.f32 %v4195_v8, %v602_v28  ;;  %v6821_v45 = vld [vmem:[#allocation39_spill] sm:$0xff]  ;;  %v6826_v28 = vld [vmem:[#allocation41_spill] sm:$0xff] }
 0x225   :  { %v2895_v49 = vpack.c.bf16 %v555_v9, %v551_v26  ;;  %2964 = vmatpush1.bf16.msra.mxu1 %v2963_v43  ;;  %v574_v35 = vpop.permute.xlu1 %573  ;;  %v2965_v37 = vpack.c.bf16 %v558_v22, %v554_v23  ;;  %v588_v0 = vpop.permute.xlu0 %587  ;;  %v2967_v29 = vpack.c.bf16 %v557_v24, %v553_v19  ;;  %v6820_v43 = vld [vmem:[#allocation57_spill] sm:$0xff]  ;;  %v2971_v40 = vpack.c.bf16 %v630_v58, %v626_v10  ;;  %v6823_v22 = vld [vmem:[#allocation38_spill] sm:$0xff]  ;;  %v6824_v10 = vld [vmem:[#allocation16_spill] sm:$0xff] }
 0x226   :  { %v603_v30 = vsel %vm591_vm5, %v6818_v61, %v574_v35  ;;  %v599_v17 = vsel %vm591_vm5, %v574_v35, %v6819_v11  ;;  %v594_v63 = vsel %vm591_vm5, %v6820_v43, %v588_v0  ;;  %v606_v46 = vsel %vm591_vm5, %v588_v0, %v6817_v32 }
 0x227   :  { %v637_v54 = vmul.f32 %v4195_v8, %v603_v30  ;;  %2896 = vmatpush1.bf16.msra.mxu0 %v2895_v49  ;;  %2966 = vmatprep.subr.bf16.mxu1 %v2965_v37  ;;  %v2969_v33 = vpack.c.bf16 %v631_v15, %v627_v60  ;;  %v2899_v50 = vpack.c.bf16 %v628_v44, %v624_v4  ;;  %v6825_v15 = vld [vmem:[#allocation19_spill] sm:$0xff] }
 0x228   :  { %2898 = vmatprep.subr.bf16.mxu0 %v2897_v39  ;;  %v714_v2 = vsel %vm704_vm6, %v6822_v25, %v6821_v45  ;;  %v598_v42 = vsel %vm591_vm5, %v572_v55, %v6820_v43  ;;  %v638_v3 = vmul.f32 %v4198_v36, %v599_v17  ;;  %v632_v26 = vmul.f32 %v4201_v13, %v606_v46  ;;  %v6831_v46 = vld [vmem:[#allocation20_spill] sm:$0xff] }
 0x229   :  { %2968 = vmatpush1.bf16.msra.mxu1 %v2967_v29  ;;  %v590_v31 = vpop.permute.xlu1 %589  ;;  %v2901_v16 = vpack.c.bf16 %v637_v54, %v633_v27  ;;  %v4555_v41 = vpop.permute.xlu0 %684  ;;  %v635_v23 = vmul.f32 %v4204_v20, %v594_v63  ;;  %v713_v58 = vsel %vm704_vm6, %v6824_v10, %v6823_v22  ;;  %v710_v32 = vsel %vm704_vm6, %v6821_v45, %v6825_v15  ;;  %v6830_v63 = vld [vmem:[#allocation42_spill] sm:$0xff] }
 0x22a   :  { %v595_v24 = vsel %vm591_vm5, %v6819_v11, %v590_v31  ;;  %v607_v21 = vsel %vm591_vm5, %v590_v31, %v6818_v61  ;;  %2970 = vmatprep.subr.bf16.mxu1 %v2969_v33  ;;  %v706_v44 = vsel %vm704_vm6, %v6825_v15, %v6826_v28  ;;  %v4575_v19 = vrot.slane %v3831_v47, %v4222_v52  ;;  %v6828_v61 = vld [vmem:[#allocation18_spill] sm:$0xff]  ;;  %v6829_v52 = vld [vmem:[#allocation40_spill] sm:$0xff]  ;;  %v6840_v15 = vld [vmem:[#allocation71_spill] sm:$0xff] }
 0x22b   :  { %v636_v9 = vmul.f32 %v4201_v13, %v607_v21  ;;  %v639_v55 = vmul.f32 %v4204_v20, %v595_v24  ;;  %2900 = vmatpush1.bf16.msra.mxu0 %v2899_v50  ;;  %v718_v49 = vsel %vm704_vm6, %v6826_v28, %v6822_v25  ;;  %v634_v35 = vmul.f32 %v4198_v36, %v598_v42  ;;  %v6833_v50 = vld [vmem:[#allocation21_spill] sm:$0xff]  ;;  %v6834_v25 = vld [vmem:[#allocation70_spill] sm:$0xff] }
 0x22c   :  { %6827 = vst [vmem:[#allocation15_spill] sm:$0xff] %v4575_v19  ;;  %2902 = vmatprep.subr.bf16.mxu0 %v2901_v16  ;;  %v709_v30 = vsel %vm704_vm6, %v6823_v22, %v6828_v61  ;;  %v4589_v47 = vmul.f32 %v4219_v56, %v714_v2  ;;  %v705_v0 = vsel %vm704_vm6, %v6828_v61, %v6829_v52  ;;  %v6835_v2 = vld [vmem:[#allocation68_spill] sm:$0xff]  ;;  %v6837_v24 = vld [vmem:[#allocation22_spill] sm:$0xff] }
 0x22d   :  { %v2903_v37 = vpack.c.bf16 %v636_v9, %v632_v26  ;;  %2972 = vmatpush1.bf16.msra.mxu1 %v2971_v40  ;;  %v4582_v4 = vpop.permute.xlu1 %933  ;;  %v2973_v60 = vpack.c.bf16 %v639_v55, %v635_v23  ;;  %v717_v39 = vsel %vm704_vm6, %v6829_v52, %v6824_v10  ;;  %v4599_v29 = vpop.permute.xlu0 %700  ;;  %v4603_v27 = vmul.f32 %v4219_v56, %v713_v58  ;;  %v6832_v40 = vld [vmem:[#allocation43_spill] sm:$0xff]  ;;  %v6839_v22 = vld [vmem:[#allocation44_spill] sm:$0xff] }
 0x22e   :  { %v742_v11 = vmul.f32 %v4225_v7, %v710_v32  ;;  %v2975_v17 = vpack.c.bf16 %v638_v3, %v634_v35  ;;  %v4607_v54 = vmul.f32 %v4228_v1, %v706_v44  ;;  %v744_v43 = vmul.f32 %v4231_v34, %v718_v49  ;;  %v6838_v9 = vld [vmem:[#allocation23_spill] sm:$0xff]  ;;  %v6841_v32 = vld [vmem:[#allocation84_spill] sm:$0xff]  ;;  %v6843_v49 = vld [vmem:[#allocation97_spill] sm:$0xff] }
 0x22f   :  { %2904 = vmatpush1.bf16.msra.mxu0 %v2903_v37  ;;  %2974 = vmatprep.subr.bf16.mxu1 %v2973_v60  ;;  %v794_v33 = vsel %vm785_vm7, %v6831_v46, %v6830_v63  ;;  %v795_v45 = vsel %vm785_vm7, %v6833_v50, %v6832_v40  ;;  %v6836_v31 = vpack.c.bf16 %v6834_v25, %v6835_v2  ;;  %v6844_v60 = vld [vmem:[#allocation64_spill] sm:$0xff] }
 0x230   :  { %v738_v16 = vmul.f32 %v4225_v7, %v709_v30  ;;  %v4623_v42 = vmul.f32 %v4228_v1, %v705_v0  ;;  %v740_v3 = vmul.f32 %v4231_v34, %v717_v39  ;;  %v790_v21 = vsel %vm785_vm7, %v6830_v63, %v6837_v24  ;;  %v6845_v30 = vld [vmem:[#allocation72_spill] sm:$0xff]  ;;  %v6849_v63 = vld [vmem:[#allocation45_spill] sm:$0xff] }
 0x231   :  { %2906 = vmatprep.subr.bf16.mxu0 %v6836_v31  ;;  %2976 = vmatpush1.bf16.msra.mxu1 %v2975_v17  ;;  %v687_v26 = vpop.permute.xlu1 %686  ;;  %v2915_v23 = vpack.c.bf16 %v4589_v47, %v4603_v27  ;;  %v791_v55 = vsel %vm785_vm7, %v6832_v40, %v6838_v9  ;;  %v786_v10 = vsel %vm785_vm7, %v6837_v24, %v6839_v22  ;;  %v4647_v44 = vpop.permute.xlu0 %765  ;;  %v6846_v47 = vld [vmem:[#allocation69_spill] sm:$0xff]  ;;  %v6848_v27 = vld [vmem:[#allocation98_spill] sm:$0xff] }
 0x232   :  { %v798_v58 = vsel %vm785_vm7, %v6839_v22, %v6831_v46  ;;  %v6842_v28 = vpack.c.bf16 %v6840_v15, %v6841_v32  ;;  %v4650_v35 = vmul.f32 %v6843_v49, %v794_v33  ;;  %v4653_v37 = vmul.f32 %v6843_v49, %v795_v45  ;;  %v6850_v33 = vld [vmem:[#allocation80_spill] sm:$0xff]  ;;  %v6851_v40 = vld [vmem:[#allocation74_spill] sm:$0xff] }
 0x233   :  { %v712_v61 = vsel %vm704_vm6, %v687_v26, %v6844_v60  ;;  %v6847_v52 = vpack.c.bf16 %v6845_v30, %v6846_v47  ;;  %v2913_v0 = vpack.c.bf16 %v742_v11, %v738_v16  ;;  %v2987_v39 = vpack.c.bf16 %v4607_v54, %v4623_v42  ;;  %v6853_v11 = vld [vmem:[#allocation99_spill] sm:$0xff]  ;;  %v6854_v54 = vld [vmem:[#allocation100_spill] sm:$0xff]  ;;  %v6855_v42 = vld [vmem:[#allocation61_spill] sm:$0xff] }
 0x234   :  { %2978 = vmatprep.subr.bf16.mxu1 %v6842_v28  ;;  %v4664_v17 = vmul.f32 %v6848_v27, %v790_v21  ;;  %v799_v46 = vsel %vm785_vm7, %v6849_v63, %v6833_v50  ;;  %v6852_v45 = vpack.c.bf16 %v6850_v33, %v6851_v40  ;;  %v2985_v25 = vpack.c.bf16 %v744_v43, %v740_v3  ;;  %v6856_v50 = vld [vmem:[#allocation73_spill] sm:$0xff]  ;;  %v6859_v3 = vld [vmem:[#allocation60_spill] sm:$0xff]  ;;  %v6860_v32 = vld [vmem:[#allocation82_spill] sm:$0xff] }
 0x235   :  { %2908 = vmatpush1.bf16.msra.mxu0 %v6847_v52  ;;  %v4674_v2 = vmul.f32 %v6848_v27, %v791_v55  ;;  %v4677_v31 = vmul.f32 %v6853_v11, %v786_v10  ;;  %v4680_v16 = vmul.f32 %v6854_v54, %v798_v58  ;;  %v711_v24 = vsel %vm704_vm6, %v4555_v41, %v6855_v42  ;;  %v6857_v21 = vld [vmem:[#allocation85_spill] sm:$0xff]  ;;  %v703_v15 = vpop.permute.xlu1 %702  ;;  %v4703_v47 = vpop.permute.xlu0 %781  ;;  %v6865_v33 = vld [vmem:[#allocation59_spill] sm:$0xff] }
 0x236   :  { %2910 = vmatprep.subr.bf16.mxu0 %v6852_v45  ;;  %v6858_v22 = vpack.c.bf16 %v6856_v50, %v6857_v21  ;;  %v787_v43 = vsel %vm785_vm7, %v6838_v9, %v6849_v63  ;;  %v716_v55 = vsel %vm704_vm6, %v6859_v3, %v687_v26  ;;  %v750_v10 = vmul.f32 %v4225_v7, %v712_v61  ;;  %v6861_v28 = vld [vmem:[#allocation81_spill] sm:$0xff]  ;;  %v6863_v63 = vld [vmem:[#allocation46_spill] sm:$0xff]  ;;  %v6864_v26 = vld [vmem:[#allocation24_spill] sm:$0xff] }
 0x237   :  { %v720_v58 = vsel %vm704_vm6, %v703_v15, %v6859_v3  ;;  %v6862_v30 = vpack.c.bf16 %v6860_v32, %v6861_v28  ;;  %v4708_v9 = vmul.f32 %v6854_v54, %v799_v46  ;;  %v875_v61 = vsel %vm866_vm8, %v6864_v26, %v6863_v63  ;;  %v6866_v45 = vld [vmem:[#allocation76_spill] sm:$0xff]  ;;  %v6867_v50 = vld [vmem:[#allocation75_spill] sm:$0xff] }
 0x238   :  { %2980 = vmatpush1.bf16.msra.mxu1 %v6858_v22  ;;  %v719_v40 = vsel %vm704_vm6, %v4599_v29, %v6865_v33  ;;  %v6868_v21 = vpack.c.bf16 %v6866_v45, %v6867_v50  ;;  %v715_v46 = vsel %vm704_vm6, %v6865_v33, %v4555_v41  ;;  %v746_v22 = vmul.f32 %v4225_v7, %v711_v24  ;;  %v6870_v41 = vld [vmem:[#allocation83_spill] sm:$0xff]  ;;  %v6871_v33 = vld [vmem:[#allocation77_spill] sm:$0xff] }
 0x239   :  { %2982 = vmatprep.subr.bf16.mxu1 %v6862_v30  ;;  %v708_v3 = vsel %vm704_vm6, %v6844_v60, %v703_v15  ;;  %v752_v32 = vmul.f32 %v4231_v34, %v720_v58  ;;  %v4731_v28 = vmul.f32 %v6853_v11, %v787_v43  ;;  %v6869_v30 = vld [vmem:[#allocation26_spill] sm:$0xff]  ;;  %v749_v50 = vmul.f32 %v4219_v56, %v716_v55  ;;  %v4752_v58 = vpop.permute.xlu0 %846 }
 0x23a   :  { %2912 = vmatpush1.bf16.msra.mxu0 %v6868_v21  ;;  %v871_v45 = vsel %vm866_vm8, %v6863_v63, %v6869_v30  ;;  %v6872_v24 = vpack.c.bf16 %v6870_v41, %v6871_v33  ;;  %v768_v21 = vpop.permute.xlu1 %767  ;;  %v2921_v60 = vpack.c.bf16 %v4674_v2, %v4664_v17  ;;  %v707_v43 = vsel %vm704_vm6, %v6855_v42, %v4599_v29  ;;  %v6874_v41 = vld [vmem:[#allocation47_spill] sm:$0xff]  ;;  %v6875_v33 = vld [vmem:[#allocation25_spill] sm:$0xff] }
 0x23b   :  { %2914 = vmatprep.subr.bf16.mxu0 %v2913_v0  ;;  %v6873_v0 = vld [vmem:[#allocation102_spill] sm:$0xff]  ;;  %v748_v55 = vmul.f32 %v4231_v34, %v719_v40  ;;  %v2917_v63 = vpack.c.bf16 %v750_v10, %v746_v22  ;;  %v876_v17 = vsel %vm866_vm8, %v6875_v33, %v6874_v41  ;;  %v745_v2 = vmul.f32 %v4219_v56, %v715_v46  ;;  %v6877_v29 = vld [vmem:[#allocation103_spill] sm:$0xff]  ;;  %v6879_v22 = vld [vmem:[#allocation48_spill] sm:$0xff] }
 0x23c   :  { %2984 = vmatpush1.bf16.msra.mxu1 %v6872_v24  ;;  %v4745_v15 = vmul.f32 %v6873_v0, %v875_v61  ;;  %v751_v61 = vmul.f32 %v4228_v1, %v708_v3  ;;  %v6876_v24 = vld [vmem:[#allocation86_spill] sm:$0xff]  ;;  %v4764_v42 = vmul.f32 %v6877_v29, %v871_v45  ;;  %v2993_v46 = vpack.c.bf16 %v4708_v9, %v4680_v16  ;;  %v6880_v45 = vld [vmem:[#allocation79_spill] sm:$0xff] }
 0x23d   :  { %2986 = vmatprep.subr.bf16.mxu1 %v2985_v25  ;;  %v793_v52 = vsel %vm785_vm7, %v768_v21, %v6876_v24  ;;  %v6878_v25 = vld [vmem:[#allocation27_spill] sm:$0xff]  ;;  %v2989_v40 = vpack.c.bf16 %v752_v32, %v748_v55  ;;  %v867_v3 = vsel %vm866_vm8, %v6869_v30, %v6879_v22  ;;  %v2919_v5 = vpack.c.bf16 %v749_v50, %v745_v2  ;;  %v6881_v55 = vld [vmem:[#allocation78_spill] sm:$0xff]  ;;  %v863_v50 = vpop.permute.xlu0 %862  ;;  %v6883_v2 = vld [vmem:[#allocation65_spill] sm:$0xff] }
 0x23e   :  { %2916 = vmatpush1.bf16.msra.mxu0 %v2915_v23  ;;  %v872_v10 = vsel %vm866_vm8, %v6874_v41, %v6878_v25  ;;  %v747_v23 = vmul.f32 %v4228_v1, %v707_v43  ;;  %v792_v59 = vsel %vm785_vm7, %v4647_v44, %v6880_v45  ;;  %v784_v41 = vpop.permute.xlu1 %783  ;;  %v4782_v32 = vmul.f32 %v6873_v0, %v876_v17 }
 0x23f   :  { %2918 = vmatprep.subr.bf16.mxu0 %v2917_v63  ;;  %v797_v16 = vsel %vm785_vm7, %v6881_v55, %v768_v21  ;;  %v831_v9 = vmul.f32 %v6848_v27, %v793_v52  ;;  %v801_v30 = vsel %vm785_vm7, %v784_v41, %v6881_v55  ;;  %v904_v43 = vmul.f32 %v6877_v29, %v872_v10 }
 0x240   :  { %2988 = vmatpush1.bf16.msra.mxu1 %v2987_v39  ;;  %v6882_v39 = vld [vmem:[#allocation49_spill] sm:$0xff]  ;;  %v2991_v17 = vpack.c.bf16 %v751_v61, %v747_v23  ;;  %v800_v21 = vsel %vm785_vm7, %v4703_v47, %v6883_v2  ;;  %v796_v52 = vsel %vm785_vm7, %v6883_v2, %v4647_v44  ;;  %v789_v10 = vsel %vm785_vm7, %v6876_v24, %v784_v41  ;;  %v6884_v23 = vld [vmem:[#allocation104_spill] sm:$0xff] }
 0x241   :  { %2990 = vmatprep.subr.bf16.mxu1 %v2989_v40  ;;  %v880_v63 = vsel %vm866_vm8, %v6882_v39, %v6875_v33  ;;  %v827_v40 = vmul.f32 %v6848_v27, %v792_v59  ;;  %v833_v33 = vmul.f32 %v6854_v54, %v801_v30  ;;  %v2995_v61 = vpack.c.bf16 %v4731_v28, %v4677_v31 }
 0x242   :  { %2920 = vmatpush1.bf16.msra.mxu0 %v2919_v5  ;;  %v879_v5 = vsel %vm866_vm8, %v6879_v22, %v6864_v26  ;;  %v4816_v55 = vmul.f32 %v6884_v23, %v867_v3  ;;  %v830_v59 = vmul.f32 %v6843_v49, %v797_v16  ;;  %v849_v44 = vpop.permute.xlu1 %848  ;;  %v788_v31 = vsel %vm785_vm7, %v6880_v45, %v4703_v47  ;;  %v4828_v26 = vpop.permute.xlu0 %931  ;;  %v6885_v16 = vld [vmem:[#allocation101_spill] sm:$0xff] }
 0x243   :  { %2922 = vmatprep.subr.bf16.mxu0 %v2921_v60  ;;  %v868_v60 = vsel %vm866_vm8, %v6878_v25, %v6882_v39  ;;  %v829_v28 = vmul.f32 %v6854_v54, %v800_v21  ;;  %v2925_v24 = vpack.c.bf16 %v831_v9, %v827_v40  ;;  %v906_v22 = vmul.f32 %v4575_v19, %v880_v63  ;;  %v6887_v39 = vld [vmem:[#allocation50_spill] sm:$0xff]  ;;  %v6888_v63 = vld [vmem:[#allocation28_spill] sm:$0xff] }
 0x244   :  { %2992 = vmatpush1.bf16.msra.mxu1 %v2991_v17  ;;  %v826_v3 = vmul.f32 %v6843_v49, %v796_v52  ;;  %v832_v41 = vmul.f32 %v6853_v11, %v789_v10  ;;  %v874_v25 = vsel %vm866_vm8, %v849_v44, %v6885_v16  ;;  %v6886_v30 = vpack.c.bf16 %v4653_v37, %v4650_v35  ;;  %v6889_v52 = vld [vmem:[#allocation92_spill] sm:$0xff] }
 0x245   :  { %2994 = vmatprep.subr.bf16.mxu1 %v2993_v46  ;;  %v2931_v47 = vpack.c.bf16 %v4782_v32, %v4745_v15  ;;  %v902_v46 = vmul.f32 %v4575_v19, %v879_v5  ;;  %v2997_v45 = vpack.c.bf16 %v833_v33, %v829_v28  ;;  %v2929_v9 = vpack.c.bf16 %v904_v43, %v4764_v42  ;;  %v6890_v32 = vld [vmem:[#allocation91_spill] sm:$0xff] }
 0x246   :  { %2924 = vmatpush1.bf16.msra.mxu0 %v6886_v30  ;;  %v956_v17 = vsel %vm947_vm9, %v6888_v63, %v6887_v39  ;;  %v828_v2 = vmul.f32 %v6853_v11, %v788_v31  ;;  %v2927_v21 = vpack.c.bf16 %v830_v59, %v826_v3  ;;  %v873_v35 = vsel %vm866_vm8, %v4752_v58, %v6889_v52  ;;  %v865_v37 = vpop.permute.xlu1 %864  ;;  %v940_v10 = vpop.permute.xlu0 %939  ;;  %v6891_v5 = vld [vmem:[#allocation87_spill] sm:$0xff] }
 0x247   :  { %2926 = vmatprep.subr.bf16.mxu0 %v2925_v24  ;;  %v905_v15 = vmul.f32 %v6884_v23, %v868_v60  ;;  %v878_v42 = vsel %vm866_vm8, %v6890_v32, %v849_v44  ;;  %v912_v43 = vmul.f32 %v6877_v29, %v874_v25  ;;  %v882_v40 = vsel %vm866_vm8, %v865_v37, %v6890_v32  ;;  %v6892_v3 = vld [vmem:[#allocation51_spill] sm:$0xff] }
 0x248   :  { %2996 = vmatpush1.bf16.msra.mxu1 %v2995_v61  ;;  %v2999_v33 = vpack.c.bf16 %v832_v41, %v828_v2  ;;  %v881_v61 = vsel %vm866_vm8, %v863_v50, %v6891_v5  ;;  %v952_v59 = vsel %vm947_vm9, %v6887_v39, %v4828_v26  ;;  %v3001_v44 = vpack.c.bf16 %v906_v22, %v902_v46  ;;  %v6893_v41 = vld [vmem:[#allocation30_spill] sm:$0xff]  ;;  %v4883_v22 = vld [vmem:[%s6490_s1 + $0x28] ss:$0 sm:$0xff] }
 0x249   :  { %2998 = vmatprep.subr.bf16.mxu1 %v2997_v45  ;;  %v877_v60 = vsel %vm866_vm8, %v6891_v5, %v4752_v58  ;;  %v908_v31 = vmul.f32 %v6877_v29, %v873_v35  ;;  %v870_v28 = vsel %vm866_vm8, %v6885_v16, %v865_v37  ;;  %v914_v24 = vmul.f32 %v4575_v19, %v882_v40  ;;  %v4906_v37 = vld [vmem:[%s6490_s1 + $0x38] ss:$0 sm:$0xff] }
 0x24a   :  { %2928 = vmatpush1.bf16.msra.mxu0 %v2927_v21  ;;  %v957_v25 = vsel %vm947_vm9, %v6893_v41, %v6892_v3  ;;  %v953_v58 = vsel %vm947_vm9, %v6892_v3, %v4582_v4  ;;  %v869_v16 = vsel %vm866_vm8, %v6889_v52, %v863_v50  ;;  %v911_v30 = vmul.f32 %v6873_v0, %v878_v42  ;;  %v942_v46 = vpop.permute.xlu1 %941  ;;  %v4898_v2 = vpop.permute.xlu0 %919  ;;  %v2730_v42 = vld [vmem:[%s6490_s1 + $0x20] ss:$0 sm:$0xff] }
 0x24b   :  { %2930 = vmatprep.subr.bf16.mxu0 %v2929_v9  ;;  %v910_v45 = vmul.f32 %v4575_v19, %v881_v61  ;;  %v981_v9 = vmul.f32 %v4883_v22, %v952_v59  ;;  %v961_v39 = vsel %vm947_vm9, %v942_v46, %v6893_v41  ;;  %v2933_v21 = vpack.c.bf16 %v912_v43, %v908_v31  ;;  %v996_v3 = vld [vmem:[%s6491_s4] sm:$0xff] }
 0x24c   :  { %3000 = vmatpush1.bf16.msra.mxu1 %v2999_v33  ;;  %v3003_v35 = vpack.c.bf16 %v905_v15, %v4816_v55  ;;  %v907_v50 = vmul.f32 %v6873_v0, %v877_v60  ;;  %v913_v52 = vmul.f32 %v6884_v23, %v870_v28  ;;  %v960_v32 = vsel %vm947_vm9, %v940_v10, %v6888_v63  ;;  %v2732_v63 = vld [vmem:[%s6490_s1 + $0x30] ss:$0 sm:$0xff] }
 0x24d   :  { %3002 = vmatprep.subr.bf16.mxu1 %v3001_v44  ;;  %v985_v55 = vmul.f32 %v4883_v22, %v953_v58  ;;  %v949_v15 = vsel %vm947_vm9, %v4582_v4, %v942_v46  ;;  %v987_v43 = vmul.f32 %v4906_v37, %v961_v39  ;;  %v3005_v40 = vpack.c.bf16 %v914_v24, %v910_v45  ;;  %v999_v46 = vld [vmem:[%s6491_s4 + $0x18] sm:$0xff] }
 0x24e   :  { %2932 = vmatpush1.bf16.msra.mxu0 %v2931_v47  ;;  %v984_v33 = vmul.f32 %v2730_v42, %v957_v25  ;;  %v909_v5 = vmul.f32 %v6884_v23, %v869_v16  ;;  %v2935_v61 = vpack.c.bf16 %v911_v30, %v907_v50  ;;  %v922_v47 = vpop.permute.xlu1 %921  ;;  %v948_v59 = vsel %vm947_vm9, %v4828_v26, %v940_v10  ;;  %v928_v44 = vpop.permute.xlu0 %927  ;;  %v1000_v25 = vld [vmem:[%s6491_s4 + $0x20] sm:$0xff] }
 0x24f   :  { %2934 = vmatprep.subr.bf16.mxu0 %v2933_v21  ;;  %v983_v4 = vmul.f32 %v4906_v37, %v960_v32  ;;  %v2937_v60 = vpack.c.bf16 %v985_v55, %v981_v9  ;;  %v980_v31 = vmul.f32 %v2730_v42, %v956_v17  ;;  %v986_v24 = vmul.f32 %v2732_v63, %v949_v15  ;;  %v1003_v9 = vld [vmem:[%s6491_s4 + $0x38] sm:$0xff] }
 0x250   :  { %3004 = vmatpush1.bf16.msra.mxu1 %v3003_v35  ;;  %v3007_v28 = vpack.c.bf16 %v913_v52, %v909_v5  ;;  %v982_v10 = vmul.f32 %v2732_v63, %v948_v59  ;;  %v958_v39 = vsel %vm947_vm9, %v4898_v2, %v928_v44  ;;  %v1006_v5 = vld [vmem:[%s6491_s4 + $0x50] sm:$0xff] }
 0x251   :  { %3006 = vmatprep.subr.bf16.mxu1 %v3005_v40  ;;  %v3009_v41 = vpack.c.bf16 %v987_v43, %v983_v4  ;;  %v2939_v26 = vpack.c.bf16 %v984_v33, %v980_v31  ;;  %v1002_v43 = vld [vmem:[%s6491_s4 + $0x30] sm:$0xff]  ;;  %v988_v40 = vmul.f32 %v2730_v42, %v958_v39 }
 0x252   :  { %2936 = vmatpush1.bf16.msra.mxu0 %v2935_v61  ;;  %v930_v58 = vpop.permute.xlu1 %929  ;;  %v936_v16 = vpop.permute.xlu0 %935  ;;  %v3011_v17 = vpack.c.bf16 %v986_v24, %v982_v10 }
 0x253   :  { %2938 = vmatprep.subr.bf16.mxu0 %v2937_v60  ;;  %v959_v30 = vsel %vm947_vm9, %v922_v47, %v930_v58  ;;  %v954_v45 = vsel %vm947_vm9, %v928_v44, %v936_v16 }
 0x254   :  { %3008 = vmatpush1.bf16.msra.mxu1 %v3007_v28  ;;  %v992_v35 = vmul.f32 %v2730_v42, %v959_v30  ;;  %v989_v32 = vmul.f32 %v4883_v22, %v954_v45  ;;  %v1005_v28 = vld [vmem:[%s6491_s4 + $0x48] sm:$0xff] }
 0x255   :  { %3010 = vmatprep.subr.bf16.mxu1 %v3009_v41  ;;  %1110 = vmatmul.mubr.f32.vlgmr.msra.gmra.mrb[8].mxu0 %v996_v3  ;;  %v1004_v41 = vld [vmem:[%s6491_s4 + $0x40] sm:$0xff] }
 0x256   :  { %2940 = vmatpush1.bf16.msra.mxu0 %v2939_v26  ;;  %1115 = vmatprep.mubr.f32.mxu0 %v1000_v25  ;;  %v938_v21 = vpop.permute.xlu1 %937  ;;  %v944_v52 = vpop.permute.xlu0 %943  ;;  %v2943_v59 = vpack.c.bf16 %v992_v35, %v988_v40 }
 0x257   :  { %1288 = vmatmul.mubr.f32.vlgmr.msra.gmra.mrb[8].mxu1 %v996_v3  ;;  %v955_v50 = vsel %vm947_vm9, %v930_v58, %v938_v21  ;;  %v950_v15 = vsel %vm947_vm9, %v936_v16, %v944_v52  ;;  %v962_v33 = vsel %vm947_vm9, %v944_v52, %v4898_v2 }
 0x258   :  { %3012 = vmatpush1.bf16.msra.mxu1 %v3011_v17  ;;  %1293 = vmatprep.mubr.f32.mxu1 %v1000_v25  ;;  %v993_v55 = vmul.f32 %v4883_v22, %v955_v50  ;;  %v990_v4 = vmul.f32 %v2732_v63, %v950_v15  ;;  %v991_v60 = vmul.f32 %v4906_v37, %v962_v33  ;;  %v1007_v25 = vld [vmem:[%s6491_s4 + $0x58] sm:$0xff]  ;;  %v6896_v33 = vld [vmem:[#allocation63_spill] sm:$0xff] }
 0x259   :  { %1116 = vmatmul.mubr.f32.gmra.mrb[10].mxu0 %v999_v46 }
 0x25a   :  { %1121 = vmatprep.mubr.f32.mxu0 %v1003_v9  ;;  %v946_v61 = vpop.permute.xlu1 %945  ;;  %v2941_v22 = vpack.c.bf16 %v993_v55, %v989_v32 }
 0x25b   :  { %1294 = vmatmul.mubr.f32.gmra.mrb[10].mxu1 %v999_v46  ;;  %v951_v44 = vsel %vm947_vm9, %v938_v21, %v946_v61  ;;  %v963_v42 = vsel %vm947_vm9, %v946_v61, %v922_v47  ;;  %v6894_v47 = vmov 0.0  }
 0x25c   :  { %1299 = vmatprep.mubr.f32.mxu1 %v1003_v9  ;;  %v994_v2 = vmul.f32 %v2732_v63, %v951_v44  ;;  %v995_v31 = vmul.f32 %v4906_v37, %v963_v42  ;;  %2942 = vmatprep.subr.bf16.mxu0 %v2941_v22  ;;  %v998_v63 = vld [vmem:[%s6491_s4 + $0x10] sm:$0xff]  ;;  %v1001_v37 = vld [vmem:[%s6491_s4 + $0x28] sm:$0xff] }
 0x25d   :  { %1122 = vmatmul.mubr.f32.gmra.mrb[12].mxu0 %v1002_v43 }
 0x25e   :  { %1127 = vmatprep.mubr.f32.mxu0 %v1006_v5  ;;  %2944 = vmatpush1.bf16.msra.mxu0 %v2943_v59  ;;  %v3015_v24 = vpack.c.bf16 %v994_v2, %v990_v4  ;;  %v3013_v3 = vpack.c.bf16 %v995_v31, %v991_v60 }
 0x25f   :  { %1300 = vmatmul.mubr.f32.gmra.mrb[12].mxu1 %v1002_v43 }
 0x260   :  { %1305 = vmatprep.mubr.f32.mxu1 %v1006_v5  ;;  %3014 = vmatprep.subr.bf16.mxu1 %v3013_v3 }
 0x261   :  { %1128 = vmatmul.mubr.f32.gmra.mrb[14].mxu0 %v1005_v28  ;;  %3016 = vmatpush1.bf16.msra.mxu1 %v3015_v24 }
 0x262   :  { %1198 = vmatprep.mubr.f32.mxu0 %v6894_v47 }
 0x263   :  { %1306 = vmatmul.mubr.f32.gmra.mrb[14].mxu1 %v1005_v28 }
 0x264   :  { %1376 = vmatprep.mubr.f32.mxu1 %v6894_v47 }
 0x265   :  { %2734 = vmatmul.mubr.msk.f32.vlgmr.msra.gmra.mrb[8].mxu0 %vm1032_vm10, %v998_v63 }
 0x266   :  { %1204 = vmatprep.mubr.f32.mxu0 %v6894_v47  ;;  %v1015_v26 = vpop.permute.xlu0 %1014 }
 0x267   :  { %2738 = vmatmul.mubr.msk.f32.vlgmr.msra.gmra.mrb[8].mxu1 %vm1032_vm10, %v998_v63 }
 0x268   :  { %1382 = vmatprep.mubr.f32.mxu1 %v6894_v47 }
 0x269   :  { %2735 = vmatmul.mubr.msk.f32.gmra.mrb[10].mxu0 %vm1032_vm10, %v1001_v37 }
 0x26a   :  { %1210 = vmatprep.mubr.f32.mxu0 %v6894_v47  ;;  %v1020_v9 = vpop.permute.xlu1 %1019 }
 0x26b   :  { %2739 = vmatmul.mubr.msk.f32.gmra.mrb[10].mxu1 %vm1032_vm10, %v1001_v37 }
 0x26c   :  { %1388 = vmatprep.mubr.f32.mxu1 %v6894_v47 }
 0x26d   :  { %2736 = vmatmul.mubr.msk.f32.gmra.mrb[12].mxu0 %vm1032_vm10, %v1004_v41 }
 0x26e   :  { %1216 = vmatprep.mubr.f32.mxu0 %v6894_v47 }
 0x26f   :  { %2740 = vmatmul.mubr.msk.f32.gmra.mrb[12].mxu1 %vm1032_vm10, %v1004_v41 }
 0x270   :  { %1394 = vmatprep.mubr.f32.mxu1 %v6894_v47 }
 0x271   :  { %2737 = vmatmul.mubr.msk.f32.gmra.mrb[14].mxu0 %vm1032_vm10, %v1007_v25 }
 0x273   :  { %2741 = vmatmul.mubr.msk.f32.gmra.mrb[14].mxu1 %vm1032_vm10, %v1007_v25 }
 0x338   :  { %v1200_v10 = vpop.f32.mrb[8].mxu0 }
 0x339   :  { %v3233_v58 = vadd.f32 %v1200_v10, %v1015_v26  ;;  %v1202_v16 = vpop.f32.mrb[9].mxu0 }
 0x33a   :  { %v1378_v17 = vpop.f32.mrb[8].mxu1  ;;  %v3234_v28 = vadd.f32 %v1202_v16, %v1015_v26 }
 0x33b   :  { %v1401_v30 = vmax.f32 %v3233_v58, 0.0  ;;  %v3241_v46 = vadd.f32 %v1378_v17, %v1015_v26  ;;  %v1380_v45 = vpop.f32.mrb[9].mxu1  ;;  %v5134_v58 = vpop.permute.xlu1 %1029 }
 0x33c   :  { %v1206_v39 = vpop.f32.mrb[10].mxu0  ;;  %v5069_v24 = vmax.f32 %v3234_v28, 0.0  ;;  %v3242_v3 = vadd.f32 %v1380_v45, %v1015_v26  ;;  %v5128_v26 = vpop.permute.xlu0 %1024 }
 0x33d   :  { %v3235_v21 = vadd.f32 %v1206_v39, %v1020_v9  ;;  %v1208_v35 = vpop.f32.mrb[11].mxu0  ;;  %1417 = vrot.lane.b32.xlu0 %v1401_v30, %s3315_s2  ;;  %v4999_v52 = vmax.f32 %v3241_v46, 0.0  ;;  %v5009_v5 = vmul.f32 %v1401_v30, %v6896_v33 }
 0x33e   :  { %v1384_v50 = vpop.f32.mrb[10].mxu1  ;;  %6900 = vst [vmem:[#allocation54_spill] sm:$0xff] %v5069_v24  ;;  %v3236_v63 = vadd.f32 %v1208_v35, %v1020_v9  ;;  %v5074_v37 = vmax.f32 %v3242_v3, 0.0 }
 0x33f   :  { %6895 = vst [vmem:[#allocation35_spill] sm:$0xff] %v4999_v52  ;;  %v1405_v32 = vmax.f32 %v3235_v21, 0.0  ;;  %v3243_v55 = vadd.f32 %v1384_v50, %v1020_v9  ;;  %v1386_v15 = vpop.f32.mrb[11].mxu1  ;;  %6897 = vst [vmem:[#allocation14_spill] sm:$0xff] %v5009_v5 }
 0x340   :  { %v5001_v43 = vpop.f32.mrb[12].mxu0  ;;  %6901 = vst [vmem:[#allocation53_spill] sm:$0xff] %v5074_v37  ;;  %v5076_v41 = vmax.f32 %v3236_v63, 0.0  ;;  %v3244_v25 = vadd.f32 %v1386_v15, %v1020_v9 }
 0x341   :  { %v5003_v40 = vpop.f32.mrb[13].mxu0  ;;  %1419 = vrot.lane.b32.xlu1 %v1405_v32, %s3315_s2  ;;  %1433 = vrot.lane.b32.xlu0 %v4999_v52, %s3315_s2  ;;  %v5012_v61 = vmul.f32 %v1405_v32, %v6896_v33  ;;  %v5016_v59 = vmax.f32 %v3243_v55, 0.0  ;;  %v3237_v16 = vadd.f32 %v5001_v43, %v5128_v26 }
 0x342   :  { %v5014_v22 = vpop.f32.mrb[12].mxu1  ;;  %6902 = vst [vmem:[#allocation37_spill] sm:$0xff] %v5076_v41  ;;  %v5082_v10 = vmax.f32 %v3244_v25, 0.0  ;;  %v3238_v29 = vadd.f32 %v5003_v40, %v5128_v26 }
 0x343   :  { %6898 = vst [vmem:[#allocation36_spill] sm:$0xff] %v5012_v61  ;;  %6899 = vst [vmem:[#allocation52_spill] sm:$0xff] %v5016_v59  ;;  %v5018_v4 = vpop.f32.mrb[13].mxu1  ;;  %v3245_v46 = vadd.f32 %v5014_v22, %v5128_v26 }
 0x344   :  { %v5022_v42 = vpop.f32.mrb[14].mxu0  ;;  %6903 = vst [vmem:[#allocation55_spill] sm:$0xff] %v5082_v10  ;;  %v3246_v40 = vadd.f32 %v5018_v4, %v5128_v26  ;;  %v6917_v26 = vld [vmem:[#allocation31_spill] sm:$0xff] }
 0x345   :  { %v5024_v60 = vpop.f32.mrb[15].mxu0  ;;  %1435 = vrot.lane.b32.xlu1 %v5016_v59, %s3315_s2  ;;  %1481 = vrot.lane.b32.xlu0 %v1401_v30, %s3316_s14  ;;  %v3239_v45 = vadd.f32 %v5022_v42, %v5134_v58  ;;  %v5158_v21 = vmax.f32 %v3245_v46, 0.0 }
 0x346   :  { %v5029_v2 = vpop.f32.mrb[14].mxu1 }
 0x347   :  { %v5031_v31 = vpop.f32.mrb[15].mxu1  ;;  %6905 = vst [vmem:[#allocation58_spill] sm:$0xff] %v5158_v21  ;;  %v5160_v35 = vmax.f32 %v3239_v45, 0.0  ;;  %v3247_v50 = vadd.f32 %v5029_v2, %v5134_v58 }
 0x349   :  { %1483 = vrot.lane.b32.xlu1 %v1405_v32, %s3316_s14  ;;  %1497 = vrot.lane.b32.xlu0 %v4999_v52, %s3316_s14  ;;  %6906 = vst [vmem:[#allocation57_spill] sm:$0xff] %v5160_v35  ;;  %v5172_v15 = vmax.f32 %v3247_v50, 0.0 }
 0x34b   :  { %6907 = vst [vmem:[#allocation39_spill] sm:$0xff] %v5172_v15 }
 0x34d   :  { %1499 = vrot.lane.b32.xlu1 %v5016_v59, %s3316_s14  ;;  %1545 = vrot.lane.b32.xlu0 %v1401_v30, %s3317_s15 }
 0x351   :  { %1547 = vrot.lane.b32.xlu1 %v1405_v32, %s3317_s15  ;;  %1561 = vrot.lane.b32.xlu0 %v4999_v52, %s3317_s15 }
 0x355   :  { %1563 = vrot.lane.b32.xlu1 %v5016_v59, %s3317_s15  ;;  %1609 = vrot.lane.b32.xlu0 %v1401_v30, %s3318_s16 }
 0x359   :  { %1611 = vrot.lane.b32.xlu1 %v1405_v32, %s3318_s16  ;;  %1625 = vrot.lane.b32.xlu0 %v4999_v52, %s3318_s16 }
 0x35d   :  { %1627 = vrot.lane.b32.xlu1 %v5016_v59, %s3318_s16  ;;  %1689 = vrot.lane.b32.xlu0 %v1401_v30, %s3319_s17 }
 0x361   :  { %1691 = vrot.lane.b32.xlu1 %v1405_v32, %s3319_s17  ;;  %1705 = vrot.lane.b32.xlu0 %v4999_v52, %s3319_s17 }
 0x365   :  { %1707 = vrot.lane.b32.xlu1 %v5016_v59, %s3319_s17  ;;  %1753 = vrot.lane.b32.xlu0 %v1401_v30, %s3320_s18 }
 0x369   :  { %1755 = vrot.lane.b32.xlu1 %v1405_v32, %s3320_s18  ;;  %1769 = vrot.lane.b32.xlu0 %v4999_v52, %s3320_s18 }
 0x36d   :  { %1771 = vrot.lane.b32.xlu1 %v5016_v59, %s3320_s18  ;;  %1817 = vrot.lane.b32.xlu0 %v1401_v30, %s3321_s19 }
 0x371   :  { %1819 = vrot.lane.b32.xlu1 %v1405_v32, %s3321_s19  ;;  %1833 = vrot.lane.b32.xlu0 %v4999_v52, %s3321_s19 }
 0x375   :  { %1835 = vrot.lane.b32.xlu1 %v5016_v59, %s3321_s19  ;;  %1881 = vrot.lane.b32.xlu0 %v1401_v30, %s3322_s20  ;;  %v5144_v30 = vmax.f32 %v3237_v16, 0.0 }
 0x377   :  { %6904 = vst [vmem:[#allocation56_spill] sm:$0xff] %v5144_v30 }
 0x379   :  { %1883 = vrot.lane.b32.xlu1 %v1405_v32, %s3322_s20  ;;  %1425 = vrot.lane.b32.xlu0 %v5069_v24, %s3315_s2 }
 0x37d   :  { %1427 = vrot.lane.b32.xlu1 %v5076_v41, %s3315_s2  ;;  %1441 = vrot.lane.b32.xlu0 %v5074_v37, %s3315_s2 }
 0x381   :  { %1443 = vrot.lane.b32.xlu1 %v5082_v10, %s3315_s2  ;;  %1489 = vrot.lane.b32.xlu0 %v5069_v24, %s3316_s14 }
 0x385   :  { %1491 = vrot.lane.b32.xlu1 %v5076_v41, %s3316_s14  ;;  %1505 = vrot.lane.b32.xlu0 %v5074_v37, %s3316_s14 }
 0x389   :  { %1507 = vrot.lane.b32.xlu1 %v5082_v10, %s3316_s14  ;;  %1553 = vrot.lane.b32.xlu0 %v5069_v24, %s3317_s15 }
 0x38d   :  { %1555 = vrot.lane.b32.xlu1 %v5076_v41, %s3317_s15  ;;  %1569 = vrot.lane.b32.xlu0 %v5074_v37, %s3317_s15 }
 0x391   :  { %1571 = vrot.lane.b32.xlu1 %v5082_v10, %s3317_s15  ;;  %1617 = vrot.lane.b32.xlu0 %v5069_v24, %s3318_s16 }
 0x395   :  { %1619 = vrot.lane.b32.xlu1 %v5076_v41, %s3318_s16  ;;  %1633 = vrot.lane.b32.xlu0 %v5074_v37, %s3318_s16 }
 0x399   :  { %1635 = vrot.lane.b32.xlu1 %v5082_v10, %s3318_s16  ;;  %1697 = vrot.lane.b32.xlu0 %v5069_v24, %s3319_s17 }
 0x39d   :  { %1699 = vrot.lane.b32.xlu1 %v5076_v41, %s3319_s17  ;;  %1713 = vrot.lane.b32.xlu0 %v5074_v37, %s3319_s17 }
 0x3a1   :  { %1715 = vrot.lane.b32.xlu1 %v5082_v10, %s3319_s17  ;;  %1761 = vrot.lane.b32.xlu0 %v5069_v24, %s3320_s18 }
 0x3a5   :  { %1763 = vrot.lane.b32.xlu1 %v5076_v41, %s3320_s18  ;;  %1777 = vrot.lane.b32.xlu0 %v5074_v37, %s3320_s18 }
 0x3a9   :  { %1779 = vrot.lane.b32.xlu1 %v5082_v10, %s3320_s18  ;;  %1825 = vrot.lane.b32.xlu0 %v5069_v24, %s3321_s19 }
 0x3ad   :  { %1827 = vrot.lane.b32.xlu1 %v5076_v41, %s3321_s19  ;;  %1841 = vrot.lane.b32.xlu0 %v5074_v37, %s3321_s19 }
 0x3af   :  { %v5138_v17 = vpop.permute.xlu0 %1417 }
 0x3b1   :  { %1843 = vrot.lane.b32.xlu1 %v5082_v10, %s3321_s19  ;;  %1889 = vrot.lane.b32.xlu0 %v5069_v24, %s3322_s20 }
 0x3b3   :  { %v5150_v9 = vpop.permute.xlu1 %1419  ;;  %v5152_v39 = vpop.permute.xlu0 %1433 }
 0x3b5   :  { %1891 = vrot.lane.b32.xlu1 %v5076_v41, %s3322_s20  ;;  %1421 = vrot.lane.b32.xlu0 %v5144_v30, %s3315_s2 }
 0x3b7   :  { %v5164_v32 = vpop.permute.xlu1 %1435  ;;  %v5166_v55 = vpop.permute.xlu0 %1481 }
 0x3b9   :  { %1423 = vrot.lane.b32.xlu1 %v5160_v35, %s3315_s2  ;;  %1437 = vrot.lane.b32.xlu0 %v5158_v21, %s3315_s2 }
 0x3bb   :  { %v5174_v43 = vpop.permute.xlu1 %1483  ;;  %v5176_v22 = vpop.permute.xlu0 %1497 }
 0x3bd   :  { %1439 = vrot.lane.b32.xlu1 %v5172_v15, %s3315_s2  ;;  %1485 = vrot.lane.b32.xlu0 %v5144_v30, %s3316_s14 }
 0x3bf   :  { %v5182_v42 = vpop.permute.xlu1 %1499  ;;  %v5184_v2 = vpop.permute.xlu0 %1545 }
 0x3c1   :  { %1487 = vrot.lane.b32.xlu1 %v5160_v35, %s3316_s14  ;;  %1501 = vrot.lane.b32.xlu0 %v5158_v21, %s3316_s14 }
 0x3c3   :  { %v5190_v28 = vpop.permute.xlu1 %1547  ;;  %v5192_v3 = vpop.permute.xlu0 %1561 }
 0x3c5   :  { %1503 = vrot.lane.b32.xlu1 %v5172_v15, %s3316_s14  ;;  %1549 = vrot.lane.b32.xlu0 %v5144_v30, %s3317_s15 }
 0x3c7   :  { %v5198_v63 = vpop.permute.xlu1 %1563  ;;  %v5200_v25 = vpop.permute.xlu0 %1609 }
 0x3c9   :  { %1551 = vrot.lane.b32.xlu1 %v5160_v35, %s3317_s15  ;;  %1565 = vrot.lane.b32.xlu0 %v5158_v21, %s3317_s15 }
 0x3cb   :  { %v5206_v16 = vpop.permute.xlu1 %1611  ;;  %v5208_v46 = vpop.permute.xlu0 %1625 }
 0x3cd   :  { %1567 = vrot.lane.b32.xlu1 %v5172_v15, %s3317_s15  ;;  %1613 = vrot.lane.b32.xlu0 %v5144_v30, %s3318_s16 }
 0x3cf   :  { %v5214_v45 = vpop.permute.xlu1 %1627  ;;  %v5216_v50 = vpop.permute.xlu0 %1689 }
 0x3d1   :  { %1615 = vrot.lane.b32.xlu1 %v5160_v35, %s3318_s16  ;;  %1629 = vrot.lane.b32.xlu0 %v5158_v21, %s3318_s16 }
 0x3d3   :  { %v5222_v44 = vpop.permute.xlu1 %1691  ;;  %v5224_v47 = vpop.permute.xlu0 %1705 }
 0x3d5   :  { %1631 = vrot.lane.b32.xlu1 %v5172_v15, %s3318_s16  ;;  %1693 = vrot.lane.b32.xlu0 %v5144_v30, %s3319_s17 }
 0x3d7   :  { %v5230_v5 = vpop.permute.xlu1 %1707  ;;  %v5232_v61 = vpop.permute.xlu0 %1753 }
 0x3d9   :  { %1695 = vrot.lane.b32.xlu1 %v5160_v35, %s3319_s17  ;;  %1709 = vrot.lane.b32.xlu0 %v5158_v21, %s3319_s17 }
 0x3db   :  { %v5238_v33 = vpop.permute.xlu1 %1755  ;;  %v5240_v24 = vpop.permute.xlu0 %1769 }
 0x3dd   :  { %1711 = vrot.lane.b32.xlu1 %v5172_v15, %s3319_s17  ;;  %1757 = vrot.lane.b32.xlu0 %v5144_v30, %s3320_s18 }
 0x3df   :  { %v5246_v41 = vpop.permute.xlu1 %1771  ;;  %v5248_v37 = vpop.permute.xlu0 %1817 }
 0x3e0   :  { %6908 = vst [vmem:[#allocation17_spill] sm:$0xff] %v5248_v37 }
 0x3e1   :  { %1759 = vrot.lane.b32.xlu1 %v5160_v35, %s3320_s18  ;;  %1773 = vrot.lane.b32.xlu0 %v5158_v21, %s3320_s18 }
 0x3e3   :  { %v5254_v19 = vpop.permute.xlu1 %1819  ;;  %v5256_v23 = vpop.permute.xlu0 %1833 }
 0x3e4   :  { %6909 = vst [vmem:[#allocation38_spill] sm:$0xff] %v5254_v19  ;;  %6910 = vst [vmem:[#allocation16_spill] sm:$0xff] %v5256_v23  ;;  %v5272_v19 = vmax.f32 %v3238_v29, 0.0  ;;  %v3240_v23 = vadd.f32 %v5024_v60, %v5134_v58  ;;  %v3248_v60 = vadd.f32 %v5031_v31, %v5134_v58 }
 0x3e5   :  { %1775 = vrot.lane.b32.xlu1 %v5172_v15, %s3320_s18  ;;  %1821 = vrot.lane.b32.xlu0 %v5144_v30, %s3321_s19 }
 0x3e6   :  { %6913 = vst [vmem:[#allocation18_spill] sm:$0xff] %v5272_v19  ;;  %v5308_v58 = vmax.f32 %v3248_v60, 0.0 }
 0x3e7   :  { %v5264_v0 = vpop.permute.xlu1 %1835  ;;  %v5266_v37 = vpop.permute.xlu0 %1881 }
 0x3e8   :  { %6911 = vst [vmem:[#allocation19_spill] sm:$0xff] %v5264_v0  ;;  %6912 = vst [vmem:[#allocation41_spill] sm:$0xff] %v5266_v37  ;;  %v5287_v37 = vmax.f32 %v3240_v23, 0.0 }
 0x3e9   :  { %1823 = vrot.lane.b32.xlu1 %v5160_v35, %s3321_s19  ;;  %1837 = vrot.lane.b32.xlu0 %v5158_v21, %s3321_s19  ;;  %v5291_v35 = vmax.f32 %v3246_v40, 0.0  ;;  %6918 = vst [vmem:[#allocation43_spill] sm:$0xff] %v5308_v58 }
 0x3ea   :  { %6915 = vst [vmem:[#allocation42_spill] sm:$0xff] %v5287_v37 }
 0x3eb   :  { %v5276_v54 = vpop.permute.xlu1 %1883  ;;  %v1426_v30 = vpop.permute.xlu0 %1425  ;;  %6916 = vst [vmem:[#allocation20_spill] sm:$0xff] %v5291_v35 }
 0x3ec   :  { %6914 = vst [vmem:[#allocation40_spill] sm:$0xff] %v5276_v54  ;;  %v1457_v29 = vsel %vm348_vm2, %v5138_v17, %v1426_v30  ;;  %v1453_v11 = vsel %vm348_vm2, %v1426_v30, %v5152_v39 }
 0x3ed   :  { %1839 = vrot.lane.b32.xlu1 %v5172_v15, %s3321_s19  ;;  %1429 = vrot.lane.b32.xlu0 %v5272_v19, %s3315_s2  ;;  %v1466_v15 = vmul.f32 %v1457_v29, %v6917_v26 }
 0x3ef   :  { %v1428_v54 = vpop.permute.xlu1 %1427  ;;  %v1442_v21 = vpop.permute.xlu0 %1441 }
 0x3f0   :  { %v1458_v4 = vsel %vm348_vm2, %v5150_v9, %v1428_v54  ;;  %v1449_v23 = vsel %vm348_vm2, %v5152_v39, %v1442_v21  ;;  %v1461_v31 = vsel %vm348_vm2, %v1442_v21, %v5138_v17  ;;  %v1454_v40 = vsel %vm348_vm2, %v1428_v54, %v5164_v32 }
 0x3f1   :  { %v1470_v0 = vmul.f32 %v1458_v4, %v6917_v26  ;;  %1431 = vrot.lane.b32.xlu1 %v5287_v37, %s3315_s2  ;;  %1445 = vrot.lane.b32.xlu0 %v5291_v35, %s3315_s2  ;;  %v1465_v60 = vmul.f32 %v1461_v31, %v3836_v48  ;;  %v1468_v54 = vmul.f32 %v1449_v23, %v3839_v57 }
 0x3f2   :  { %v1471_v30 = vmul.f32 %v1454_v40, %v3864_v12  ;;  %v1467_v23 = vmul.f32 %v1453_v11, %v3864_v12 }
 0x3f3   :  { %v1444_v29 = vpop.permute.xlu1 %1443  ;;  %v5313_v4 = vpop.permute.xlu0 %1489  ;;  %v3017_v26 = vpack.c.bf16 %v1470_v0, %v1466_v15 }
 0x3f4   :  { %v1450_v17 = vsel %vm348_vm2, %v5164_v32, %v1444_v29  ;;  %v1462_v21 = vsel %vm348_vm2, %v1444_v29, %v5150_v9  ;;  %v3091_v31 = vpack.c.bf16 %v1471_v30, %v1467_v23 }
 0x3f5   :  { %v1469_v27 = vmul.f32 %v1462_v21, %v3836_v48  ;;  %v1472_v0 = vmul.f32 %v1450_v17, %v3839_v57  ;;  %1447 = vrot.lane.b32.xlu1 %v5308_v58, %s3315_s2  ;;  %1493 = vrot.lane.b32.xlu0 %v5272_v19, %s3316_s14 }
 0x3f6   :  { %3018 = vmatprep.subr.bf16.mxu0 %v3017_v26 }
 0x3f7   :  { %v3019_v39 = vpack.c.bf16 %v1469_v27, %v1465_v60  ;;  %v5333_v32 = vpop.permute.xlu1 %1491  ;;  %v1506_v9 = vpop.permute.xlu0 %1505  ;;  %v3089_v15 = vpack.c.bf16 %v1472_v0, %v1468_v54 }
 0x3f8   :  { %v1513_v29 = vsel %vm429_vm3, %v5176_v22, %v1506_v9  ;;  %v1525_v40 = vsel %vm429_vm3, %v1506_v9, %v5166_v55 }
 0x3f9   :  { %1495 = vrot.lane.b32.xlu1 %v5287_v37, %s3316_s14  ;;  %1509 = vrot.lane.b32.xlu0 %v5291_v35, %s3316_s14  ;;  %v5353_v21 = vmul.f32 %v1525_v40, %v4176_v62  ;;  %v5356_v60 = vmul.f32 %v1513_v29, %v4179_v14 }
 0x3fa   :  { %3020 = vmatpush1.bf16.msra.mxu0 %v3019_v39  ;;  %3090 = vmatprep.subr.bf16.mxu1 %v3089_v15 }
 0x3fb   :  { %v1508_v27 = vpop.permute.xlu1 %1507  ;;  %v1554_v26 = vpop.permute.xlu0 %1553  ;;  %3092 = vmatpush1.bf16.msra.mxu1 %v3091_v31 }
 0x3fc   :  { %v1514_v11 = vsel %vm429_vm3, %v5182_v42, %v1508_v27  ;;  %v1526_v17 = vsel %vm429_vm3, %v1508_v27, %v5174_v43  ;;  %v1581_v30 = vsel %vm510_vm4, %v1554_v26, %v5192_v3  ;;  %v1585_v39 = vsel %vm510_vm4, %v5184_v2, %v1554_v26 }
 0x3fd   :  { %v5359_v54 = vmul.f32 %v1526_v17, %v4176_v62  ;;  %v5362_v0 = vmul.f32 %v1514_v11, %v4179_v14  ;;  %1511 = vrot.lane.b32.xlu1 %v5308_v58, %s3316_s14  ;;  %1557 = vrot.lane.b32.xlu0 %v5272_v19, %s3317_s15  ;;  %v5385_v27 = vmul.f32 %v1585_v39, %v4183_v38 }
 0x3fe   :  { %v5388_v26 = vmul.f32 %v1581_v30, %v4186_v53 }
 0x3ff   :  { %v1556_v15 = vpop.permute.xlu1 %1555  ;;  %v1570_v23 = vpop.permute.xlu0 %1569 }
 0x400   :  { %v1582_v29 = vsel %vm510_vm4, %v1556_v15, %v5198_v63  ;;  %v1586_v40 = vsel %vm510_vm4, %v5190_v28, %v1556_v15  ;;  %6919 = vst [vmem:[#allocation21_spill] sm:$0xff] %v5388_v26  ;;  %v1577_v9 = vsel %vm510_vm4, %v5192_v3, %v1570_v23  ;;  %v1589_v39 = vsel %vm510_vm4, %v1570_v23, %v5184_v2 }
 0x401   :  { %v5391_v11 = vmul.f32 %v1586_v40, %v4183_v38  ;;  %v5394_v17 = vmul.f32 %v1582_v29, %v4186_v53  ;;  %1559 = vrot.lane.b32.xlu1 %v5287_v37, %s3317_s15  ;;  %1573 = vrot.lane.b32.xlu0 %v5291_v35, %s3317_s15  ;;  %v5417_v2 = vmul.f32 %v1589_v39, %v4189_v18 }
 0x402   :  { %v5420_v23 = vmul.f32 %v1577_v9, %v4192_v6 }
 0x403   :  { %6920 = vst [vmem:[#allocation70_spill] sm:$0xff] %v5394_v17  ;;  %v1572_v15 = vpop.permute.xlu1 %1571  ;;  %v1618_v29 = vpop.permute.xlu0 %1617  ;;  %6921 = vst [vmem:[#allocation68_spill] sm:$0xff] %v5417_v2 }
 0x404   :  { %v1578_v31 = vsel %vm510_vm4, %v5198_v63, %v1572_v15  ;;  %v1590_v3 = vsel %vm510_vm4, %v1572_v15, %v5190_v28  ;;  %v1645_v63 = vsel %vm591_vm5, %v1618_v29, %v5208_v46  ;;  %v1649_v28 = vsel %vm591_vm5, %v5200_v25, %v1618_v29 }
 0x405   :  { %v5423_v30 = vmul.f32 %v1590_v3, %v4189_v18  ;;  %v5426_v26 = vmul.f32 %v1578_v31, %v4192_v6  ;;  %1575 = vrot.lane.b32.xlu1 %v5308_v58, %s3317_s15  ;;  %1621 = vrot.lane.b32.xlu0 %v5272_v19, %s3318_s16  ;;  %v5449_v29 = vmul.f32 %v1649_v28, %v4195_v8 }
 0x406   :  { %v5452_v17 = vmul.f32 %v1645_v63, %v4198_v36 }
 0x407   :  { %v1620_v39 = vpop.permute.xlu1 %1619  ;;  %v1634_v31 = vpop.permute.xlu0 %1633 }
 0x408   :  { %v1646_v3 = vsel %vm591_vm5, %v1620_v39, %v5214_v45  ;;  %v1650_v40 = vsel %vm591_vm5, %v5206_v16, %v1620_v39  ;;  %6922 = vst [vmem:[#allocation22_spill] sm:$0xff] %v5452_v17  ;;  %v1641_v15 = vsel %vm591_vm5, %v5208_v46, %v1634_v31  ;;  %v1653_v28 = vsel %vm591_vm5, %v1634_v31, %v5200_v25 }
 0x409   :  { %v5455_v9 = vmul.f32 %v1650_v40, %v4195_v8  ;;  %v5458_v2 = vmul.f32 %v1646_v3, %v4198_v36  ;;  %1623 = vrot.lane.b32.xlu1 %v5287_v37, %s3318_s16  ;;  %1637 = vrot.lane.b32.xlu0 %v5291_v35, %s3318_s16  ;;  %v5481_v25 = vmul.f32 %v1653_v28, %v4201_v13 }
 0x40a   :  { %v5484_v31 = vmul.f32 %v1641_v15, %v4204_v20 }
 0x40b   :  { %6923 = vst [vmem:[#allocation23_spill] sm:$0xff] %v5458_v2  ;;  %v1636_v63 = vpop.permute.xlu1 %1635  ;;  %v1698_v39 = vpop.permute.xlu0 %1697 }
 0x40c   :  { %v1642_v36 = vsel %vm591_vm5, %v5214_v45, %v1636_v63  ;;  %v1654_v46 = vsel %vm591_vm5, %v1636_v63, %v5206_v16  ;;  %v1725_v45 = vsel %vm704_vm6, %v1698_v39, %v5224_v47  ;;  %v1729_v16 = vsel %vm704_vm6, %v5216_v50, %v1698_v39 }
 0x40d   :  { %v5487_v40 = vmul.f32 %v1654_v46, %v4201_v13  ;;  %v5490_v17 = vmul.f32 %v1642_v36, %v4204_v20  ;;  %1639 = vrot.lane.b32.xlu1 %v5308_v58, %s3318_s16  ;;  %1897 = vrot.lane.b32.xlu0 %v4999_v52, %s3322_s20  ;;  %v5513_v39 = vmul.f32 %v1729_v16, %v4219_v56 }
 0x40e   :  { %v5516_v52 = vmul.f32 %v1725_v45, %v4225_v7 }
 0x40f   :  { %v1700_v28 = vpop.permute.xlu1 %1699  ;;  %v1714_v36 = vpop.permute.xlu0 %1713  ;;  %6924 = vst [vmem:[#allocation44_spill] sm:$0xff] %v5513_v39 }
 0x410   :  { %v1726_v46 = vsel %vm704_vm6, %v1700_v28, %v5230_v5  ;;  %v1730_v3 = vsel %vm704_vm6, %v5222_v44, %v1700_v28  ;;  %6925 = vst [vmem:[#allocation71_spill] sm:$0xff] %v5516_v52  ;;  %v1721_v63 = vsel %vm704_vm6, %v5224_v47, %v1714_v36  ;;  %v1733_v16 = vsel %vm704_vm6, %v1714_v36, %v5216_v50  ;;  %v1960_v52 = vld [vmem:[%s6494_s7 + $0x18] sm:$0xff] }
 0x411   :  { %v5519_v15 = vmul.f32 %v1730_v3, %v4219_v56  ;;  %v5522_v2 = vmul.f32 %v1726_v46, %v4225_v7  ;;  %1899 = vrot.lane.b32.xlu1 %v5016_v59, %s3322_s20  ;;  %1701 = vrot.lane.b32.xlu0 %v5272_v19, %s3319_s17  ;;  %v5545_v50 = vmul.f32 %v1721_v63, %v4228_v1  ;;  %v2617_v7 = vld [vmem:[%s6495_s9] sm:$0xff] }
 0x412   :  { %v5548_v36 = vmul.f32 %v1733_v16, %v4231_v34 }
 0x413   :  { %6926 = vst [vmem:[#allocation84_spill] sm:$0xff] %v5519_v15  ;;  %6927 = vst [vmem:[#allocation64_spill] sm:$0xff] %v5522_v2  ;;  %v1716_v45 = vpop.permute.xlu1 %1715  ;;  %v1762_v28 = vpop.permute.xlu0 %1761  ;;  %v6933_v15 = vld [vmem:[#allocation98_spill] sm:$0xff] }
 0x414   :  { %v1722_v56 = vsel %vm704_vm6, %v5230_v5, %v1716_v45  ;;  %v1734_v47 = vsel %vm704_vm6, %v1716_v45, %v5222_v44  ;;  %6928 = vst [vmem:[#allocation72_spill] sm:$0xff] %v5545_v50  ;;  %6929 = vst [vmem:[#allocation69_spill] sm:$0xff] %v5548_v36  ;;  %v1789_v5 = vsel %vm785_vm7, %v1762_v28, %v5240_v24 }
 0x415   :  { %v5551_v3 = vmul.f32 %v1722_v56, %v4228_v1  ;;  %v5554_v39 = vmul.f32 %v1734_v47, %v4231_v34  ;;  %1907 = vrot.lane.b32.xlu1 %v5082_v10, %s3322_s20  ;;  %v1793_v44 = vsel %vm785_vm7, %v5232_v61, %v1762_v28  ;;  %1717 = vrot.lane.b32.xlu0 %v5291_v35, %s3319_s17  ;;  %v6949_v1 = vld [vmem:[#allocation103_spill] sm:$0xff] }
 0x416   :  { %v5577_v28 = vmul.f32 %v1793_v44, %v6843_v49  ;;  %v5580_v34 = vmul.f32 %v1789_v5, %v6933_v15 }
 0x417   :  { %6930 = vst [vmem:[#allocation45_spill] sm:$0xff] %v5551_v3  ;;  %6931 = vst [vmem:[#allocation80_spill] sm:$0xff] %v5554_v39  ;;  %v1764_v63 = vpop.permute.xlu1 %1763  ;;  %v1778_v16 = vpop.permute.xlu0 %1777  ;;  %v1959_v39 = vld [vmem:[%s6494_s7 + $0x10] sm:$0xff] }
 0x418   :  { %v1790_v47 = vsel %vm785_vm7, %v1764_v63, %v5246_v41  ;;  %v1794_v46 = vsel %vm785_vm7, %v5238_v33, %v1764_v63  ;;  %6932 = vst [vmem:[#allocation74_spill] sm:$0xff] %v5577_v28  ;;  %6934 = vst [vmem:[#allocation61_spill] sm:$0xff] %v5580_v34  ;;  %v1785_v45 = vsel %vm785_vm7, %v5240_v24, %v1778_v16 }
 0x419   :  { %v5583_v56 = vmul.f32 %v1794_v46, %v6843_v49  ;;  %v5586_v50 = vmul.f32 %v1790_v47, %v6933_v15  ;;  %1703 = vrot.lane.b32.xlu1 %v5287_v37, %s3319_s17  ;;  %v1797_v44 = vsel %vm785_vm7, %v1778_v16, %v5232_v61  ;;  %1765 = vrot.lane.b32.xlu0 %v5272_v19, %s3320_s18  ;;  %v6937_v61 = vld [vmem:[#allocation99_spill] sm:$0xff]  ;;  %v6939_v15 = vld [vmem:[#allocation100_spill] sm:$0xff] }
 0x41a   :  { %v5609_v16 = vmul.f32 %v1785_v45, %v6937_v61  ;;  %v5612_v3 = vmul.f32 %v1797_v44, %v6939_v15 }
 0x41b   :  { %6935 = vst [vmem:[#allocation73_spill] sm:$0xff] %v5583_v56  ;;  %6936 = vst [vmem:[#allocation85_spill] sm:$0xff] %v5586_v50  ;;  %v1780_v5 = vpop.permute.xlu1 %1779  ;;  %v1826_v63 = vpop.permute.xlu0 %1825  ;;  %v6945_v56 = vld [vmem:[#allocation19_spill] sm:$0xff] }
 0x41c   :  { %v1786_v49 = vsel %vm785_vm7, %v5246_v41, %v1780_v5  ;;  %v1798_v24 = vsel %vm785_vm7, %v1780_v5, %v5238_v33  ;;  %6938 = vst [vmem:[#allocation60_spill] sm:$0xff] %v5609_v16  ;;  %6940 = vst [vmem:[#allocation82_spill] sm:$0xff] %v5612_v3  ;;  %v6943_v41 = vld [vmem:[#allocation16_spill] sm:$0xff]  ;;  %v6944_v33 = vld [vmem:[#allocation17_spill] sm:$0xff] }
 0x41d   :  { %v5615_v46 = vmul.f32 %v1786_v49, %v6937_v61  ;;  %v5618_v28 = vmul.f32 %v1798_v24, %v6939_v15  ;;  %1719 = vrot.lane.b32.xlu1 %v5308_v58, %s3319_s17  ;;  %v1853_v47 = vsel %vm866_vm8, %v1826_v63, %v6943_v41  ;;  %v1857_v45 = vsel %vm866_vm8, %v6944_v33, %v1826_v63  ;;  %v6946_v61 = vld [vmem:[#allocation38_spill] sm:$0xff] }
 0x41e   :  { %1781 = vrot.lane.b32.xlu0 %v5291_v35, %s3320_s18  ;;  %v6947_v63 = vld [vmem:[#allocation102_spill] sm:$0xff]  ;;  %v5644_v36 = vmul.f32 %v1853_v47, %v6949_v1 }
 0x41f   :  { %6941 = vst [vmem:[#allocation81_spill] sm:$0xff] %v5615_v46  ;;  %6942 = vst [vmem:[#allocation46_spill] sm:$0xff] %v5618_v28  ;;  %v1828_v44 = vpop.permute.xlu1 %1827  ;;  %v1842_v5 = vpop.permute.xlu0 %1841  ;;  %v5641_v50 = vmul.f32 %v1857_v45, %v6947_v63 }
 0x420   :  { %v1854_v15 = vsel %vm866_vm8, %v1828_v44, %v6945_v56  ;;  %v1858_v34 = vsel %vm866_vm8, %v6946_v61, %v1828_v44  ;;  %6950 = vst [vmem:[#allocation59_spill] sm:$0xff] %v5644_v36  ;;  %v1849_v24 = vsel %vm866_vm8, %v6943_v41, %v1842_v5  ;;  %v1861_v45 = vsel %vm866_vm8, %v1842_v5, %v6944_v33  ;;  %v6954_v5 = vld [vmem:[#allocation104_spill] sm:$0xff] }
 0x421   :  { %6948 = vst [vmem:[#allocation24_spill] sm:$0xff] %v5641_v50  ;;  %v5647_v49 = vmul.f32 %v1858_v34, %v6947_v63  ;;  %v5650_v16 = vmul.f32 %v1854_v15, %v6949_v1  ;;  %1767 = vrot.lane.b32.xlu1 %v5287_v37, %s3320_s18  ;;  %v5675_v63 = vmul.f32 %v1849_v24, %v6954_v5  ;;  %v6956_v1 = vld [vmem:[#allocation15_spill] sm:$0xff] }
 0x422   :  { %1829 = vrot.lane.b32.xlu0 %v5272_v19, %s3321_s19  ;;  %v5678_v46 = vmul.f32 %v1861_v45, %v6956_v1  ;;  %v6962_v45 = vld [vmem:[#allocation56_spill] sm:$0xff] }
 0x423   :  { %6951 = vst [vmem:[#allocation76_spill] sm:$0xff] %v5647_v49  ;;  %6952 = vst [vmem:[#allocation75_spill] sm:$0xff] %v5650_v16  ;;  %v1844_v47 = vpop.permute.xlu1 %1843  ;;  %v5664_v15 = vpop.permute.xlu0 %1889 }
 0x424   :  { %6953 = vst [vmem:[#allocation26_spill] sm:$0xff] %v5664_v15  ;;  %v1850_v41 = vsel %vm866_vm8, %v6945_v56, %v1844_v47  ;;  %v1862_v33 = vsel %vm866_vm8, %v1844_v47, %v6946_v61  ;;  %6955 = vst [vmem:[#allocation83_spill] sm:$0xff] %v5675_v63  ;;  %v1946_v47 = vld [vmem:[%s6493_s6 + $0x8] sm:$0xff]  ;;  %v1957_v15 = vld [vmem:[%s6494_s7] sm:$0xff] }
 0x425   :  { %6957 = vst [vmem:[#allocation77_spill] sm:$0xff] %v5678_v46  ;;  %v5681_v34 = vmul.f32 %v1850_v41, %v6954_v5  ;;  %v5684_v50 = vmul.f32 %v1862_v33, %v6956_v1  ;;  %1783 = vrot.lane.b32.xlu1 %v5308_v58, %s3320_s18  ;;  %2057 = vmatprep.mubr.f32.mxu0 %v1946_v47  ;;  %v6961_v41 = vld [vmem:[#allocation53_spill] sm:$0xff]  ;;  %v6964_v1 = vld [vmem:[#allocation39_spill] sm:$0xff]  ;;  %v6965_v5 = vld [vmem:[#allocation58_spill] sm:$0xff] }
 0x426   :  { %1845 = vrot.lane.b32.xlu0 %v5291_v35, %s3321_s19  ;;  %2235 = vmatprep.mubr.f32.mxu1 %v1946_v47 }
 0x427   :  { %6958 = vst [vmem:[#allocation47_spill] sm:$0xff] %v5681_v34  ;;  %6959 = vst [vmem:[#allocation25_spill] sm:$0xff] %v5684_v50  ;;  %v5692_v61 = vpop.permute.xlu1 %1891  ;;  %v5694_v24 = vpop.permute.xlu0 %1421  ;;  %v6963_v34 = vld [vmem:[#allocation57_spill] sm:$0xff] }
 0x428   :  { %6960 = vst [vmem:[#allocation86_spill] sm:$0xff] %v5692_v61  ;;  %v1958_v61 = vld [vmem:[%s6494_s7 + $0x8] sm:$0xff] }
 0x429   :  { %1831 = vrot.lane.b32.xlu1 %v5287_v37, %s3321_s19 }
 0x42a   :  { %1905 = vrot.lane.b32.xlu0 %v6961_v41, %s3322_s20 }
 0x42b   :  { %v5705_v33 = vpop.permute.xlu1 %1423  ;;  %v5707_v56 = vpop.permute.xlu0 %1437 }
 0x42d   :  { %1847 = vrot.lane.b32.xlu1 %v5308_v58, %s3321_s19 }
 0x42e   :  { %1885 = vrot.lane.b32.xlu0 %v6962_v45, %s3322_s20 }
 0x42f   :  { %v5713_v44 = vpop.permute.xlu1 %1439  ;;  %v5715_v63 = vpop.permute.xlu0 %1485 }
 0x431   :  { %1887 = vrot.lane.b32.xlu1 %v6963_v34, %s3322_s20 }
 0x432   :  { %1893 = vrot.lane.b32.xlu0 %v5272_v19, %s3322_s20 }
 0x433   :  { %v5721_v47 = vpop.permute.xlu1 %1487  ;;  %v5723_v49 = vpop.permute.xlu0 %1501 }
 0x435   :  { %1903 = vrot.lane.b32.xlu1 %v6964_v1, %s3322_s20 }
 0x436   :  { %1901 = vrot.lane.b32.xlu0 %v6965_v5, %s3322_s20  ;;  %v2618_v5 = vld [vmem:[%s6495_s9 + $0x8] sm:$0x3] }
 0x437   :  { %v5729_v46 = vpop.permute.xlu1 %1503  ;;  %v5731_v50 = vpop.permute.xlu0 %1549 }
 0x439   :  { %1895 = vrot.lane.b32.xlu1 %v5287_v37, %s3322_s20 }
 0x43a   :  { %1909 = vrot.lane.b32.xlu0 %v5291_v35, %s3322_s20 }
 0x43b   :  { %v5737_v36 = vpop.permute.xlu1 %1551  ;;  %v5739_v16 = vpop.permute.xlu0 %1565 }
 0x43d   :  { %1911 = vrot.lane.b32.xlu1 %v5308_v58, %s3322_s20 }
 0x43e   :  { %1963 = vperm.xlu0 %3307, %v1957_v15  }
 0x43f   :  { %v5749_v3 = vpop.permute.xlu1 %1567  ;;  %v5751_v28 = vpop.permute.xlu0 %1613 }
 0x441   :  { %1968 = vperm.xlu1 %3308, %v1958_v61  }
 0x442   :  { %1973 = vperm.xlu0 %3307, %v1959_v39  }
 0x443   :  { %v5759_v2 = vpop.permute.xlu1 %1615  ;;  %v5761_v15 = vpop.permute.xlu0 %1629 }
 0x445   :  { %1978 = vperm.xlu1 %3308, %v1960_v52  }
 0x446   :  { %2621 = vperm.xlu0 %3307, %v2617_v7  }
 0x447   :  { %v5769_v61 = vpop.permute.xlu1 %1631  ;;  %v5771_v39 = vpop.permute.xlu0 %1693 }
 0x448   :  { %6966 = vst [vmem:[#allocation27_spill] sm:$0xff] %v5771_v39 }
 0x449   :  { %2626 = vperm.xlu1 %3308, %v2618_v5  }
 0x44b   :  { %v5773_v1 = vpop.permute.xlu1 %1695  ;;  %v5775_v45 = vpop.permute.xlu0 %1709 }
 0x44c   :  { %6967 = vst [vmem:[#allocation48_spill] sm:$0xff] %v5773_v1  ;;  %6968 = vst [vmem:[#allocation79_spill] sm:$0xff] %v5775_v45  ;;  %v1517_v45 = vsel %vm429_vm3, %v5313_v4, %v5176_v22 }
 0x44f   :  { %v5777_v35 = vpop.permute.xlu1 %1711  ;;  %v5779_v34 = vpop.permute.xlu0 %1757 }
 0x450   :  { %6969 = vst [vmem:[#allocation78_spill] sm:$0xff] %v5777_v35  ;;  %6970 = vst [vmem:[#allocation49_spill] sm:$0xff] %v5779_v34 }
 0x453   :  { %v5781_v58 = vpop.permute.xlu1 %1759  ;;  %v5783_v7 = vpop.permute.xlu0 %1773 }
 0x454   :  { %6971 = vst [vmem:[#allocation65_spill] sm:$0xff] %v5781_v58  ;;  %6972 = vst [vmem:[#allocation101_spill] sm:$0xff] %v5783_v7  ;;  %v1522_v58 = vsel %vm429_vm3, %v5174_v43, %v5333_v32 }
 0x457   :  { %v5785_v52 = vpop.permute.xlu1 %1775  ;;  %v5787_v19 = vpop.permute.xlu0 %1821 }
 0x458   :  { %6973 = vst [vmem:[#allocation50_spill] sm:$0xff] %v5785_v52  ;;  %6974 = vst [vmem:[#allocation28_spill] sm:$0xff] %v5787_v19  ;;  %v6978_v52 = vld [vmem:[#allocation31_spill] sm:$0xff] }
 0x45b   :  { %v5789_v59 = vpop.permute.xlu1 %1823  ;;  %v5791_v39 = vpop.permute.xlu0 %1837 }
 0x45c   :  { %6975 = vst [vmem:[#allocation92_spill] sm:$0xff] %v5789_v59  ;;  %6976 = vst [vmem:[#allocation91_spill] sm:$0xff] %v5791_v39 }
 0x45f   :  { %v5793_v5 = vpop.permute.xlu1 %1839  ;;  %v1430_v1 = vpop.permute.xlu0 %1429 }
 0x460   :  { %6977 = vst [vmem:[#allocation87_spill] sm:$0xff] %v5793_v5  ;;  %v1459_v35 = vsel %vm348_vm2, %v5694_v24, %v1430_v1  ;;  %v1455_v10 = vsel %vm348_vm2, %v1430_v1, %v5707_v56 }
 0x461   :  { %v1474_v39 = vmul.f32 %v1459_v35, %v6978_v52  ;;  %v1521_v35 = vsel %vm429_vm3, %v5166_v55, %v5313_v4 }
 0x463   :  { %v1432_v34 = vpop.permute.xlu1 %1431  ;;  %v1446_v59 = vpop.permute.xlu0 %1445 }
 0x464   :  { %v1460_v19 = vsel %vm348_vm2, %v5705_v33, %v1432_v34  ;;  %v1456_v5 = vsel %vm348_vm2, %v1432_v34, %v5713_v44  ;;  %v1451_v43 = vsel %vm348_vm2, %v5707_v56, %v1446_v59  ;;  %v1463_v37 = vsel %vm348_vm2, %v1446_v59, %v5694_v24  ;;  %v6979_v34 = vld [vmem:[#allocation88_spill] sm:$0xff]  ;;  %v6980_v56 = vld [vmem:[#allocation89_spill] sm:$0xff] }
 0x465   :  { %v1478_v7 = vmul.f32 %v1460_v19, %v6978_v52  ;;  %v1518_v19 = vsel %vm429_vm3, %v5333_v32, %v5182_v42  ;;  %v1534_v22 = vmul.f32 %v1522_v58, %v6979_v34  ;;  %v1479_v59 = vmul.f32 %v1456_v5, %v3864_v12 }
 0x466   :  { %v1473_v42 = vmul.f32 %v1463_v37, %v3836_v48  ;;  %v1476_v58 = vmul.f32 %v1451_v43, %v3839_v57  ;;  %v1530_v1 = vmul.f32 %v1521_v35, %v6979_v34  ;;  %v1531_v43 = vmul.f32 %v1517_v45, %v6980_v56 }
 0x467   :  { %v1448_v52 = vpop.permute.xlu1 %1447  ;;  %v3021_v41 = vpack.c.bf16 %v1478_v7, %v1474_v39  ;;  %v1494_v4 = vpop.permute.xlu0 %1493  ;;  %v1535_v7 = vmul.f32 %v1518_v19, %v6980_v56 }
 0x468   :  { %v1452_v24 = vsel %vm348_vm2, %v5713_v44, %v1448_v52  ;;  %v1464_v55 = vsel %vm348_vm2, %v1448_v52, %v5705_v33  ;;  %v1523_v44 = vsel %vm429_vm3, %v5715_v63, %v1494_v4  ;;  %v1475_v33 = vmul.f32 %v1455_v10, %v3864_v12 }
 0x469   :  { %v1477_v32 = vmul.f32 %v1464_v55, %v3836_v48  ;;  %v1480_v39 = vmul.f32 %v1452_v24, %v3839_v57  ;;  %3022 = vmatprep.subr.bf16.mxu0 %v3021_v41  ;;  %v3025_v41 = vpack.c.bf16 %v1534_v22, %v1530_v1  ;;  %v1538_v24 = vmul.f32 %v1523_v44, %v6979_v34 }
 0x46a   :  { %v3095_v35 = vpack.c.bf16 %v1479_v59, %v1475_v33  ;;  %v3099_v22 = vpack.c.bf16 %v1535_v7, %v1531_v43  ;;  %v6983_v43 = vpack.c.bf16 %v5391_v11, %v5385_v27  ;;  %v6984_v27 = vpack.c.bf16 %v5426_v26, %v5420_v23 }
 0x46b   :  { %v3023_v5 = vpack.c.bf16 %v1477_v32, %v1473_v42  ;;  %v1496_v52 = vpop.permute.xlu1 %1495  ;;  %v3093_v37 = vpack.c.bf16 %v1480_v39, %v1476_v58  ;;  %v1510_v57 = vpop.permute.xlu0 %1509  ;;  %v1519_v42 = vsel %vm429_vm3, %v1494_v4, %v5723_v49  ;;  %v6981_v32 = vpack.c.bf16 %v5362_v0, %v5356_v60 }
 0x46c   :  { %v1524_v48 = vsel %vm429_vm3, %v5721_v47, %v1496_v52  ;;  %v1520_v19 = vsel %vm429_vm3, %v1496_v52, %v5729_v46  ;;  %v1515_v10 = vsel %vm429_vm3, %v5723_v49, %v1510_v57  ;;  %v1527_v45 = vsel %vm429_vm3, %v1510_v57, %v5715_v63 }
 0x46d   :  { %v1542_v12 = vmul.f32 %v1524_v48, %v6979_v34  ;;  %3024 = vmatpush1.bf16.msra.mxu0 %v3023_v5  ;;  %3094 = vmatprep.subr.bf16.mxu1 %v3093_v37  ;;  %v1543_v34 = vmul.f32 %v1520_v19, %v6980_v56  ;;  %v1537_v1 = vmul.f32 %v1527_v45, %v4176_v62  ;;  %v6987_v45 = vld [vmem:[#allocation70_spill] sm:$0xff] }
 0x46e   :  { %3026 = vmatprep.subr.bf16.mxu0 %v3025_v41  ;;  %3096 = vmatpush1.bf16.msra.mxu1 %v3095_v35  ;;  %v1540_v44 = vmul.f32 %v1515_v10, %v4179_v14  ;;  %v1539_v60 = vmul.f32 %v1519_v42, %v6980_v56  ;;  %v6985_v10 = vld [vmem:[#allocation68_spill] sm:$0xff] }
 0x46f   :  { %v1512_v59 = vpop.permute.xlu1 %1511  ;;  %v3029_v55 = vpack.c.bf16 %v1542_v12, %v1538_v24  ;;  %3098 = vmatprep.subr.bf16.mxu1 %v6981_v32  ;;  %v1558_v39 = vpop.permute.xlu0 %1557 }
 0x470   :  { %v1516_v58 = vsel %vm429_vm3, %v5729_v46, %v1512_v59  ;;  %v1528_v63 = vsel %vm429_vm3, %v1512_v59, %v5721_v47  ;;  %v6982_v46 = vpack.c.bf16 %v5359_v54, %v5353_v21  ;;  %v1587_v47 = vsel %vm510_vm4, %v5731_v50, %v1558_v39 }
 0x471   :  { %v1541_v49 = vmul.f32 %v1528_v63, %v4176_v62  ;;  %v1544_v4 = vmul.f32 %v1516_v58, %v4179_v14  ;;  %v3103_v5 = vpack.c.bf16 %v1543_v34, %v1539_v60  ;;  %v1602_v21 = vmul.f32 %v1587_v47, %v4183_v38  ;;  %v6993_v47 = vld [vmem:[#allocation90_spill] sm:$0xff] }
 0x472   :  { %3028 = vmatpush1.bf16.msra.mxu0 %v6982_v46  ;;  %3100 = vmatpush1.bf16.msra.mxu1 %v3099_v22  ;;  %v6988_v22 = vld [vmem:[#allocation21_spill] sm:$0xff] }
 0x473   :  { %3030 = vmatprep.subr.bf16.mxu0 %v3029_v55  ;;  %v3031_v0 = vpack.c.bf16 %v1541_v49, %v1537_v1  ;;  %v1560_v7 = vpop.permute.xlu1 %1559  ;;  %v3101_v33 = vpack.c.bf16 %v1544_v4, %v1540_v44  ;;  %v1574_v14 = vpop.permute.xlu0 %1573  ;;  %v6989_v59 = vpack.c.bf16 %v6987_v45, %v6988_v22  ;;  %v6991_v49 = vld [vmem:[#allocation62_spill] sm:$0xff]  ;;  %v6992_v4 = vld [vmem:[#allocation37_spill] sm:$0xff] }
 0x474   :  { %v1588_v62 = vsel %vm510_vm4, %v5737_v36, %v1560_v7  ;;  %v1584_v54 = vsel %vm510_vm4, %v1560_v7, %v5749_v3  ;;  %v1579_v56 = vsel %vm510_vm4, %v5739_v16, %v1574_v14  ;;  %v1591_v37 = vsel %vm510_vm4, %v1574_v14, %v5731_v50 }
 0x475   :  { %v1606_v52 = vmul.f32 %v1588_v62, %v4183_v38  ;;  %3102 = vmatprep.subr.bf16.mxu1 %v3101_v33  ;;  %v1583_v38 = vsel %vm510_vm4, %v1558_v39, %v5739_v16  ;;  %v1607_v41 = vmul.f32 %v1584_v54, %v4186_v53  ;;  %v1601_v24 = vmul.f32 %v1591_v37, %v4189_v18 }
 0x476   :  { %3032 = vmatpush1.bf16.msra.mxu0 %v3031_v0  ;;  %3104 = vmatpush1.bf16.msra.mxu1 %v3103_v5  ;;  %v1604_v19 = vmul.f32 %v1579_v56, %v4192_v6  ;;  %v1603_v26 = vmul.f32 %v1583_v38, %v4186_v53  ;;  %v6990_v39 = vpack.c.bf16 %v5455_v9, %v5449_v29  ;;  %v7000_v56 = vld [vmem:[#allocation22_spill] sm:$0xff] }
 0x477   :  { %3034 = vmatprep.subr.bf16.mxu0 %v6983_v43  ;;  %v1576_v48 = vpop.permute.xlu1 %1575  ;;  %v3037_v57 = vpack.c.bf16 %v1606_v52, %v1602_v21  ;;  %3106 = vmatprep.subr.bf16.mxu1 %v6984_v27  ;;  %v1622_v11 = vpop.permute.xlu0 %1621  ;;  %v6994_v29 = vpack.c.bf16 %v5490_v17, %v5484_v31  ;;  %v6997_v17 = vld [vmem:[#allocation66_spill] sm:$0xff]  ;;  %v6998_v31 = vld [vmem:[#allocation55_spill] sm:$0xff] }
 0x478   :  { %v1580_v35 = vsel %vm510_vm4, %v5749_v3, %v1576_v48  ;;  %v1592_v50 = vsel %vm510_vm4, %v1576_v48, %v5737_v36  ;;  %v6986_v3 = vpack.c.bf16 %v5423_v30, %v6985_v10  ;;  %v1651_v36 = vsel %vm591_vm5, %v5751_v28, %v1622_v11  ;;  %v6999_v52 = vld [vmem:[#allocation23_spill] sm:$0xff] }
 0x479   :  { %v1605_v16 = vmul.f32 %v1592_v50, %v4189_v18  ;;  %v1608_v12 = vmul.f32 %v1580_v35, %v4192_v6  ;;  %v3111_v42 = vpack.c.bf16 %v1607_v41, %v1603_v26  ;;  %v1666_v34 = vmul.f32 %v1651_v36, %v4195_v8  ;;  %v7004_v35 = vld [vmem:[#allocation67_spill] sm:$0xff]  ;;  %v7005_v50 = vld [vmem:[#allocation52_spill] sm:$0xff] }
 0x47a   :  { %3036 = vmatpush1.bf16.msra.mxu0 %v6986_v3  ;;  %3108 = vmatpush1.bf16.msra.mxu1 %v6989_v59  ;;  %v1647_v46 = vsel %vm591_vm5, %v1622_v11, %v5761_v15  ;;  %v1680_v5 = vmul.f32 %v6998_v31, %v6997_v17  ;;  %v7001_v37 = vpack.c.bf16 %v6999_v52, %v7000_v56  ;;  %v7008_v3 = vld [vmem:[#allocation35_spill] sm:$0xff]  ;;  %v7023_v31 = vld [vmem:[#allocation64_spill] sm:$0xff] }
 0x47b   :  { %3038 = vmatprep.subr.bf16.mxu0 %v3037_v57  ;;  %v3039_v23 = vpack.c.bf16 %v1605_v16, %v1601_v24  ;;  %v1624_v55 = vpop.permute.xlu1 %1623  ;;  %v3109_v18 = vpack.c.bf16 %v1608_v12, %v1604_v19  ;;  %v1638_v30 = vpop.permute.xlu0 %1637  ;;  %v1667_v21 = vmul.f32 %v1647_v46, %v6993_v47  ;;  %v7003_v57 = vld [vmem:[#allocation42_spill] sm:$0xff]  ;;  %v1679_v27 = vmul.f32 %v7005_v50, %v7004_v35  ;;  %v7007_v16 = vld [vmem:[#allocation43_spill] sm:$0xff]  ;;  %v7031_v50 = vld [vmem:[#allocation96_spill] sm:$0xff] }
 0x47c   :  { %v1652_v6 = vsel %vm591_vm5, %v5759_v2, %v1624_v55  ;;  %v1648_v58 = vsel %vm591_vm5, %v1624_v55, %v5769_v61  ;;  %v1643_v63 = vsel %vm591_vm5, %v5761_v15, %v1638_v30  ;;  %v1655_v32 = vsel %vm591_vm5, %v1638_v30, %v5751_v28  ;;  %v7006_v24 = vld [vmem:[#allocation18_spill] sm:$0xff]  ;;  %v7009_v26 = vld [vmem:[#allocation63_spill] sm:$0xff]  ;;  %v7011_v55 = vld [vmem:[#allocation20_spill] sm:$0xff] }
 0x47d   :  { %v1670_v53 = vmul.f32 %v1652_v6, %v4195_v8  ;;  %3110 = vmatprep.subr.bf16.mxu1 %v3109_v18  ;;  %v1678_v8 = vmul.f32 %v6992_v4, %v6991_v49  ;;  %v1671_v60 = vmul.f32 %v1648_v58, %v6993_v47  ;;  %v1665_v7 = vmul.f32 %v1655_v32, %v4201_v13  ;;  %v7012_v6 = vld [vmem:[#allocation36_spill] sm:$0xff]  ;;  %v7013_v30 = vld [vmem:[#allocation14_spill] sm:$0xff] }
 0x47e   :  { %3040 = vmatpush1.bf16.msra.mxu0 %v3039_v23  ;;  %3112 = vmatpush1.bf16.msra.mxu1 %v3111_v42  ;;  %v1668_v15 = vmul.f32 %v1643_v63, %v4204_v20  ;;  %v1686_v38 = vmul.f32 %v7003_v57, %v6991_v49  ;;  %v1682_v19 = vmul.f32 %v7006_v24, %v6991_v49  ;;  %v7010_v23 = vld [vmem:[#allocation57_spill] sm:$0xff]  ;;  %v7015_v58 = vld [vmem:[#allocation56_spill] sm:$0xff]  ;;  %v7016_v63 = vld [vmem:[#allocation39_spill] sm:$0xff] }
 0x47f   :  { %3042 = vmatprep.subr.bf16.mxu0 %v6990_v39  ;;  %v1640_v1 = vpop.permute.xlu1 %1639  ;;  %v3045_v44 = vpack.c.bf16 %v1670_v53, %v1666_v34  ;;  %3114 = vmatprep.subr.bf16.mxu1 %v6994_v29  ;;  %v5964_v0 = vpop.permute.xlu0 %1897  ;;  %v3119_v41 = vpack.c.bf16 %v1671_v60, %v1667_v21  ;;  %v1688_v12 = vmul.f32 %v7007_v16, %v6997_v17  ;;  %v7017_v39 = vld [vmem:[#allocation79_spill] sm:$0xff]  ;;  %v7019_v47 = vld [vmem:[#allocation78_spill] sm:$0xff]  ;;  %v7033_v16 = vld [vmem:[#allocation44_spill] sm:$0xff] }
 0x480   :  { %v1644_v28 = vsel %vm591_vm5, %v5769_v61, %v1640_v1  ;;  %v1656_v9 = vsel %vm591_vm5, %v1640_v1, %v5759_v2  ;;  %v6995_v61 = vpack.c.bf16 %v5487_v40, %v5481_v25  ;;  %v6996_v2 = vld [vmem:[#allocation54_spill] sm:$0xff]  ;;  %v7002_v25 = vld [vmem:[#allocation53_spill] sm:$0xff]  ;;  %v1675_v36 = vmul.f32 %v7008_v3, %v7004_v35 }
 0x481   :  { %v1669_v33 = vmul.f32 %v1656_v9, %v4201_v13  ;;  %v1672_v62 = vmul.f32 %v1644_v28, %v4204_v20  ;;  %v1674_v14 = vmul.f32 %v6996_v2, %v6991_v49  ;;  %v1676_v48 = vmul.f32 %v7002_v25, %v6997_v17  ;;  %v7020_v28 = vld [vmem:[#allocation48_spill] sm:$0xff]  ;;  %v7035_v3 = vld [vmem:[#allocation101_spill] sm:$0xff] }
 0x482   :  { %3044 = vmatpush1.bf16.msra.mxu0 %v6995_v61  ;;  %3116 = vmatpush1.bf16.msra.mxu1 %v7001_v37  ;;  %v1685_v45 = vmul.f32 %v7010_v23, %v7009_v26  ;;  %v3053_v59 = vpack.c.bf16 %v1686_v38, %v1682_v19  ;;  %v1684_v18 = vmul.f32 %v7011_v55, %v6997_v17  ;;  %v7027_v25 = vld [vmem:[#allocation80_spill] sm:$0xff] }
 0x483   :  { %3046 = vmatprep.subr.bf16.mxu0 %v3045_v44  ;;  %v3047_v54 = vpack.c.bf16 %v1669_v33, %v1665_v7  ;;  %v5981_v13 = vpop.permute.xlu1 %1899  ;;  %v3117_v20 = vpack.c.bf16 %v1672_v62, %v1668_v15  ;;  %v1702_v43 = vpop.permute.xlu0 %1701  ;;  %v3049_v40 = vpack.c.bf16 %v1678_v8, %v1674_v14  ;;  %v3121_v11 = vpack.c.bf16 %v1680_v5, %v1676_v48  ;;  %v7018_v8 = vld [vmem:[#allocation58_spill] sm:$0xff]  ;;  %v7021_v7 = vld [vmem:[#allocation27_spill] sm:$0xff]  ;;  %v7028_v48 = vld [vmem:[#allocation69_spill] sm:$0xff] }
 0x484   :  { %v7014_v42 = vpack.c.bf16 %v7012_v6, %v7013_v30  ;;  %v3123_v34 = vpack.c.bf16 %v1679_v27, %v1675_v36  ;;  %v1681_v53 = vmul.f32 %v7015_v58, %v7009_v26  ;;  %v1687_v32 = vmul.f32 %v7016_v63, %v7004_v35  ;;  %v7022_v33 = vld [vmem:[#allocation94_spill] sm:$0xff]  ;;  %v7024_v5 = vld [vmem:[#allocation71_spill] sm:$0xff]  ;;  %v7032_v19 = vld [vmem:[#allocation84_spill] sm:$0xff] }
 0x485   :  { %3118 = vmatprep.subr.bf16.mxu1 %v3117_v20  ;;  %v1727_v1 = vsel %vm704_vm6, %v1702_v43, %v7017_v39  ;;  %v3125_v44 = vpack.c.bf16 %v1688_v12, %v1684_v18  ;;  %v1683_v46 = vmul.f32 %v7018_v8, %v7004_v35  ;;  %v1731_v15 = vsel %vm704_vm6, %v7021_v7, %v1702_v43  ;;  %v7039_v6 = vld [vmem:[#allocation50_spill] sm:$0xff]  ;;  %v7044_v8 = vld [vmem:[#allocation61_spill] sm:$0xff] }
 0x486   :  { %3048 = vmatpush1.bf16.msra.mxu0 %v3047_v54  ;;  %3120 = vmatpush1.bf16.msra.mxu1 %v3119_v41  ;;  %v3055_v4 = vpack.c.bf16 %v1685_v45, %v1681_v53  ;;  %v1746_v62 = vmul.f32 %v1727_v1, %v7022_v33  ;;  %v7025_v21 = vpack.c.bf16 %v7023_v31, %v7024_v5  ;;  %v7026_v54 = vld [vmem:[#allocation93_spill] sm:$0xff]  ;;  %v7030_v41 = vld [vmem:[#allocation95_spill] sm:$0xff]  ;;  %v7051_v31 = vld [vmem:[#allocation100_spill] sm:$0xff] }
 0x487   :  { %3050 = vmatprep.subr.bf16.mxu0 %v3049_v40  ;;  %v5993_v10 = vpop.permute.xlu1 %1907  ;;  %3122 = vmatprep.subr.bf16.mxu1 %v3121_v11  ;;  %v1718_v22 = vpop.permute.xlu0 %1717  ;;  %v3127_v2 = vpack.c.bf16 %v1687_v32, %v1683_v46  ;;  %v1745_v20 = vmul.f32 %v1731_v15, %v7026_v54  ;;  %v7029_v57 = vpack.c.bf16 %v7027_v25, %v7028_v48  ;;  %v7036_v45 = vld [vmem:[#allocation45_spill] sm:$0xff]  ;;  %v7042_v32 = vld [vmem:[#allocation98_spill] sm:$0xff] }
 0x488   :  { %v1723_v14 = vsel %vm704_vm6, %v7017_v39, %v1718_v22  ;;  %v1735_v17 = vsel %vm704_vm6, %v1718_v22, %v7021_v7  ;;  %v7034_v12 = vpack.c.bf16 %v7032_v19, %v7033_v16  ;;  %v7037_v22 = vld [vmem:[#allocation72_spill] sm:$0xff]  ;;  %v7041_v53 = vld [vmem:[#allocation49_spill] sm:$0xff] }
 0x489   :  { %v1747_v35 = vmul.f32 %v1723_v14, %v7030_v41  ;;  %v1748_v27 = vmul.f32 %v1735_v17, %v7031_v50  ;;  %v7050_v14 = vld [vmem:[#allocation99_spill] sm:$0xff]  ;;  %v7056_v48 = vld [vmem:[#allocation81_spill] sm:$0xff]  ;;  %v7061_v19 = vld [vmem:[#allocation92_spill] sm:$0xff] }
 0x48a   :  { %3052 = vmatpush1.bf16.msra.mxu0 %v7014_v42  ;;  %3124 = vmatpush1.bf16.msra.mxu1 %v3123_v34  ;;  %v7040_v42 = vld [vmem:[#allocation65_spill] sm:$0xff] }
 0x48b   :  { %3054 = vmatprep.subr.bf16.mxu0 %v3053_v59  ;;  %v1704_v49 = vpop.permute.xlu1 %1703  ;;  %3126 = vmatprep.subr.bf16.mxu1 %v3125_v44  ;;  %v1766_v29 = vpop.permute.xlu0 %1765  ;;  %v7038_v59 = vpack.c.bf16 %v7036_v45, %v7037_v22  ;;  %v7064_v45 = vld [vmem:[#allocation103_spill] sm:$0xff] }
 0x48c   :  { %v1728_v60 = vsel %vm704_vm6, %v1704_v49, %v7019_v47  ;;  %v1732_v9 = vsel %vm704_vm6, %v7020_v28, %v1704_v49  ;;  %v1791_v36 = vsel %vm785_vm7, %v1766_v29, %v7035_v3  ;;  %v1795_v63 = vsel %vm785_vm7, %v7041_v53, %v1766_v29 }
 0x48d   :  { %v1750_v61 = vmul.f32 %v1728_v60, %v7022_v33  ;;  %v1749_v52 = vmul.f32 %v1732_v9, %v7026_v54  ;;  %v1810_v39 = vmul.f32 %v1791_v36, %v7042_v32  ;;  %v7047_v33 = vld [vmem:[#allocation46_spill] sm:$0xff] }
 0x48e   :  { %3056 = vmatpush1.bf16.msra.mxu0 %v3055_v4  ;;  %3128 = vmatpush1.bf16.msra.mxu1 %v3127_v2  ;;  %v7043_v4 = vld [vmem:[#allocation85_spill] sm:$0xff] }
 0x48f   :  { %3058 = vmatprep.subr.bf16.mxu0 %v7025_v21  ;;  %v1720_v56 = vpop.permute.xlu1 %1719  ;;  %v3061_v37 = vpack.c.bf16 %v1750_v61, %v1746_v62  ;;  %3130 = vmatprep.subr.bf16.mxu1 %v7029_v57  ;;  %v3063_v26 = vpack.c.bf16 %v1749_v52, %v1745_v20  ;;  %v7045_v46 = vpack.c.bf16 %v7043_v4, %v7044_v8  ;;  %v7048_v62 = vld [vmem:[#allocation82_spill] sm:$0xff]  ;;  %v7052_v52 = vld [vmem:[#allocation73_spill] sm:$0xff]  ;;  %v7055_v20 = vld [vmem:[#allocation91_spill] sm:$0xff] }
 0x490   :  { %v1724_v43 = vsel %vm704_vm6, %v7019_v47, %v1720_v56  ;;  %v1736_v40 = vsel %vm704_vm6, %v1720_v56, %v7020_v28  ;;  %v1782_v38 = vpop.permute.xlu0 %1781  ;;  %v7046_v47 = vld [vmem:[#allocation97_spill] sm:$0xff]  ;;  %v7049_v61 = vpack.c.bf16 %v7047_v33, %v7048_v62  ;;  %v7053_v56 = vld [vmem:[#allocation74_spill] sm:$0xff]  ;;  %v7057_v57 = vld [vmem:[#allocation60_spill] sm:$0xff] }
 0x491   :  { %v1751_v11 = vmul.f32 %v1724_v43, %v7030_v41  ;;  %v1752_v24 = vmul.f32 %v1736_v40, %v7031_v50  ;;  %v1787_v44 = vsel %vm785_vm7, %v7035_v3, %v1782_v38  ;;  %v1799_v49 = vsel %vm785_vm7, %v1782_v38, %v7041_v53  ;;  %v7059_v50 = vld [vmem:[#allocation86_spill] sm:$0xff]  ;;  %v7062_v3 = vld [vmem:[#allocation40_spill] sm:$0xff]  ;;  %v6136_v53 = vld [vmem:[%s6490_s1 + $0x28] ss:$0 sm:$0xff] }
 0x492   :  { %3060 = vmatpush1.bf16.msra.mxu0 %v7034_v12  ;;  %3132 = vmatpush1.bf16.msra.mxu1 %v7038_v59  ;;  %v1809_v29 = vmul.f32 %v1795_v63, %v7046_v47  ;;  %v1811_v17 = vmul.f32 %v1787_v44, %v7050_v14  ;;  %v1812_v5 = vmul.f32 %v1799_v49, %v7051_v31  ;;  %v7075_v62 = vld [vmem:[#allocation15_spill] sm:$0xff] }
 0x493   :  { %3062 = vmatprep.subr.bf16.mxu0 %v3061_v37  ;;  %v3135_v23 = vpack.c.bf16 %v1751_v11, %v1747_v35  ;;  %v1768_v55 = vpop.permute.xlu1 %1767  ;;  %v3133_v18 = vpack.c.bf16 %v1752_v24, %v1748_v27  ;;  %v7054_v37 = vpack.c.bf16 %v7052_v52, %v7053_v56  ;;  %v7058_v38 = vpack.c.bf16 %v7056_v48, %v7057_v57  ;;  %v7060_v11 = vld [vmem:[#allocation87_spill] sm:$0xff]  ;;  %v6177_v56 = vld [vmem:[%s6490_s1 + $0x38] ss:$0 sm:$0xff] }
 0x494   :  { %v1792_v30 = vsel %vm785_vm7, %v1768_v55, %v7039_v6  ;;  %v1796_v34 = vsel %vm785_vm7, %v7040_v42, %v1768_v55  ;;  %v1830_v58 = vpop.permute.xlu0 %1829  ;;  %v1918_v27 = vsel %vm947_vm9, %v7059_v50, %v5981_v13  ;;  %v1922_v36 = vsel %vm947_vm9, %v7062_v3, %v7059_v50  ;;  %v7065_v55 = vld [vmem:[#allocation26_spill] sm:$0xff]  ;;  %v7079_v48 = vld [vmem:[#allocation47_spill] sm:$0xff] }
 0x495   :  { %v1814_v1 = vmul.f32 %v1792_v30, %v7042_v32  ;;  %3134 = vmatprep.subr.bf16.mxu1 %v3133_v18  ;;  %v1813_v60 = vmul.f32 %v1796_v34, %v7046_v47  ;;  %v1855_v43 = vsel %vm866_vm8, %v1830_v58, %v7055_v20  ;;  %v1917_v18 = vsel %vm947_vm9, %v7065_v55, %v5964_v0  ;;  %v7067_v34 = vld [vmem:[#allocation59_spill] sm:$0xff]  ;;  %v7069_v32 = vld [vmem:[#allocation102_spill] sm:$0xff] }
 0x496   :  { %3064 = vmatpush1.bf16.msra.mxu0 %v3063_v26  ;;  %3136 = vmatpush1.bf16.msra.mxu1 %v3135_v23  ;;  %v7063_v26 = vld [vmem:[#allocation28_spill] sm:$0xff]  ;;  %v1874_v22 = vmul.f32 %v1855_v43, %v7064_v45  ;;  %v1934_v63 = vmul.f32 %v6136_v53, %v1918_v27  ;;  %v1926_v8 = vsel %vm947_vm9, %v5993_v10, %v7062_v3  ;;  %v7080_v57 = vld [vmem:[#allocation83_spill] sm:$0xff] }
 0x497   :  { %3066 = vmatprep.subr.bf16.mxu0 %v7045_v46  ;;  %v1784_v28 = vpop.permute.xlu1 %1783  ;;  %v3069_v9 = vpack.c.bf16 %v1814_v1, %v1810_v39  ;;  %3138 = vmatprep.subr.bf16.mxu1 %v7049_v61  ;;  %v3071_v40 = vpack.c.bf16 %v1813_v60, %v1809_v29  ;;  %v1859_v23 = vsel %vm866_vm8, %v7063_v26, %v1830_v58  ;;  %v7070_v1 = vld [vmem:[#allocation41_spill] sm:$0xff] }
 0x498   :  { %v1788_v7 = vsel %vm785_vm7, %v7039_v6, %v1784_v28  ;;  %v1800_v15 = vsel %vm785_vm7, %v1784_v28, %v7040_v42  ;;  %v1846_v2 = vpop.permute.xlu0 %1845  ;;  %v7066_v42 = vld [vmem:[#allocation75_spill] sm:$0xff]  ;;  %v1873_v46 = vmul.f32 %v1859_v23, %v7069_v32  ;;  %v7071_v28 = vld [vmem:[#allocation25_spill] sm:$0xff]  ;;  %v1936_v50 = vmul.f32 %v6177_v56, %v1926_v8 }
 0x499   :  { %v1815_v21 = vmul.f32 %v1788_v7, %v7050_v14  ;;  %v1816_v54 = vmul.f32 %v1800_v15, %v7051_v31  ;;  %v1851_v6 = vsel %vm866_vm8, %v7055_v20, %v1846_v2  ;;  %v1863_v30 = vsel %vm866_vm8, %v1846_v2, %v7063_v26  ;;  %v7074_v15 = vld [vmem:[#allocation104_spill] sm:$0xff]  ;;  %v3311_v20 = vld [vmem:[%s6490_s1 + $0x20] ss:$0 sm:$0xff] }
 0x49a   :  { %3068 = vmatpush1.bf16.msra.mxu0 %v7054_v37  ;;  %3140 = vmatpush1.bf16.msra.mxu1 %v7058_v38  ;;  %v7068_v58 = vpack.c.bf16 %v7066_v42, %v7067_v34  ;;  %v1875_v33 = vmul.f32 %v1851_v6, %v7074_v15  ;;  %v1876_v61 = vmul.f32 %v1863_v30, %v7075_v62  ;;  %v7077_v31 = vld [vmem:[#allocation24_spill] sm:$0xff] }
 0x49b   :  { %3070 = vmatprep.subr.bf16.mxu0 %v3069_v9  ;;  %v3143_v25 = vpack.c.bf16 %v1815_v21, %v1811_v17  ;;  %v1832_v41 = vpop.permute.xlu1 %1831  ;;  %v3141_v35 = vpack.c.bf16 %v1816_v54, %v1812_v5  ;;  %v7072_v9 = vld [vmem:[#allocation77_spill] sm:$0xff]  ;;  %v7076_v17 = vld [vmem:[#allocation76_spill] sm:$0xff]  ;;  %v1921_v21 = vsel %vm947_vm9, %v7070_v1, %v7065_v55  ;;  %v1930_v54 = vmul.f32 %v6136_v53, %v1917_v18 }
 0x49c   :  { %v1856_v24 = vsel %vm866_vm8, %v1832_v41, %v7060_v11  ;;  %v1860_v16 = vsel %vm866_vm8, %v7061_v19, %v1832_v41  ;;  %v1906_v12 = vpop.permute.xlu0 %1905  ;;  %v7073_v29 = vpack.c.bf16 %v7071_v28, %v7072_v9  ;;  %v7078_v5 = vpack.c.bf16 %v7076_v17, %v7077_v31  ;;  %v1952_v18 = vld [vmem:[%s6493_s6 + $0x38] sm:$0xff]  ;;  %v2382_v17 = vld [vmem:[%s6496_s10 + $0x8] sm:$0xff] }
 0x49d   :  { %v1878_v59 = vmul.f32 %v1856_v24, %v7064_v45  ;;  %3142 = vmatprep.subr.bf16.mxu1 %v3141_v35  ;;  %v1877_v39 = vmul.f32 %v1860_v16, %v7069_v32  ;;  %v1925_v44 = vsel %vm947_vm9, %v1906_v12, %v7070_v1  ;;  %v1913_v52 = vsel %vm947_vm9, %v5964_v0, %v1906_v12  ;;  %v1945_v12 = vld [vmem:[%s6493_s6] sm:$0xff]  ;;  %v2398_v32 = vld [vmem:[%s6496_s10 + $0x88] sm:$0xff] }
 0x49e   :  { %3072 = vmatpush1.bf16.msra.mxu0 %v3071_v40  ;;  %3144 = vmatpush1.bf16.msra.mxu1 %v3143_v25  ;;  %v1932_v37 = vmul.f32 %v6177_v56, %v1925_v44  ;;  %v1933_v43 = vmul.f32 %v3311_v20, %v1922_v36  ;;  %v7081_v38 = vpack.c.bf16 %v7079_v48, %v7080_v57  ;;  %v2432_v48 = vld [vmem:[%s6496_s10 + $0x198] sm:$0xff] }
 0x49f   :  { %3074 = vmatprep.subr.bf16.mxu0 %v7068_v58  ;;  %v1848_v49 = vpop.permute.xlu1 %1847  ;;  %v3077_v4 = vpack.c.bf16 %v1878_v59, %v1874_v22  ;;  %3146 = vmatprep.subr.bf16.mxu1 %v7073_v29  ;;  %v3079_v40 = vpack.c.bf16 %v1877_v39, %v1873_v46  ;;  %v1914_v35 = vsel %vm947_vm9, %v5981_v13, %v5993_v10  ;;  %v1949_v13 = vld [vmem:[%s6493_s6 + $0x20] sm:$0xff]  ;;  %v1948_v59 = vld [vmem:[%s6493_s6 + $0x18] sm:$0xff]  ;;  %v1955_v46 = vld [vmem:[%s6493_s6 + $0x50] sm:$0xff] }
 0x4a0   :  { %v1852_v47 = vsel %vm866_vm8, %v7060_v11, %v1848_v49  ;;  %v1864_v60 = vsel %vm866_vm8, %v1848_v49, %v7061_v19  ;;  %v6157_v7 = vpop.permute.xlu0 %1885  ;;  %v3081_v11 = vpack.c.bf16 %v1934_v63, %v1930_v54  ;;  %v1929_v24 = vmul.f32 %v3311_v20, %v1921_v21  ;;  %v3312_v19 = vld [vmem:[%s6490_s1 + $0x30] ss:$0 sm:$0xff]  ;;  %v2397_v63 = vld [vmem:[%s6496_s10 + $0x80] sm:$0xff]  ;;  %v2400_v54 = vld [vmem:[%s6496_s10 + $0x98] sm:$0xff] }
 0x4a1   :  { %v1879_v2 = vmul.f32 %v1852_v47, %v7074_v15  ;;  %v1880_v14 = vmul.f32 %v1864_v60, %v7075_v62  ;;  %v1931_v16 = vmul.f32 %v3312_v19, %v1913_v52  ;;  %v3153_v3 = vpack.c.bf16 %v1936_v50, %v1932_v37  ;;  %v2399_v21 = vld [vmem:[%s6496_s10 + $0x90] sm:$0xff]  ;;  %v2414_v37 = vld [vmem:[%s6496_s10 + $0x108] sm:$0xff] }
 0x4a2   :  { %3076 = vmatpush1.bf16.msra.mxu0 %v7078_v5  ;;  %3148 = vmatpush1.bf16.msra.mxu1 %v7081_v38  ;;  %v3083_v10 = vpack.c.bf16 %v1933_v43, %v1929_v24  ;;  %v1935_v36 = vmul.f32 %v3312_v19, %v1914_v35  ;;  %v3161_v28 = vpack.c.bf16 %v2398_v32, %v2397_v63  ;;  %v1947_v43 = vld [vmem:[%s6493_s6 + $0x10] sm:$0xff]  ;;  %v2401_v35 = vld [vmem:[%s6496_s10 + $0xa0] sm:$0xff]  ;;  %v2402_v50 = vld [vmem:[%s6496_s10 + $0xa8] sm:$0xff] }
 0x4a3   :  { %3078 = vmatprep.subr.bf16.mxu0 %v3077_v4  ;;  %v3151_v25 = vpack.c.bf16 %v1879_v2, %v1875_v33  ;;  %v1888_v0 = vpop.permute.xlu1 %1887  ;;  %v3149_v41 = vpack.c.bf16 %v1880_v14, %v1876_v61  ;;  %v1951_v4 = vld [vmem:[%s6493_s6 + $0x30] sm:$0xff]  ;;  %v1954_v61 = vld [vmem:[%s6493_s6 + $0x48] sm:$0xff]  ;;  %v2429_v2 = vld [vmem:[%s6496_s10 + $0x180] sm:$0xff]  ;;  %v3165_v57 = vpack.c.bf16 %v2400_v54, %v2399_v21 }
 0x4a4   :  { %v1894_v27 = vpop.permute.xlu0 %1893  ;;  %v3155_v45 = vpack.c.bf16 %v1935_v36, %v1931_v16  ;;  %v2381_v14 = vld [vmem:[%s6496_s10] sm:$0xff]  ;;  %v3193_v52 = vpack.c.bf16 %v2430_v51, %v2429_v2  ;;  %v2383_v38 = vld [vmem:[%s6496_s10 + $0x10] sm:$0xff]  ;;  %v2416_v24 = vld [vmem:[%s6496_s10 + $0x118] sm:$0xff] }
 0x4a5   :  { %3150 = vmatprep.subr.bf16.mxu1 %v3149_v41  ;;  %v1923_v22 = vsel %vm947_vm9, %v6157_v7, %v1894_v27  ;;  %v2386_v36 = vld [vmem:[%s6496_s10 + $0x28] sm:$0xff]  ;;  %v2388_v63 = vld [vmem:[%s6496_s10 + $0x38] sm:$0xff]  ;;  %v2439_v51 = vld [vmem:[%s6496_s10 + $0x1d0] sm:$0xff] }
 0x4a6   :  { %3080 = vmatpush1.bf16.msra.mxu0 %v3079_v40  ;;  %3152 = vmatpush1.bf16.msra.mxu1 %v3151_v25  ;;  %v1937_v30 = vmul.f32 %v3311_v20, %v1923_v22  ;;  %v3163_v40 = vpack.c.bf16 %v2382_v17, %v2381_v14  ;;  %v2431_v25 = vld [vmem:[%s6496_s10 + $0x190] sm:$0xff]  ;;  %v2440_v14 = vld [vmem:[%s6496_s10 + $0x1d8] sm:$0xff] }
 0x4a7   :  { %3082 = vmatprep.subr.bf16.mxu0 %v3081_v11  ;;  %v1904_v26 = vpop.permute.xlu1 %1903  ;;  %3154 = vmatprep.subr.bf16.mxu1 %v3153_v3  ;;  %v2415_v11 = vld [vmem:[%s6496_s10 + $0x110] sm:$0xff]  ;;  %v2434_v3 = vld [vmem:[%s6496_s10 + $0x1a8] sm:$0xff]  ;;  %v3213_v54 = vpack.c.bf16 %v2440_v14, %v2439_v51 }
 0x4a8   :  { %v1902_v23 = vpop.permute.xlu0 %1901 }
 0x4a9   :  { %2058 = vmatmul.mubr.f32.vlgmr.msra.gmra.mrb[16].mxu0 %v1945_v12  ;;  %v1919_v55 = vsel %vm947_vm9, %v1894_v27, %v1902_v23  ;;  %2236 = vmatmul.mubr.f32.vlgmr.msra.gmra.mrb[16].mxu1 %v1945_v12  ;;  %v3197_v27 = vpack.c.bf16 %v2432_v48, %v2431_v25  ;;  %v2433_v12 = vld [vmem:[%s6496_s10 + $0x1a0] sm:$0xff] }
 0x4aa   :  { %3084 = vmatpush1.bf16.msra.mxu0 %v3083_v10  ;;  %2063 = vmatprep.mubr.f32.mxu0 %v1949_v13  ;;  %v1938_v39 = vmul.f32 %v6136_v53, %v1919_v55  ;;  %v2385_v10 = vld [vmem:[%s6496_s10 + $0x20] sm:$0xff]  ;;  %v3201_v22 = vpack.c.bf16 %v2434_v3, %v2433_v12  ;;  %v2418_v55 = vld [vmem:[%s6496_s10 + $0x128] sm:$0xff]  ;;  %v2395_v12 = vld [vmem:[%s6496_s10 + $0x70] sm:$0xff] }
 0x4ab   :  { %3156 = vmatpush1.bf16.msra.mxu1 %v3155_v45  ;;  %v1896_v6 = vpop.permute.xlu1 %1895  ;;  %2241 = vmatprep.mubr.f32.mxu1 %v1949_v13  ;;  %v3169_v13 = vpack.c.bf16 %v2402_v50, %v2401_v35  ;;  %v2404_v45 = vld [vmem:[%s6496_s10 + $0xb8] sm:$0xff]  ;;  %v2393_v48 = vld [vmem:[%s6496_s10 + $0x60] sm:$0xff]  ;;  %v2426_v50 = vld [vmem:[%s6496_s10 + $0x168] sm:$0xff] }
 0x4ac   :  { %v1920_v42 = vsel %vm947_vm9, %v1896_v6, %v1904_v26  ;;  %v1924_v34 = vsel %vm947_vm9, %v1888_v0, %v1896_v6  ;;  %v1910_v58 = vpop.permute.xlu0 %1909  ;;  %v3171_v6 = vpack.c.bf16 %v2386_v36, %v2385_v10  ;;  %v2425_v35 = vld [vmem:[%s6496_s10 + $0x160] sm:$0xff]  ;;  %v2396_v3 = vld [vmem:[%s6496_s10 + $0x78] sm:$0xff] }
 0x4ad   :  { %2064 = vmatmul.mubr.f32.gmra.mrb[18].mxu0 %v1948_v59  ;;  %v1941_v1 = vmul.f32 %v3311_v20, %v1924_v34  ;;  %v1942_v44 = vmul.f32 %v6136_v53, %v1920_v42  ;;  %v1915_v49 = vsel %vm947_vm9, %v1902_v23, %v1910_v58  ;;  %v1927_v8 = vsel %vm947_vm9, %v1910_v58, %v6157_v7  ;;  %v2403_v23 = vld [vmem:[%s6496_s10 + $0xb0] sm:$0xff]  ;;  %v2436_v42 = vld [vmem:[%s6496_s10 + $0x1b8] sm:$0xff] }
 0x4ae   :  { %2069 = vmatprep.mubr.f32.mxu0 %v1952_v18  ;;  %2242 = vmatmul.mubr.f32.gmra.mrb[18].mxu1 %v1948_v59  ;;  %v1939_v9 = vmul.f32 %v3312_v19, %v1915_v49  ;;  %v1940_v7 = vmul.f32 %v6177_v56, %v1927_v8  ;;  %v7082_v20 = vmov 0.0   ;;  %v2417_v59 = vld [vmem:[%s6496_s10 + $0x120] sm:$0xff]  ;;  %v3173_v34 = vpack.c.bf16 %v2404_v45, %v2403_v23  ;;  %v2387_v58 = vld [vmem:[%s6496_s10 + $0x30] sm:$0xff]  ;;  %v1956_v8 = vld [vmem:[%s6493_s6 + $0x58] sm:$0xff] }
 0x4af   :  { %v3087_v47 = vpack.c.bf16 %v1941_v1, %v1937_v30  ;;  %v1912_v60 = vpop.permute.xlu1 %1911  ;;  %2247 = vmatprep.mubr.f32.mxu1 %v1952_v18  ;;  %v3085_v53 = vpack.c.bf16 %v1942_v44, %v1938_v39  ;;  %v1953_v18 = vld [vmem:[%s6493_s6 + $0x40] sm:$0xff]  ;;  %v2435_v30 = vld [vmem:[%s6496_s10 + $0x1b0] sm:$0xff]  ;;  %v3203_v32 = vpack.c.bf16 %v2418_v55, %v2417_v59  ;;  %v2406_v1 = vld [vmem:[%s6496_s10 + $0xc8] sm:$0xff]  ;;  %v3191_v10 = vpack.c.bf16 %v2396_v3, %v2395_v12 }
 0x4b0   :  { %v1916_v29 = vsel %vm947_vm9, %v1904_v26, %v1912_v60  ;;  %v1928_v15 = vsel %vm947_vm9, %v1912_v60, %v1888_v0  ;;  %v2384_v0 = vld [vmem:[%s6496_s10 + $0x18] sm:$0xff]  ;;  %v3199_v26 = vpack.c.bf16 %v2416_v24, %v2415_v11  ;;  %v2405_v39 = vld [vmem:[%s6496_s10 + $0xc0] sm:$0xff]  ;;  %v3205_v44 = vpack.c.bf16 %v2436_v42, %v2435_v30  ;;  %v2419_v49 = vld [vmem:[%s6496_s10 + $0x130] sm:$0xff] }
 0x4b1   :  { %2070 = vmatmul.mubr.f32.gmra.mrb[20].mxu0 %v1951_v4  ;;  %v1943_v33 = vmul.f32 %v3312_v19, %v1916_v29  ;;  %v1944_v62 = vmul.f32 %v6177_v56, %v1928_v15  ;;  %3086 = vmatprep.subr.bf16.mxu0 %v3085_v53  ;;  %v2413_v56 = vld [vmem:[%s6496_s10 + $0x100] sm:$0xff]  ;;  %v1950_v19 = vld [vmem:[%s6493_s6 + $0x28] sm:$0xff]  ;;  %v3167_v16 = vpack.c.bf16 %v2384_v0, %v2383_v38  ;;  %v2407_v15 = vld [vmem:[%s6496_s10 + $0xd0] sm:$0xff] }
 0x4b2   :  { %2075 = vmatprep.mubr.f32.mxu0 %v1955_v46  ;;  %2248 = vmatmul.mubr.f32.gmra.mrb[20].mxu1 %v1951_v4  ;;  %v3195_v41 = vpack.c.bf16 %v2414_v37, %v2413_v56  ;;  %v2420_v4 = vld [vmem:[%s6496_s10 + $0x138] sm:$0xff]  ;;  %v2438_v60 = vld [vmem:[%s6496_s10 + $0x1c8] sm:$0xff]  ;;  %v3177_v53 = vpack.c.bf16 %v2406_v1, %v2405_v39  ;;  %v2441_v38 = vld [vmem:[%s6496_s10 + $0x1e0] sm:$0xff]  ;;  %v3219_v11 = vpack.c.bf16 %v2426_v50, %v2425_v35 }
 0x4b3   :  { %3088 = vmatpush1.bf16.msra.mxu0 %v3087_v47  ;;  %v3159_v31 = vpack.c.bf16 %v1943_v33, %v1939_v9  ;;  %2253 = vmatprep.mubr.f32.mxu1 %v1955_v46  ;;  %v3157_v5 = vpack.c.bf16 %v1944_v62, %v1940_v7  ;;  %v3175_v46 = vpack.c.bf16 %v2388_v63, %v2387_v58  ;;  %v2437_v47 = vld [vmem:[%s6496_s10 + $0x1c0] sm:$0xff]  ;;  %v2390_v9 = vld [vmem:[%s6496_s10 + $0x48] sm:$0xff]  ;;  %v2408_v7 = vld [vmem:[%s6496_s10 + $0xd8] sm:$0xff] }
 0x4b4   :  { %3162 = vmatprep.subr.bf16.mxu0 %v3161_v28  ;;  %v2389_v28 = vld [vmem:[%s6496_s10 + $0x40] sm:$0xff]  ;;  %v3207_v29 = vpack.c.bf16 %v2420_v4, %v2419_v49  ;;  %v3209_v33 = vpack.c.bf16 %v2438_v60, %v2437_v47  ;;  %v3181_v17 = vpack.c.bf16 %v2408_v7, %v2407_v15  ;;  %v2424_v56 = vld [vmem:[%s6496_s10 + $0x158] sm:$0xff]  ;;  %v2411_v24 = vld [vmem:[%s6496_s10 + $0xf0] sm:$0xff] }
 0x4b5   :  { %2076 = vmatmul.mubr.f32.gmra.mrb[22].mxu0 %v1954_v61  ;;  %3158 = vmatprep.subr.bf16.mxu1 %v3157_v5  ;;  %v2421_v62 = vld [vmem:[%s6496_s10 + $0x140] sm:$0xff]  ;;  %v3179_v2 = vpack.c.bf16 %v2390_v9, %v2389_v28  ;;  %v2392_v5 = vld [vmem:[%s6496_s10 + $0x58] sm:$0xff]  ;;  %v7086_v28 = vld [vmem:[#allocation7_spill] sm:$0xff] }
 0x4b6   :  { %2146 = vmatprep.mubr.f32.mxu0 %v7082_v20  ;;  %2254 = vmatmul.mubr.f32.gmra.mrb[22].mxu1 %v1954_v61  ;;  %v2422_v61 = vld [vmem:[%s6496_s10 + $0x148] sm:$0xff]  ;;  %v2444_v36 = vld [vmem:[%s6496_s10 + $0x1f8] sm:$0xff]  ;;  %v7084_v1 = vld [vmem:[#allocation6_spill] sm:$0xff] }
 0x4b7   :  { %3160 = vmatpush1.bf16.msra.mxu1 %v3159_v31  ;;  %2324 = vmatprep.mubr.f32.mxu1 %v7082_v20  ;;  %v2391_v31 = vld [vmem:[%s6496_s10 + $0x50] sm:$0xff]  ;;  %v3211_v21 = vpack.c.bf16 %v2422_v61, %v2421_v62  ;;  %v2428_v23 = vld [vmem:[%s6496_s10 + $0x178] sm:$0xff] }
 0x4b8   :  { %3194 = vmatprep.subr.bf16.mxu1 %v3193_v52  ;;  %v2423_v52 = vld [vmem:[%s6496_s10 + $0x150] sm:$0xff]  ;;  %v3183_v37 = vpack.c.bf16 %v2392_v5, %v2391_v31 }
 0x4b9   :  { %2742 = vmatmul.mubr.msk.f32.vlgmr.msra.gmra.mrb[16].mxu0 %vm1032_vm10, %v1947_v43 }
 0x4ba   :  { %2152 = vmatprep.mubr.f32.mxu0 %v7082_v20  ;;  %3164 = vmatpush3.bf16.msra.mxu0 %v3163_v40  ;;  %v2410_v40 = vld [vmem:[%s6496_s10 + $0xe8] sm:$0xff] }
 0x4bb   :  { %2746 = vmatmul.mubr.msk.f32.vlgmr.msra.gmra.mrb[16].mxu1 %vm1032_vm10, %v1947_v43  ;;  %3166 = vmatprep.subr.bf16.mxu0 %v3165_v57  ;;  %v2409_v43 = vld [vmem:[%s6496_s10 + $0xe0] sm:$0xff]  ;;  %v2394_v57 = vld [vmem:[%s6496_s10 + $0x68] sm:$0xff] }
 0x4bc   :  { %2330 = vmatprep.mubr.f32.mxu1 %v7082_v20  ;;  %3196 = vmatpush3.bf16.msra.mxu1 %v3195_v41  ;;  %v3185_v25 = vpack.c.bf16 %v2410_v40, %v2409_v43  ;;  %v3187_v0 = vpack.c.bf16 %v2394_v57, %v2393_v48  ;;  %v2442_v41 = vld [vmem:[%s6496_s10 + $0x1e8] sm:$0xff]  ;;  %v7090_v40 = vld [vmem:[#allocation9_spill] sm:$0xff] }
 0x4bd   :  { %2743 = vmatmul.mubr.msk.f32.gmra.mrb[18].mxu0 %vm1032_vm10, %v1950_v19  ;;  %3198 = vmatprep.subr.bf16.mxu1 %v3197_v27  ;;  %v3217_v27 = vpack.c.bf16 %v2442_v41, %v2441_v38  ;;  %v1964_v59 = vpop.permute.xlu0 %1963 }
 0x4be   :  { %2158 = vmatprep.mubr.f32.mxu0 %v7082_v20  ;;  %3168 = vmatpush3.bf16.msra.mxu0 %v3167_v16 }
 0x4bf   :  { %2747 = vmatmul.mubr.msk.f32.gmra.mrb[18].mxu1 %vm1032_vm10, %v1950_v19  ;;  %3170 = vmatprep.subr.bf16.mxu0 %v3169_v13  ;;  %v2412_v19 = vld [vmem:[%s6496_s10 + $0xf8] sm:$0xff]  ;;  %v2443_v13 = vld [vmem:[%s6496_s10 + $0x1f0] sm:$0xff] }
 0x4c0   :  { %2336 = vmatprep.mubr.f32.mxu1 %v7082_v20  ;;  %3200 = vmatpush3.bf16.msra.mxu1 %v3199_v26  ;;  %v3189_v16 = vpack.c.bf16 %v2412_v19, %v2411_v24  ;;  %v2427_v26 = vld [vmem:[%s6496_s10 + $0x170] sm:$0xff]  ;;  %v3221_v45 = vpack.c.bf16 %v2444_v36, %v2443_v13  ;;  %v1969_v39 = vpop.permute.xlu1 %1968  ;;  %v7092_v24 = vld [vmem:[#allocation29_spill] sm:$0xff]  ;;  %v7093_v13 = vld [vmem:[#allocation11_spill] sm:$0xff] }
 0x4c1   :  { %2744 = vmatmul.mubr.msk.f32.gmra.mrb[20].mxu0 %vm1032_vm10, %v1953_v18  ;;  %3202 = vmatprep.subr.bf16.mxu1 %v3201_v22  ;;  %v3223_v22 = vpack.c.bf16 %v2428_v23, %v2427_v26  ;;  %v1974_v51 = vpop.permute.xlu0 %1973 }
 0x4c2   :  { %2164 = vmatprep.mubr.f32.mxu0 %v7082_v20  ;;  %3172 = vmatpush3.bf16.msra.mxu0 %v3171_v6 }
 0x4c3   :  { %2748 = vmatmul.mubr.msk.f32.gmra.mrb[20].mxu1 %vm1032_vm10, %v1953_v18  ;;  %3174 = vmatprep.subr.bf16.mxu0 %v3173_v34  ;;  %v7083_v34 = vld [vmem:[#allocation2_spill] sm:$0xff] }
 0x4c4   :  { %2342 = vmatprep.mubr.f32.mxu1 %v7082_v20  ;;  %3204 = vmatpush3.bf16.msra.mxu1 %v3203_v32  ;;  %v3215_v20 = vpack.c.bf16 %v2424_v56, %v2423_v52  ;;  %v7089_v52 = vld [vmem:[#allocation5_spill] sm:$0xff] }
 0x4c5   :  { %2745 = vmatmul.mubr.msk.f32.gmra.mrb[22].mxu0 %vm1032_vm10, %v1956_v8  ;;  %3206 = vmatprep.subr.bf16.mxu1 %v3205_v44 }
 0x4c6   :  { %3176 = vmatpush3.bf16.msra.mxu0 %v3175_v46 }
 0x4c7   :  { %2749 = vmatmul.mubr.msk.f32.gmra.mrb[22].mxu1 %vm1032_vm10, %v1956_v8  ;;  %3178 = vmatprep.subr.bf16.mxu0 %v3177_v53  ;;  %v7085_v8 = vld [vmem:[#allocation3_spill] sm:$0xff] }
 0x4c8   :  { %3208 = vmatpush3.bf16.msra.mxu1 %v3207_v29 }
 0x4c9   :  { %3210 = vmatprep.subr.bf16.mxu1 %v3209_v33  ;;  %v7087_v33 = vld [vmem:[#allocation4_spill] sm:$0xff] }
 0x4ca   :  { %3180 = vmatpush3.bf16.msra.mxu0 %v3179_v2 }
 0x4cb   :  { %3182 = vmatprep.subr.bf16.mxu0 %v3181_v17  ;;  %v7088_v17 = vld [vmem:[#allocation8_spill] sm:$0xff] }
 0x4cc   :  { %3212 = vmatpush3.bf16.msra.mxu1 %v3211_v21 }
 0x4cd   :  { %3214 = vmatprep.subr.bf16.mxu1 %v3213_v54 }
 0x4ce   :  { %3184 = vmatpush3.bf16.msra.mxu0 %v3183_v37 }
 0x4cf   :  { %3186 = vmatprep.subr.bf16.mxu0 %v3185_v25 }
 0x4d0   :  { %3216 = vmatpush3.bf16.msra.mxu1 %v3215_v20 }
 0x4d1   :  { %3218 = vmatprep.subr.bf16.mxu1 %v3217_v27  ;;  %v1979_v27 = vpop.permute.xlu1 %1978 }
 0x4d2   :  { %3188 = vmatpush3.bf16.msra.mxu0 %v3187_v0  ;;  %v7091_v0 = vld [vmem:[#allocation10_spill] sm:$0xff] }
 0x4d3   :  { %3190 = vmatprep.subr.bf16.mxu0 %v3189_v16 }
 0x4d4   :  { %3220 = vmatpush3.bf16.msra.mxu1 %v3219_v11 }
 0x4d5   :  { %3222 = vmatprep.subr.bf16.mxu1 %v3221_v45  ;;  %v7094_v45 = vld [vmem:[#allocation33_spill] sm:$0xff] }
 0x4d6   :  { %3192 = vmatpush3.bf16.msra.mxu0 %v3191_v10 }
 0x4d8   :  { %3224 = vmatpush3.bf16.msra.mxu1 %v3223_v22 }
 0x58c   :  { %v2148_v55 = vpop.f32.mrb[16].mxu0 }
 0x58d   :  { %v3249_v18 = vadd.f32 %v2148_v55, %v1964_v59  ;;  %v2150_v6 = vpop.f32.mrb[17].mxu0 }
 0x58e   :  { %v3250_v30 = vadd.f32 %v2150_v6, %v1964_v59  ;;  %v2326_v42 = vpop.f32.mrb[16].mxu1  ;;  %v7095_v6 = vld [vmem:[#allocation12_spill] sm:$0xff] }
 0x58f   :  { %v2349_v58 = vadd.f32 %v3249_v18, %v7083_v34  ;;  %v3257_v63 = vadd.f32 %v2326_v42, %v1964_v59  ;;  %v2328_v32 = vpop.f32.mrb[17].mxu1 }
 0x590   :  { %v2350_v44 = vadd.f32 %v3250_v30, %v7084_v1  ;;  %v3258_v49 = vadd.f32 %v2328_v32, %v1964_v59  ;;  %v2154_v4 = vpop.f32.mrb[18].mxu0 }
 0x591   :  { %v2351_v46 = vadd.f32 %v3257_v63, %v7085_v8  ;;  %v3251_v47 = vadd.f32 %v2154_v4, %v1969_v39  ;;  %v2156_v60 = vpop.f32.mrb[19].mxu0  ;;  %v2365_v7 = vmax.f32 %v2349_v58, 0.0  ;;  %v7096_v63 = vld [vmem:[#allocation32_spill] sm:$0xff]  ;;  %v7098_v8 = vld [vmem:[#allocation34_spill] sm:$0xff] }
 0x592   :  { %v2366_v53 = vmax.f32 %v2350_v44, 0.0  ;;  %v2352_v9 = vadd.f32 %v3258_v49, %v7086_v28  ;;  %v3252_v29 = vadd.f32 %v2156_v60, %v1969_v39  ;;  %v2332_v15 = vpop.f32.mrb[18].mxu1  ;;  %v7097_v44 = vld [vmem:[#allocation13_spill] sm:$0xff]  ;;  %v2615_v28 = vld [vmem:[%s6497_s8] sm:$0xff] }
 0x593   :  { %v2353_v62 = vadd.f32 %v3251_v47, %v7087_v33  ;;  %v3259_v61 = vadd.f32 %v2332_v15, %v1969_v39  ;;  %v2334_v2 = vpop.f32.mrb[19].mxu1  ;;  %v2367_v54 = vmax.f32 %v2351_v46, 0.0 }
 0x594   :  { %v2368_v14 = vmax.f32 %v2352_v9, 0.0  ;;  %v2354_v31 = vadd.f32 %v3252_v29, %v7088_v17  ;;  %v3260_v5 = vadd.f32 %v2334_v2, %v1969_v39  ;;  %v2160_v21 = vpop.f32.mrb[20].mxu0  ;;  %2509 = vmatprep.mubr.f32.mxu0 %v2366_v53 }
 0x595   :  { %v2355_v56 = vadd.f32 %v3259_v61, %v7089_v52  ;;  %v3253_v37 = vadd.f32 %v2160_v21, %v1974_v51  ;;  %v2162_v20 = vpop.f32.mrb[21].mxu0  ;;  %2510 = vmatmul.mubr.f32.vlgmr.msra.gmra.mrb[24].mxu0 %v2365_v7  ;;  %v2369_v38 = vmax.f32 %v2353_v62, 0.0 }
 0x596   :  { %v2370_v43 = vmax.f32 %v2354_v31, 0.0  ;;  %v2356_v25 = vadd.f32 %v3260_v5, %v7090_v40  ;;  %v3254_v48 = vadd.f32 %v2162_v20, %v1974_v51  ;;  %v2338_v57 = vpop.f32.mrb[20].mxu1  ;;  %2594 = vmatprep.mubr.f32.mxu1 %v2368_v14 }
 0x597   :  { %v2357_v41 = vadd.f32 %v3253_v37, %v7091_v0  ;;  %v3261_v35 = vadd.f32 %v2338_v57, %v1974_v51  ;;  %v2340_v50 = vpop.f32.mrb[21].mxu1  ;;  %2595 = vmatmul.mubr.f32.vlgmr.msra.gmra.mrb[24].mxu1 %v2367_v54  ;;  %v2371_v3 = vmax.f32 %v2355_v56, 0.0 }
 0x598   :  { %v2372_v11 = vmax.f32 %v2356_v25, 0.0  ;;  %v2358_v19 = vadd.f32 %v3254_v48, %v7092_v24  ;;  %v3262_v16 = vadd.f32 %v2340_v50, %v1974_v51  ;;  %v2166_v12 = vpop.f32.mrb[22].mxu0  ;;  %2514 = vmatprep.mubr.f32.mxu0 %v2370_v43  ;;  %v2627_v24 = vpop.permute.xlu1 %2626 }
 0x599   :  { %v2359_v10 = vadd.f32 %v3261_v35, %v7093_v13  ;;  %v3255_v36 = vadd.f32 %v2166_v12, %v1979_v27  ;;  %v2168_v26 = vpop.f32.mrb[23].mxu0  ;;  %2515 = vmatmul.mubr.f32.gmra.mrb[26].mxu0 %v2369_v38  ;;  %v2373_v18 = vmax.f32 %v2357_v41, 0.0 }
 0x59a   :  { %v2374_v23 = vmax.f32 %v2358_v19, 0.0  ;;  %v2360_v22 = vadd.f32 %v3262_v16, %v7094_v45  ;;  %v3256_v59 = vadd.f32 %v2168_v26, %v1979_v27  ;;  %v2344_v55 = vpop.f32.mrb[22].mxu1  ;;  %2599 = vmatprep.mubr.f32.mxu1 %v2372_v11  ;;  %v2616_v11 = vld [vmem:[%s6497_s8 + $0x8] sm:$0x3]  ;;  %v2622_v16 = vpop.permute.xlu0 %2621 }
 0x59b   :  { %v2361_v30 = vadd.f32 %v3255_v36, %v7095_v6  ;;  %v3263_v42 = vadd.f32 %v2344_v55, %v1979_v27  ;;  %v2346_v34 = vpop.f32.mrb[23].mxu1  ;;  %2600 = vmatmul.mubr.f32.gmra.mrb[26].mxu1 %v2371_v3  ;;  %v2375_v1 = vmax.f32 %v2359_v10, 0.0 }
 0x59c   :  { %v2376_v58 = vmax.f32 %v2360_v22, 0.0  ;;  %v2362_v32 = vadd.f32 %v3256_v59, %v7096_v63  ;;  %v3264_v39 = vadd.f32 %v2346_v34, %v1979_v27  ;;  %2519 = vmatprep.mubr.f32.mxu0 %v2374_v23 }
 0x59d   :  { %v2363_v49 = vadd.f32 %v3263_v42, %v7097_v44  ;;  %2520 = vmatmul.mubr.f32.gmra.mrb[28].mxu0 %v2373_v18  ;;  %v2377_v47 = vmax.f32 %v2361_v30, 0.0 }
 0x59e   :  { %v2378_v4 = vmax.f32 %v2362_v32, 0.0  ;;  %v2364_v46 = vadd.f32 %v3264_v39, %v7098_v8  ;;  %2604 = vmatprep.mubr.f32.mxu1 %v2376_v58 }
 0x59f   :  { %2605 = vmatmul.mubr.f32.gmra.mrb[28].mxu1 %v2375_v1  ;;  %v2379_v53 = vmax.f32 %v2363_v49, 0.0 }
 0x5a0   :  { %v2380_v60 = vmax.f32 %v2364_v46, 0.0  ;;  %2524 = vmatprep.mubr.f32.mxu0 %v2378_v4 }
 0x5a1   :  { %2525 = vmatmul.mubr.f32.gmra.mrb[30].mxu0 %v2377_v47 }
 0x5a2   :  { %2609 = vmatprep.mubr.f32.mxu1 %v2380_v60  ;;  %2854 = vmatprep.mubr.msk.f32.mxu0 %vm1032_vm10, %v2615_v28 }
 0x5a3   :  { %2610 = vmatmul.mubr.f32.gmra.mrb[30].mxu1 %v2379_v53 }
 0x668   :  { %v2784_v9 = vpop.f32.mrb[24].mxu0 }
 0x669   :  { %v2785_v29 = vpop.f32.mrb[25].mxu0 }
 0x66a   :  { %v2786_v15 = vadd.f32 %v2785_v29, %v2784_v9  ;;  %v2828_v7 = vpop.f32.mrb[24].mxu1 }
 0x66b   :  { %v2829_v33 = vpop.f32.mrb[25].mxu1 }
 0x66c   :  { %v2830_v62 = vadd.f32 %v2829_v33, %v2828_v7  ;;  %v2787_v61 = vpop.f32.mrb[26].mxu0 }
 0x66d   :  { %v2788_v2 = vpop.f32.mrb[27].mxu0 }
 0x66e   :  { %v2597_v51 = vadd.f32 %v2830_v62, %v2786_v15  ;;  %v2789_v14 = vadd.f32 %v2788_v2, %v2787_v61  ;;  %v2831_v17 = vpop.f32.mrb[26].mxu1 }
 0x66f   :  { %v2832_v31 = vpop.f32.mrb[27].mxu1 }
 0x670   :  { %v2833_v5 = vadd.f32 %v2832_v31, %v2831_v17  ;;  %v2790_v21 = vpop.f32.mrb[28].mxu0 }
 0x671   :  { %v2791_v54 = vpop.f32.mrb[29].mxu0 }
 0x672   :  { %v2602_v52 = vadd.f32 %v2833_v5, %v2789_v14  ;;  %v2792_v56 = vadd.f32 %v2791_v54, %v2790_v21  ;;  %v2834_v37 = vpop.f32.mrb[28].mxu1 }
 0x673   :  { %v2835_v20 = vpop.f32.mrb[29].mxu1 }
 0x674   :  { %v2836_v43 = vadd.f32 %v2835_v20, %v2834_v37  ;;  %v2793_v40 = vpop.f32.mrb[30].mxu0  ;;  %v3225_v25 = vpack.c.bf16 %v2602_v52, %v2597_v51 }
 0x675   :  { %v2794_v48 = vpop.f32.mrb[31].mxu0 }
 0x676   :  { %v2607_v57 = vadd.f32 %v2836_v43, %v2792_v56  ;;  %v2795_v38 = vadd.f32 %v2794_v48, %v2793_v40  ;;  %v2837_v0 = vpop.f32.mrb[30].mxu1  ;;  %3226 = vmatprep.subr.bf16.mxu0 %v3225_v25 }
 0x677   :  { %v2838_v41 = vpop.f32.mrb[31].mxu1  ;;  %3228 = vmatpush3.bf16.msra.mxu0 %v3225_v25 }
 0x678   :  { %v2839_v35 = vadd.f32 %v2838_v41, %v2837_v0 }
 0x67a   :  { %v2612_v50 = vadd.f32 %v2839_v35, %v2795_v38 }
 0x67c   :  { %v3229_v27 = vpack.c.bf16 %v2612_v50, %v2607_v57 }
 0x67e   :  { %3230 = vmatprep.subr.bf16.mxu0 %v3229_v27 }
 0x67f   :  { %3232 = vmatpush3.bf16.msra.mxu0 %v3229_v27 }
 0x682   :  { %2855 = vmatmul.mubr.msk.f32.vlgmr.msra.gmra.mrb[32].mxu0 %vm1032_vm10, %v2616_v11 }
 0x755   :  { %v2856_v19 = vpop.f32.mrb[32].mxu0 }
 0x756   :  { %v2707_v12 = vadd.f32 %v2856_v19, %v2627_v24  ;;  %v2701_v3 = vpop.f32.mrb[33].mxu0 }
 0x757   :  { %v2702_v13 = vadd.f32 %v2701_v3, %v2622_v16 }
 0x758   :  { %2713 = vst.msk [vmem:[%s6498_s11 + $0x8] sm:$0x3] %vm2712_vm11, %v2707_v12 }
 0x759   :  { %2711 = vst.msk [vmem:[%s6498_s11] sm:$0xff] %vm2710_vm12, %v2702_v13 }

</bundles_post_ra>
